<compile_context>
chip_gen: v7x
topology: tpu7x:2x2x1
jax: 0.10.0
libtpu: 0.0.40
codegen_flags: <defaults>
</compile_context>

<pallas_src>
import functools

import jax
import jax.numpy as jnp
import numpy as np
from jax.experimental import pallas as pl
from jax.experimental.pallas import tpu as pltpu


DEFAULT_VMEM_LIMIT = 48 * 1024 * 1024


# --------------------------------------------------------------------------------------
# Helpers
# --------------------------------------------------------------------------------------
def _layer_norm(x, gamma, beta, eps):
    x = x.astype(jnp.float32)
    mu = jnp.mean(x, axis=-1, keepdims=True)
    var = jnp.mean((x - mu) ** 2, axis=-1, keepdims=True)
    return (x - mu) * jax.lax.rsqrt(var + eps) * gamma + beta


def _pick_tile(n, cap, multiple_of=1):
    """Largest divisor of n that is <= cap; a tile < n must be a multiple of
    `multiple_of` (TPU (8,128) block constraint on non-full dims)."""
    if n <= cap:
        return n
    candidates = [d for d in range(1, n) if n % d == 0 and d <= cap
                  and d % multiple_of == 0]
    return max(candidates) if candidates else n


def _choose_s_tile(S, L, c_m, H, ch, budget_bytes=16 * 1024 * 1024):
    # rough f32 bytes of live per-S-row state inside the MSA kernel
    per_row = 4 * L * (2 * c_m + 4 * H * ch)
    cap = max(1, budget_bytes // max(per_row, 1))
    return _pick_tile(S, cap)


def _choose_i_tile(L, c_z, H, budget_bytes=16 * 1024 * 1024):
    per_row = 4 * L * (3 * c_z + 4 * H)
    cap = max(1, budget_bytes // max(per_row, 1))
    return _pick_tile(L, cap, multiple_of=8)


# --------------------------------------------------------------------------------------
# Pass 1: pair representation -> per-head masked softmax weights  (once per batch)
# --------------------------------------------------------------------------------------
def _pair_softmax_kernel(z_ref, mask_ref, wz_t_ref, gz_ref, bz_ref, w_ref, *,
                         inf, eps, compute_dtype):
    z = z_ref[0]                                   # [Lt, L, c_z]
    mask = mask_ref[0].astype(jnp.float32)         # [Lt, L]
    Lt, L, c_z = z.shape
    H = wz_t_ref.shape[-1]

    z_n = _layer_norm(z, gz_ref[...], bz_ref[...], eps)
    z2 = z_n.reshape(Lt * L, c_z).astype(compute_dtype)

    # bias for all heads: [Lt*L, H]
    b_all = jnp.dot(z2, wz_t_ref[...],
                    preferred_element_type=jnp.float32).reshape(Lt, L, H)
    neg = (1.0 - mask) * (-inf)                    # [Lt, L]

    # Per-head masked softmax.  H is tiny and this kernel runs once per batch
    # (i-tile), not once per S-tile, so the static head loop is essentially free.
    # Each softmax is lane-dense: the reduction axis j sits on the lane axis.
    for h in range(H):
        b_h = b_all[:, :, h] + neg                 # [Lt, L]
        b_max = jnp.max(b_h, axis=-1, keepdims=True)
        e = jnp.exp(b_h - b_max)
        w_h = e / jnp.sum(e, axis=-1, keepdims=True)
        w_ref[0, h] = w_h.astype(w_ref.dtype)


# --------------------------------------------------------------------------------------
# Pass 2: MSA update, tiled over (batch, S-tiles)
# --------------------------------------------------------------------------------------
def _msa_update_kernel(w_ref, m_ref, wm_t_ref, wg_t_ref, wo_t_ref,
                       gm_ref, bm_ref, o_ref, *, num_heads, c_h, eps,
                       compute_dtype):
    m = m_ref[0]                                   # [St, L, c_m]
    St, L, c_m = m.shape
    H, ch = num_heads, c_h

    m_n = _layer_norm(m, gm_ref[...], bm_ref[...], eps)
    m2 = m_n.reshape(St * L, c_m).astype(compute_dtype)

    # Fused projections for all heads (single MXU feeds, N = H*ch).
    v2 = jnp.dot(m2, wm_t_ref[...], preferred_element_type=jnp.float32)   # [St*L, H*ch]
    g2 = jax.nn.sigmoid(
        jnp.dot(m2, wg_t_ref[...], preferred_element_type=jnp.float32))   # [St*L, H*ch]

    # Rearrange v to [H, Lj, St*ch] so the weighted average is ONE H-batched
    # matmul with full-width N = St*ch (instead of H matmuls with N = ch).
    v_r = jnp.transpose(v2.reshape(St, L, H, ch), (2, 1, 0, 3))
    v_r = v_r.reshape(H, L, St * ch).astype(compute_dtype)

    w = w_ref[0].astype(compute_dtype)             # [H, Li, Lj]
    o = jax.lax.dot_general(
        w, v_r,
        dimension_numbers=(((2,), (1,)), ((0,), (0,))),
        preferred_element_type=jnp.float32)        # [H, Li, St*ch]

    # Single transpose back to [St*L, H*ch] rows (matches g2's row ordering).
    o_t = jnp.transpose(o.reshape(H, L, St, ch), (2, 1, 0, 3)).reshape(St * L, H * ch)

    # Gate and ONE fused output projection (K = H*ch).
    gated = (g2 * o_t).astype(compute_dtype)
    out = jnp.dot(gated, wo_t_ref[...], preferred_element_type=jnp.float32)  # [St*L, c_m]
    o_ref[0] = out.reshape(St, L, c_m).astype(o_ref.dtype)


# --------------------------------------------------------------------------------------
# Wrapper
# --------------------------------------------------------------------------------------
def pair_weighted_averaging(m, z, mask, params, *, num_heads, c_h,
                            inf=1e6, eps=1e-5, compute_dtype=jnp.bfloat16,
                            s_tile=None, i_tile=None,
                            vmem_limit_bytes=DEFAULT_VMEM_LIMIT):
    B, S, L, c_m = m.shape
    c_z = z.shape[-1]
    H, ch = num_heads, c_h
    assert params["wm"].shape == (H * ch, c_m)
    assert params["wg"].shape == (H * ch, c_m)
    assert params["wz"].shape == (H, c_z)
    assert params["wo"].shape == (c_m, H * ch)

    # Pre-transposed weights: plain [K, N] MXU feeds (no in-kernel .T), cast once
    # to the MXU input dtype.  LN params stay f32 (VPU math stays f32 everywhere).
    wm_t = jnp.asarray(params["wm"]).T.astype(compute_dtype)      # [c_m, H*ch]
    wg_t = jnp.asarray(params["wg"]).T.astype(compute_dtype)      # [c_m, H*ch]
    wz_t = jnp.asarray(params["wz"]).T.astype(compute_dtype)      # [c_z, H]
    wo_t = jnp.asarray(params["wo"]).T.astype(compute_dtype)      # [H*ch, c_m]
    gm = jnp.asarray(params["gm"], jnp.float32).reshape(1, c_m)
    bm = jnp.asarray(params["bm"], jnp.float32).reshape(1, c_m)
    gz = jnp.asarray(params["gz"], jnp.float32).reshape(1, c_z)
    bz = jnp.asarray(params["bz"], jnp.float32).reshape(1, c_z)

    Lt = i_tile if i_tile is not None else _choose_i_tile(L, c_z, H)
    St = s_tile if s_tile is not None else _choose_s_tile(S, L, c_m, H, ch)
    assert L % Lt == 0 and S % St == 0

    # ---- Pass 1: pair -> per-head softmax weights, once per batch ----
    pair_kernel = functools.partial(_pair_softmax_kernel, inf=inf, eps=eps,
                                    compute_dtype=compute_dtype)
    w_attn = pl.pallas_call(
        pair_kernel,
        out_shape=jax.ShapeDtypeStruct((B, H, L, L), compute_dtype),
        grid_spec=pltpu.PrefetchScalarGridSpec(
            num_scalar_prefetch=0,
            grid=(B, L // Lt),
            in_specs=[
                pl.BlockSpec((1, Lt, L, c_z), lambda b, i: (b, i, 0, 0)),   # z
                pl.BlockSpec((1, Lt, L), lambda b, i: (b, i, 0)),           # mask
                pl.BlockSpec((c_z, H), lambda b, i: (0, 0)),                # wz_t
                pl.BlockSpec((1, c_z), lambda b, i: (0, 0)),                # gz
                pl.BlockSpec((1, c_z), lambda b, i: (0, 0)),                # bz
            ],
            out_specs=pl.BlockSpec((1, H, Lt, L), lambda b, i: (b, 0, i, 0)),
        ),
        compiler_params=pltpu.CompilerParams(
            dimension_semantics=("parallel", "parallel"),
            vmem_limit_bytes=vmem_limit_bytes),
    )(z, mask, wz_t, gz, bz)

    # ---- Pass 2: MSA update, tiled over (batch, S-tiles) ----
    msa_kernel = functools.partial(_msa_update_kernel, num_heads=H, c_h=ch,
                                   eps=eps, compute_dtype=compute_dtype)
    out = pl.pallas_call(
        msa_kernel,
        out_shape=jax.ShapeDtypeStruct((B, S, L, c_m), m.dtype),
        grid_spec=pltpu.PrefetchScalarGridSpec(
            num_scalar_prefetch=0,
            grid=(B, S // St),
            in_specs=[
                pl.BlockSpec((1, H, L, L), lambda b, s: (b, 0, 0, 0)),      # softmax w
                pl.BlockSpec((1, St, L, c_m), lambda b, s: (b, s, 0, 0)),   # m
                pl.BlockSpec((c_m, H * ch), lambda b, s: (0, 0)),           # wm_t
                pl.BlockSpec((c_m, H * ch), lambda b, s: (0, 0)),           # wg_t
                pl.BlockSpec((H * ch, c_m), lambda b, s: (0, 0)),           # wo_t
                pl.BlockSpec((1, c_m), lambda b, s: (0, 0)),                # gm
                pl.BlockSpec((1, c_m), lambda b, s: (0, 0)),                # bm
            ],
            out_specs=pl.BlockSpec((1, St, L, c_m), lambda b, s: (b, s, 0, 0)),
        ),
        compiler_params=pltpu.CompilerParams(
            dimension_semantics=("parallel", "parallel"),
            vmem_limit_bytes=vmem_limit_bytes),
    )(w_attn, m, wm_t, wg_t, wo_t, gm, bm)
    return out


# --------------------------------------------------------------------------------------
# Pure-JAX reference (mirrors the PyTorch forward, non-chunked branch)
# --------------------------------------------------------------------------------------
def reference(m, z, mask, params, num_heads, c_h, inf=1e6, eps=1e-5):
    def ln(x, g, b):
        mu = x.mean(-1, keepdims=True)
        var = ((x - mu) ** 2).mean(-1, keepdims=True)
        return (x - mu) / jnp.sqrt(var + eps) * g + b

    B, S, L, c_m = m.shape
    H, ch = num_heads, c_h
    m_n = ln(m, params["gm"], params["bm"])
    z_n = ln(z, params["gz"], params["bz"])
    v = (m_n @ params["wm"].T).reshape(B, S, L, H, ch)
    v = jnp.transpose(v, (0, 3, 1, 2, 4))                       # b h s j d
    b_ = jnp.transpose(z_n @ params["wz"].T, (0, 3, 1, 2))      # b h i j
    b_ = b_ + (1.0 - mask[:, None]) * (-inf)
    w = jax.nn.softmax(b_, axis=-1)
    g = jax.nn.sigmoid(m_n @ params["wg"].T)
    o = jnp.einsum("bhij,bhsjd->bhsid", w, v)
    o = jnp.transpose(o, (0, 2, 3, 1, 4)).reshape(B, S, L, H * ch)
    return (g * o) @ params["wo"].T


if __name__ == "__main__":
    B, S, L = 2, 8, 16
    c_m, c_z, c_h, H = 32, 16, 8, 4

    key = jax.random.PRNGKey(0)
    ks = jax.random.split(key, 8)
    m = jax.random.normal(ks[0], (B, S, L, c_m), dtype=jnp.float32)
    z = jax.random.normal(ks[1], (B, L, L, c_z), dtype=jnp.float32)
    mask = (jax.random.uniform(ks[2], (B, L, L)) > 0.2).astype(jnp.float32)

    # Deterministic parameter init. NOTE: the PyTorch module zero-inits proj_o
    # (final_init_); we use small random values so the test output is non-trivial.
    params = dict(
        wm=0.1 * jax.random.normal(ks[3], (H * c_h, c_m), dtype=jnp.float32),
        wg=0.1 * jax.random.normal(ks[4], (H * c_h, c_m), dtype=jnp.float32),
        wz=0.1 * jax.random.normal(ks[5], (H, c_z), dtype=jnp.float32),
        wo=0.1 * jax.random.normal(ks[6], (c_m, H * c_h), dtype=jnp.float32),
        gm=jnp.ones((c_m,), jnp.float32), bm=jnp.zeros((c_m,), jnp.float32),
        gz=jnp.ones((c_z,), jnp.float32), bz=jnp.zeros((c_z,), jnp.float32),
    )

    ref = reference(m, z, mask, params, H, c_h)

    # Exact-precision path (f32 MXU inputs): must match the reference tightly.
    out_f32 = pair_weighted_averaging(m, z, mask, params, num_heads=H, c_h=c_h,
                                      compute_dtype=jnp.float32)
    out_f32 = jax.block_until_ready(out_f32)
    assert out_f32.shape == (B, S, L, c_m)
    assert np.allclose(np.asarray(out_f32), np.asarray(ref), atol=1e-3, rtol=1e-3), \
        "Pallas kernel (f32) does not match reference"

    # Fast path (bf16 MXU inputs, f32 accumulation) -- default for v6e/v7x.
    out_bf16 = pair_weighted_averaging(m, z, mask, params, num_heads=H, c_h=c_h,
                                       compute_dtype=jnp.bfloat16)
    out_bf16 = jax.block_until_ready(out_bf16)
    assert np.allclose(np.asarray(out_bf16), np.asarray(ref), atol=3e-2, rtol=3e-2), \
        "Pallas kernel (bf16) does not match reference"

    print("KERNEL_OK")
</pallas_src>

<mosaic_0001>
module attributes {stable_mosaic.version = 11 : i64} {
  func.func @_pair_softmax_kernel(%arg0: i32, %arg1: i32, %arg2: memref<1x16x16x16xf32, #tpu.memory_space<vmem>>, %arg3: memref<1x16x16xf32, #tpu.memory_space<vmem>>, %arg4: memref<16x4xf32, #tpu.memory_space<vmem>>, %arg5: memref<1x16xf32, #tpu.memory_space<vmem>>, %arg6: memref<1x16xf32, #tpu.memory_space<vmem>>, %arg7: memref<1x4x16x16xf32, #tpu.memory_space<vmem>>) attributes {dimension_semantics = [#tpu.dimension_semantics<parallel>, #tpu.dimension_semantics<parallel>], iteration_bounds = array<i64: 2, 1>, scalar_prefetch = 0 : i64, scratch_operands = 0 : i64, tpu.core_type = #tpu.core_type<tc>, window_params = [{transform_indices = @transform_0, window_bounds = array<i64: 1, 16, 16, 16>}, {transform_indices = @transform_1, window_bounds = array<i64: 1, 16, 16>}, {pipeline_mode = #tpu.pipeline_mode<synchronous>, transform_indices = @transform_2, window_bounds = array<i64: 16, 4>}, {pipeline_mode = #tpu.pipeline_mode<synchronous>, transform_indices = @transform_3, window_bounds = array<i64: 1, 16>}, {pipeline_mode = #tpu.pipeline_mode<synchronous>, transform_indices = @transform_4, window_bounds = array<i64: 1, 16>}, {transform_indices = @transform_5, window_bounds = array<i64: 1, 4, 16, 16>}]} {
    %c0 = arith.constant 0 : index
    %c0_0 = arith.constant 0 : index
    %c0_1 = arith.constant 0 : index
    %c0_2 = arith.constant 0 : index
    %0 = vector.load %arg2[%c0, %c0_0, %c0_1, %c0_2] : memref<1x16x16x16xf32, #tpu.memory_space<vmem>>, vector<1x16x16x16xf32>
    %1 = vector.shape_cast %0 : vector<1x16x16x16xf32> to vector<16x16x16xf32>
    %c0_3 = arith.constant 0 : index
    %c0_4 = arith.constant 0 : index
    %c0_5 = arith.constant 0 : index
    %2 = vector.load %arg3[%c0_3, %c0_4, %c0_5] : memref<1x16x16xf32, #tpu.memory_space<vmem>>, vector<1x16x16xf32>
    %3 = vector.shape_cast %2 : vector<1x16x16xf32> to vector<16x16xf32>
    %c0_6 = arith.constant 0 : index
    %c0_7 = arith.constant 0 : index
    %4 = vector.load %arg5[%c0_6, %c0_7] : memref<1x16xf32, #tpu.memory_space<vmem>>, vector<1x16xf32>
    %c0_8 = arith.constant 0 : index
    %c0_9 = arith.constant 0 : index
    %5 = vector.load %arg6[%c0_8, %c0_9] : memref<1x16xf32, #tpu.memory_space<vmem>>, vector<1x16xf32>
    %cst = arith.constant dense<0.000000e+00> : vector<16x16xf32>
    %6 = vector.multi_reduction <add>, %1, %cst [2] : vector<16x16x16xf32> to vector<16x16xf32>
    %7 = vector.shape_cast %6 : vector<16x16xf32> to vector<16x16x1xf32>
    %cst_10 = arith.constant 1.600000e+01 : f32
    %8 = vector.broadcast %cst_10 : f32 to vector<16x16x1xf32>
    %9 = arith.divf %7, %8 : vector<16x16x1xf32>
    %10 = vector.broadcast %9 : vector<16x16x1xf32> to vector<16x16x16xf32>
    %11 = arith.subf %1, %10 : vector<16x16x16xf32>
    %12 = arith.mulf %11, %11 : vector<16x16x16xf32>
    %cst_11 = arith.constant dense<0.000000e+00> : vector<16x16xf32>
    %13 = vector.multi_reduction <add>, %12, %cst_11 [2] : vector<16x16x16xf32> to vector<16x16xf32>
    %14 = vector.shape_cast %13 : vector<16x16xf32> to vector<16x16x1xf32>
    %cst_12 = arith.constant 1.600000e+01 : f32
    %15 = vector.broadcast %cst_12 : f32 to vector<16x16x1xf32>
    %16 = arith.divf %14, %15 : vector<16x16x1xf32>
    %17 = vector.broadcast %9 : vector<16x16x1xf32> to vector<16x16x16xf32>
    %18 = arith.subf %1, %17 : vector<16x16x16xf32>
    %cst_13 = arith.constant 9.99999974E-6 : f32
    %19 = vector.broadcast %cst_13 : f32 to vector<16x16x1xf32>
    %20 = arith.addf %16, %19 : vector<16x16x1xf32>
    %21 = math.rsqrt %20 : vector<16x16x1xf32>
    %22 = vector.broadcast %21 : vector<16x16x1xf32> to vector<16x16x16xf32>
    %23 = arith.mulf %18, %22 : vector<16x16x16xf32>
    %24 = vector.shape_cast %4 : vector<1x16xf32> to vector<1x1x16xf32>
    %25 = vector.broadcast %24 : vector<1x1x16xf32> to vector<16x16x16xf32>
    %26 = arith.mulf %23, %25 : vector<16x16x16xf32>
    %27 = vector.shape_cast %5 : vector<1x16xf32> to vector<1x1x16xf32>
    %28 = vector.broadcast %27 : vector<1x1x16xf32> to vector<16x16x16xf32>
    %29 = arith.addf %26, %28 : vector<16x16x16xf32>
    %30 = vector.shape_cast %29 : vector<16x16x16xf32> to vector<256x16xf32>
    %c0_14 = arith.constant 0 : index
    %c0_15 = arith.constant 0 : index
    %31 = vector.load %arg4[%c0_14, %c0_15] : memref<16x4xf32, #tpu.memory_space<vmem>>, vector<16x4xf32>
    %cst_16 = arith.constant dense<0.000000e+00> : vector<256x4xf32>
    %32 = tpu.matmul %30, %31, %cst_16 {dimension_numbers = #tpu.dot_dimension_numbers<[1], [0], [0], [1], [0, 0, 1, 1], [], []>} : vector<256x16xf32>, vector<16x4xf32>, vector<256x4xf32> -> vector<256x4xf32>
    %33 = vector.shape_cast %32 : vector<256x4xf32> to vector<16x16x4xf32>
    %cst_17 = arith.constant 1.000000e+00 : f32
    %34 = vector.broadcast %cst_17 : f32 to vector<16x16xf32>
    %35 = arith.subf %34, %3 : vector<16x16xf32>
    %cst_18 = arith.constant -1.000000e+06 : f32
    %36 = vector.broadcast %cst_18 : f32 to vector<16x16xf32>
    %37 = arith.mulf %35, %36 : vector<16x16xf32>
    %38 = vector.extract_strided_slice %33 {offsets = [0, 0, 0], sizes = [16, 16, 1], strides = [1, 1, 1]} : vector<16x16x4xf32> to vector<16x16x1xf32>
    %39 = vector.shape_cast %38 : vector<16x16x1xf32> to vector<16x16xf32>
    %40 = arith.addf %39, %37 : vector<16x16xf32>
    %cst_19 = arith.constant dense<0xFF800000> : vector<16xf32>
    %41 = vector.multi_reduction <maximumf>, %40, %cst_19 [1] : vector<16x16xf32> to vector<16xf32>
    %42 = vector.shape_cast %41 : vector<16xf32> to vector<16x1xf32>
    %43 = vector.broadcast %42 : vector<16x1xf32> to vector<16x16xf32>
    %44 = arith.subf %40, %43 : vector<16x16xf32>
    %45 = math.exp %44 : vector<16x16xf32>
    %cst_20 = arith.constant dense<0.000000e+00> : vector<16xf32>
    %46 = vector.multi_reduction <add>, %45, %cst_20 [1] : vector<16x16xf32> to vector<16xf32>
    %47 = vector.shape_cast %46 : vector<16xf32> to vector<16x1xf32>
    %48 = vector.broadcast %47 : vector<16x1xf32> to vector<16x16xf32>
    %49 = arith.divf %45, %48 : vector<16x16xf32>
    %c0_21 = arith.constant 0 : index
    %c0_22 = arith.constant 0 : index
    %c0_23 = arith.constant 0 : index
    %c0_24 = arith.constant 0 : index
    %50 = vector.load %arg7[%c0_21, %c0_22, %c0_23, %c0_24] : memref<1x4x16x16xf32, #tpu.memory_space<vmem>>, vector<1x1x16x16xf32>
    %51 = vector.shape_cast %50 : vector<1x1x16x16xf32> to vector<16x16xf32>
    %52 = vector.shape_cast %49 : vector<16x16xf32> to vector<1x1x16x16xf32>
    tpu.vector_store %arg7[%c0_21, %c0_22, %c0_23, %c0_24], %52 {strides = array<i32>} : memref<1x4x16x16xf32, #tpu.memory_space<vmem>>, vector<1x1x16x16xf32>,
    %53 = vector.extract_strided_slice %33 {offsets = [0, 0, 1], sizes = [16, 16, 1], strides = [1, 1, 1]} : vector<16x16x4xf32> to vector<16x16x1xf32>
    %54 = vector.shape_cast %53 : vector<16x16x1xf32> to vector<16x16xf32>
    %55 = arith.addf %54, %37 : vector<16x16xf32>
    %cst_25 = arith.constant dense<0xFF800000> : vector<16xf32>
    %56 = vector.multi_reduction <maximumf>, %55, %cst_25 [1] : vector<16x16xf32> to vector<16xf32>
    %57 = vector.shape_cast %56 : vector<16xf32> to vector<16x1xf32>
    %58 = vector.broadcast %57 : vector<16x1xf32> to vector<16x16xf32>
    %59 = arith.subf %55, %58 : vector<16x16xf32>
    %60 = math.exp %59 : vector<16x16xf32>
    %cst_26 = arith.constant dense<0.000000e+00> : vector<16xf32>
    %61 = vector.multi_reduction <add>, %60, %cst_26 [1] : vector<16x16xf32> to vector<16xf32>
    %62 = vector.shape_cast %61 : vector<16xf32> to vector<16x1xf32>
    %63 = vector.broadcast %62 : vector<16x1xf32> to vector<16x16xf32>
    %64 = arith.divf %60, %63 : vector<16x16xf32>
    %c0_27 = arith.constant 0 : index
    %c1 = arith.constant 1 : index
    %c0_28 = arith.constant 0 : index
    %c0_29 = arith.constant 0 : index
    %65 = vector.load %arg7[%c0_27, %c1, %c0_28, %c0_29] : memref<1x4x16x16xf32, #tpu.memory_space<vmem>>, vector<1x1x16x16xf32>
    %66 = vector.shape_cast %65 : vector<1x1x16x16xf32> to vector<16x16xf32>
    %67 = vector.shape_cast %64 : vector<16x16xf32> to vector<1x1x16x16xf32>
    tpu.vector_store %arg7[%c0_27, %c1, %c0_28, %c0_29], %67 {strides = array<i32>} : memref<1x4x16x16xf32, #tpu.memory_space<vmem>>, vector<1x1x16x16xf32>,
    %68 = vector.extract_strided_slice %33 {offsets = [0, 0, 2], sizes = [16, 16, 1], strides = [1, 1, 1]} : vector<16x16x4xf32> to vector<16x16x1xf32>
    %69 = vector.shape_cast %68 : vector<16x16x1xf32> to vector<16x16xf32>
    %70 = arith.addf %69, %37 : vector<16x16xf32>
    %cst_30 = arith.constant dense<0xFF800000> : vector<16xf32>
    %71 = vector.multi_reduction <maximumf>, %70, %cst_30 [1] : vector<16x16xf32> to vector<16xf32>
    %72 = vector.shape_cast %71 : vector<16xf32> to vector<16x1xf32>
    %73 = vector.broadcast %72 : vector<16x1xf32> to vector<16x16xf32>
    %74 = arith.subf %70, %73 : vector<16x16xf32>
    %75 = math.exp %74 : vector<16x16xf32>
    %cst_31 = arith.constant dense<0.000000e+00> : vector<16xf32>
    %76 = vector.multi_reduction <add>, %75, %cst_31 [1] : vector<16x16xf32> to vector<16xf32>
    %77 = vector.shape_cast %76 : vector<16xf32> to vector<16x1xf32>
    %78 = vector.broadcast %77 : vector<16x1xf32> to vector<16x16xf32>
    %79 = arith.divf %75, %78 : vector<16x16xf32>
    %c0_32 = arith.constant 0 : index
    %c2 = arith.constant 2 : index
    %c0_33 = arith.constant 0 : index
    %c0_34 = arith.constant 0 : index
    %80 = vector.load %arg7[%c0_32, %c2, %c0_33, %c0_34] : memref<1x4x16x16xf32, #tpu.memory_space<vmem>>, vector<1x1x16x16xf32>
    %81 = vector.shape_cast %80 : vector<1x1x16x16xf32> to vector<16x16xf32>
    %82 = vector.shape_cast %79 : vector<16x16xf32> to vector<1x1x16x16xf32>
    tpu.vector_store %arg7[%c0_32, %c2, %c0_33, %c0_34], %82 {strides = array<i32>} : memref<1x4x16x16xf32, #tpu.memory_space<vmem>>, vector<1x1x16x16xf32>,
    %83 = vector.extract_strided_slice %33 {offsets = [0, 0, 3], sizes = [16, 16, 1], strides = [1, 1, 1]} : vector<16x16x4xf32> to vector<16x16x1xf32>
    %84 = vector.shape_cast %83 : vector<16x16x1xf32> to vector<16x16xf32>
    %85 = arith.addf %84, %37 : vector<16x16xf32>
    %cst_35 = arith.constant dense<0xFF800000> : vector<16xf32>
    %86 = vector.multi_reduction <maximumf>, %85, %cst_35 [1] : vector<16x16xf32> to vector<16xf32>
    %87 = vector.shape_cast %86 : vector<16xf32> to vector<16x1xf32>
    %88 = vector.broadcast %87 : vector<16x1xf32> to vector<16x16xf32>
    %89 = arith.subf %85, %88 : vector<16x16xf32>
    %90 = math.exp %89 : vector<16x16xf32>
    %cst_36 = arith.constant dense<0.000000e+00> : vector<16xf32>
    %91 = vector.multi_reduction <add>, %90, %cst_36 [1] : vector<16x16xf32> to vector<16xf32>
    %92 = vector.shape_cast %91 : vector<16xf32> to vector<16x1xf32>
    %93 = vector.broadcast %92 : vector<16x1xf32> to vector<16x16xf32>
    %94 = arith.divf %90, %93 : vector<16x16xf32>
    %c0_37 = arith.constant 0 : index
    %c3 = arith.constant 3 : index
    %c0_38 = arith.constant 0 : index
    %c0_39 = arith.constant 0 : index
    %95 = vector.load %arg7[%c0_37, %c3, %c0_38, %c0_39] : memref<1x4x16x16xf32, #tpu.memory_space<vmem>>, vector<1x1x16x16xf32>
    %96 = vector.shape_cast %95 : vector<1x1x16x16xf32> to vector<16x16xf32>
    %97 = vector.shape_cast %94 : vector<16x16xf32> to vector<1x1x16x16xf32>
    tpu.vector_store %arg7[%c0_37, %c3, %c0_38, %c0_39], %97 {strides = array<i32>} : memref<1x4x16x16xf32, #tpu.memory_space<vmem>>, vector<1x1x16x16xf32>,
    return
  }
  func.func @transform_0(%arg0: i32, %arg1: i32) -> (i32, i32, i32, i32) {
    %c0_i32 = arith.constant 0 : i32
    %c0_i32_0 = arith.constant 0 : i32
    %c0_i32_1 = arith.constant 0 : i32
    return %arg0, %arg1, %c0_i32, %c0_i32_0 : i32, i32, i32, i32
  }
  func.func @transform_1(%arg0: i32, %arg1: i32) -> (i32, i32, i32) {
    %c0_i32 = arith.constant 0 : i32
    %c0_i32_0 = arith.constant 0 : i32
    return %arg0, %arg1, %c0_i32 : i32, i32, i32
  }
  func.func @transform_2(%arg0: i32, %arg1: i32) -> (i32, i32) {
    %c0_i32 = arith.constant 0 : i32
    %c0_i32_0 = arith.constant 0 : i32
    %c0_i32_1 = arith.constant 0 : i32
    return %c0_i32, %c0_i32_0 : i32, i32
  }
  func.func @transform_3(%arg0: i32, %arg1: i32) -> (i32, i32) {
    %c0_i32 = arith.constant 0 : i32
    %c0_i32_0 = arith.constant 0 : i32
    %c0_i32_1 = arith.constant 0 : i32
    return %c0_i32, %c0_i32_0 : i32, i32
  }
  func.func @transform_4(%arg0: i32, %arg1: i32) -> (i32, i32) {
    %c0_i32 = arith.constant 0 : i32
    %c0_i32_0 = arith.constant 0 : i32
    %c0_i32_1 = arith.constant 0 : i32
    return %c0_i32, %c0_i32_0 : i32, i32
  }
  func.func @transform_5(%arg0: i32, %arg1: i32) -> (i32, i32, i32, i32) {
    %c0_i32 = arith.constant 0 : i32
    %c0_i32_0 = arith.constant 0 : i32
    %c0_i32_1 = arith.constant 0 : i32
    return %arg0, %c0_i32, %arg1, %c0_i32_0 : i32, i32, i32, i32
  }
}

</mosaic_0001>

<bundles_post_ra>
// kernel: tpu_custom_call.1
= control target key start
LH: loop header
LB: loop body
LE: loop exit
PB: predicated region body
PF: predicated region fallthrough
CT: control target
= control target key end

     0   :  { %s10604_s0 = inlined_call_operand.hbm [shape: f32[2,16,16,16], index: 0, kind: input, shape index: {}]   ;;  %s10605_s1 = inlined_call_operand.hbm [shape: f32[2,16,16], index: 1, kind: input, shape index: {}]   ;;  %s10606_s2 = inlined_call_operand.vmem [shape: f32[16,4], index: 2, kind: input, shape index: {}]   ;;  %s10607_s3 = inlined_call_operand.vmem [shape: f32[1,16], index: 3, kind: input, shape index: {}]   ;;  %s10608_s4 = inlined_call_operand.vmem [shape: f32[1,16], index: 4, kind: input, shape index: {}]   ;;  %s10609_s5 = inlined_call_operand.hbm [shape: f32[2,4,16,16], index: 5, kind: output, shape index: {}]  }
   0x1   :  { %10842 = sst [smem:[#allocation163_spill]] %s10604_s0 }
   0x2   :  { %10 = vsyncpa [#allocation3], 0 }
   0x3   :  { %12 = vsyncpa [#allocation3 + $0x1], 0 }
   0x4   :  { %13 = vsyncpa [#allocation6], 0 }
   0x5   :  { %15 = vsyncpa [#allocation6 + $0x1], 0 }
   0x6   :  { %16 = vsyncpa [#allocation4], 0 }
   0x7   :  { %18 = vsyncpa [#allocation4 + $0x1], 0  ;;  %s7159_s18 = smov 0   ;;  %s7161_s19 = smov 0  }
   0x8   :  { %s7163_s20 = smov 0   ;;  %s7165_s21 = smov 0  }
   0x9   :  { %s7167_s22 = smov 0   ;;  %s7169_s23 = smov 0  }
   0xa LB: > { %s6199_s24 = sadd.s32 4294967295, %s7116_s23   ;;  %s6200_s25 = sadd.s32 4294967294, %s7116_s23   ;;  %s7116_s23 = sphi %s7169_s23, %s24_s23   ;;  %s7112_s22 = sphi %s7167_s22, %s11304_s22   ;;  %s7108_s21 = sphi %s7165_s21, %s11303_s21   ;;  %s7104_s20 = sphi %s7163_s20, %s11302_s20   ;;  %s7100_s19 = sphi %s7161_s19, %s11301_s19   ;;  %s7096_s18 = sphi %s7159_s18, %s11300_s18  }
   0xb   : > { %s36_s26 = sadd.s32 1, %s7112_s22  ;;  %s45_s27 = sadd.s32 1, %s7104_s20 }
   0xc   : > { %p38_p0 = scmp.ge.s32.totalorder %s36_s26, 2  ;;  %p52_p1 = scmp.ne.s32.totalorder %s7104_s20, %s7100_s19 }
   0xd   : > { %p53_p2 = scmp.eq.s32.totalorder %s7116_s23, 0  ;;  %p58_p3 = scmp.ne.s32.totalorder %s7100_s19, %s7096_s18 }
   0xe   : > { %s11306_s26 = smov (%p38_p0, %s36_s26), 0  ;;  %p59_p5 = scmp.eq.s32.totalorder %s6199_s24, 0 }
   0xf   : > { %p7200_p4 = por %p53_p2, %p52_p1  ;;  %s40_s29 = ssub.s32 %s7112_s22, %s11306_s26 }
  0x10   : > { %p175_p6 = scmp.eq.s32.totalorder %s6199_s24, 1  ;;  %p43_p7 = scmp.eq.s32.totalorder %s40_s29, 0 }
  0x11   : > { %p7206_p8 = por %p59_p5, %p58_p3  ;;  %p181_p10 = scmp.eq.s32.totalorder %s6200_s25, 1 }
  0x12   : > { %p7210_p9 = por %p175_p6, %p52_p1  ;;  %p6370_p13 = scmp.lt.s32.totalorder %s7116_s23, 2 }
  0x13   : > { %s10844_s30 = scalar_select %p7206_p8, 1, 0 }
  0x14   : > { %s10845_s6 = scalar_select %p7210_p9, 1, 0 }
  0x15   : > { %s7215_s7 = scalar_select %p43_p7, %s7104_s20, %s45_s27  }
  0x16   : > { %p7217_p11 = por %p181_p10, %p58_p3  ;;  %s7224_s9 = sand.u32 1, %s7104_s20  }
  0x17   : > { %s6203_s10 = sshll.u32 %s7224_s9, 8  ;;  %s6258_s11 = sshll.u32 %s7112_s22, 12 }
  0x18   : > { %s10846_s8 = scalar_select %p7217_p11, 1, 0 }
  0x19   : > { %s10847_s0 = sld [smem:[#allocation163_spill]]  ;;  %s214_s15 = scalar_lea.vmem [#allocation2], %s6203_s10 }
  0x1a   : > { %s224_s16 = sshll.u32 %s214_s15, 4  ;;  %p7237_p0 = pnand %p6370_p13, %p7200_p4  ;;  %s7233_s16 = int_to_ptr.vmem [resolvable:$true] %s224_s16 }
  0x1b   : > { %s211_s24 = scalar_lea.sflag [#allocation3], %s7224_s9 }
  0x1c   : > { %p6972_p3 = pneg %p7237_p0 }
  0x1f   : > { %s7231_s14 = scalar_lea.hbm %s10847_s0, %s6258_s11  ;;  %s6975_s28 = scalar_lea.hbm %s10847_s0, 8192 }
  0x20   : > { %s6970_s25 = scalar_lea.hbm %s7231_s14, 4096  ;;  %p6976_p4 = scmp.lt.u32.totalorder %s7231_s14, %s10847_s0 }
  0x21   : > { %p6971_p2 = scmp.ne.s32.totalorder %s7231_s14, %s6970_s25  ;;  %p6977_p7 = scmp.lt.u32.totalorder %s6975_s28, %s6970_s25 }
  0x22   : > { %p6979_p13 = scmp.lt.u32.totalorder %s6970_s25, %s7231_s14 }
  0x23   : > { %p6973_p5 = pnand %p6972_p3, %p6971_p2  ;;  %p6978_p10 = por %p6977_p7, %p6976_p4 }
  0x25   : > { %p6974_p6 = pneg %p6973_p5  ;;  %p6980_p12 = por %p6979_p13, %p6978_p10 }
  0x27   : > { %p6981_p1 = pnand %p6980_p12, %p6974_p6 }
  0x29   : > { %6984 = shalt.err (!%p6981_p1)
}
  0x2a   : > { %s6985_s12 = scalar_lea.vmem %s7233_s16, 4096  ;;  %s7118_s13 = smov [#allocation2]  }
  0x2b   : > { %p6986_p2 = scmp.ne.s32.totalorder %s7233_s16, %s6985_s12  ;;  %s6990_s15 = sshll.u32 %s7118_s13, 4  ;;  %s6991_s15 = int_to_ptr.vmem [resolvable:$false] %s6990_s15 }
  0x2c   : > { %s6992_s27 = scalar_lea.vmem %s6991_s15, 8192  ;;  %p6993_p9 = scmp.lt.s32.totalorder %s7233_s16, %s6991_s15 }
  0x2d   : > { %p6988_p5 = pnand %p6986_p2, %p6972_p3  ;;  %p6994_p4 = scmp.lt.s32.totalorder %s6992_s27, %s6985_s12 }
  0x2f   : > { %p6989_p11 = pneg %p6988_p5  ;;  %p6995_p7 = por %p6994_p4, %p6993_p9 }
  0x31   : > { %p6996_p10 = pnand %p6995_p7, %p6989_p11 }
  0x33   : > { %6999 = shalt.err (!%p6996_p10)
}
  0x34   : > { %s10611_s25 = smov 128   ;;  %s7120_s29 = smov 8  }
  0x35   : > { %6362 = dma.hbm_to_vmem [thread:$0]  (!%p7237_p0), %s7231_s14, 4096, %s7233_s16, %s211_s24, %s10611_s25, %s10611_s25, %s7120_s29  }
  0x36   : > { %p255_p9 = scmp.lt.s32.totalorder %s7116_s23, 3  ;;  %s6206_s28 = sshll.u32 %s7224_s9, 4 }
  0x37   : > { %s6259_s10 = sshll.u32 %s7112_s22, 8  ;;  %p10849_p11 = scmp.ge.s32.totalorder %s7116_s23, 1 }
  0x38   : > { %s7285_s15 = scalar_lea.hbm %s10605_s1, %s6259_s10  ;;  %s238_s27 = scalar_lea.vmem [#allocation5], %s6206_s28 }
  0x39   : > { %p7278_p12 = pnand %p10849_p11, %p255_p9  ;;  %s247_s0 = sshll.u32 %s238_s27, 4  ;;  %s7287_s0 = int_to_ptr.vmem [resolvable:$true] %s247_s0 }
  0x3a   : > { %s235_s14 = scalar_lea.sflag [#allocation6], %s7224_s9  ;;  %s7000_s16 = scalar_lea.hbm %s7285_s15, 256 }
  0x3b   : > { %p7001_p1 = scmp.ne.s32.totalorder %s7285_s15, %s7000_s16  ;;  %s7005_s10 = scalar_lea.hbm %s10605_s1, 512 }
  0x3c   : > { %p7006_p2 = scmp.lt.u32.totalorder %s7285_s15, %s10605_s1  ;;  %p7007_p5 = scmp.lt.u32.totalorder %s7005_s10, %s7000_s16 }
  0x3d   : > { %p7003_p6 = pnand %p7001_p1, %p6972_p3  ;;  %p7009_p7 = scmp.lt.u32.totalorder %s7000_s16, %s7285_s15 }
  0x3e   : > { %p7008_p4 = por %p7007_p5, %p7006_p2 }
  0x3f   : > { %p7004_p13 = pneg %p7003_p6 }
  0x40   : > { %p7010_p10 = por %p7009_p7, %p7008_p4 }
  0x42   : > { %p7011_p9 = pnand %p7010_p10, %p7004_p13 }
  0x44   : > { %7014 = shalt.err (!%p7011_p9)
}
  0x45   : > { %s7015_s28 = scalar_lea.vmem %s7287_s0, 256  ;;  %s7121_s25 = smov [#allocation5]  }
  0x46   : > { %p7016_p11 = scmp.ne.s32.totalorder %s7287_s0, %s7015_s28  ;;  %s7020_s27 = sshll.u32 %s7121_s25, 4  ;;  %s7021_s27 = int_to_ptr.vmem [resolvable:$false] %s7020_s27 }
  0x47   : > { %s7022_s24 = scalar_lea.vmem %s7021_s27, 512  ;;  %p7023_p8 = scmp.lt.s32.totalorder %s7287_s0, %s7021_s27 }
  0x48   : > { %p7018_p1 = pnand %p7016_p11, %p6972_p3  ;;  %p7024_p2 = scmp.lt.s32.totalorder %s7022_s24, %s7015_s28 }
  0x4a   : > { %p7019_p6 = pneg %p7018_p1  ;;  %p7025_p5 = por %p7024_p2, %p7023_p8 }
  0x4c   : > { %p7026_p4 = pnand %p7025_p5, %p7019_p6 }
  0x4e   : > { %7029 = shalt.err (!%p7026_p4)
}
  0x4f   : > { %s10851_s16 = smov 128   ;;  %259 = sbr.rel (%p7278_p12) target bundleno = 2549 (0x9f5), region = 40 }
  0x50   : > { %6365 = dma.hbm_to_vmem [thread:$0]  (!%p7237_p0), %s7285_s15, 256, %s7287_s0, %s235_s14, %s10851_s16, %s10851_s16, %s7120_s29  }
  0x56   : > { %s7321_s10 = sand.u32 1, %s7100_s19   ;;  %p10852_p8 = scmp.ne.s32.totalorder %s10844_s30, 0 }
  0x57   : > { %s6210_s12 = sshll.u32 %s7321_s10, 8  ;;  %s262_s13 = scalar_lea.sflag [#allocation3], %s7321_s10 }
  0x58   : > { %s7325_s17 = scalar_lea.vmem [#allocation2], %s6210_s12 }
  0x59   : > { %7083 = dma.done.wait (%p10852_p8), %s262_s13, 4096  }
  0x5a   : > { %7085 = vsyncadd (%p10852_p8), %s262_s13, 4294963200  ;;  %s6211_s0 = sshll.u32 %s7321_s10, 4  ;;  %s271_s9 = scalar_lea.sflag [#allocation6], %s7321_s10 }
  0x5b   : > { %s7333_s29 = scalar_lea.vmem [#allocation5], %s6211_s0 }
  0x5c   : > { %7087 = dma.done.wait (%p10852_p8), %s271_s9, 256  }
  0x5d   : > { %7089 = vsyncadd (%p10852_p8), %s271_s9, 4294967040  ;;  %vm345_vm0 = vcmask 130048   ;;  %v7340_v0 = vld [vmem:[%s7325_s17] sm:$0xff]  ;;  %v7343_v1 = vld [vmem:[%s7325_s17 + $0x10] sm:$0xff]  ;;  %vm1547_vm1 = vcmask 130112   ;;  %vm1684_vm2 = vcmask 1041409  }
  0x5e   : > { %v7346_v2 = vld [vmem:[%s7325_s17 + $0x8] sm:$0xff]  ;;  %v346_v3 = vsel %vm345_vm0, %v7340_v0, 0.0  ;;  %v352_v4 = vsel %vm345_vm0, %v7343_v1, 0.0  ;;  %v7353_v5 = vld [vmem:[%s7325_s17 + $0x18] sm:$0xff]  ;;  %v7360_v8 = vld [vmem:[%s7325_s17 + $0x20] sm:$0xff]  ;;  %vm1686_vm3 = vcmask 1042434  }
  0x5f   : > { %347 = vadd.xlane.f32.xlu0 %v346_v3  ;;  %353 = vadd.xlane.f32.xlu1 %v352_v4  ;;  %v349_v6 = vsel %vm345_vm0, %v7346_v2, 0.0  ;;  %v355_v7 = vsel %vm345_vm0, %v7353_v5, 0.0  ;;  %v7363_v9 = vld [vmem:[%s7325_s17 + $0x28] sm:$0xff]  ;;  %v358_v10 = vsel %vm345_vm0, %v7360_v8, 0.0  ;;  %v7370_v12 = vld [vmem:[%s7325_s17 + $0x30] sm:$0xff]  ;;  %v7373_v13 = vld [vmem:[%s7325_s17 + $0x38] sm:$0xff]  ;;  %v10613_v3 = vlaneseq }
  0x60   : > { %v361_v11 = vsel %vm345_vm0, %v7363_v9, 0.0  ;;  %v364_v14 = vsel %vm345_vm0, %v7370_v12, 0.0  ;;  %v367_v15 = vsel %vm345_vm0, %v7373_v13, 0.0  ;;  %v7380_v16 = vld [vmem:[%s7325_s17 + $0x40] sm:$0xff]  ;;  %v7383_v17 = vld [vmem:[%s7325_s17 + $0x48] sm:$0xff]  ;;  %v7390_v20 = vld [vmem:[%s7325_s17 + $0x50] sm:$0xff] }
  0x61   : > { %v370_v18 = vsel %vm345_vm0, %v7380_v16, 0.0  ;;  %v373_v19 = vsel %vm345_vm0, %v7383_v17, 0.0  ;;  %v7393_v21 = vld [vmem:[%s7325_s17 + $0x58] sm:$0xff]  ;;  %v376_v22 = vsel %vm345_vm0, %v7390_v20, 0.0  ;;  %v7400_v24 = vld [vmem:[%s7325_s17 + $0x60] sm:$0xff]  ;;  %v7403_v25 = vld [vmem:[%s7325_s17 + $0x68] sm:$0xff] }
  0x62   : > { %v379_v23 = vsel %vm345_vm0, %v7393_v21, 0.0  ;;  %v382_v26 = vsel %vm345_vm0, %v7400_v24, 0.0  ;;  %v385_v27 = vsel %vm345_vm0, %v7403_v25, 0.0  ;;  %v7410_v28 = vld [vmem:[%s7325_s17 + $0x70] sm:$0xff]  ;;  %v7413_v29 = vld [vmem:[%s7325_s17 + $0x78] sm:$0xff]  ;;  %v7420_v32 = vld [vmem:[%s7325_s17 + $0x80] sm:$0xff] }
  0x63   : > { %350 = vadd.xlane.f32.xlu0 %v349_v6  ;;  %356 = vadd.xlane.f32.xlu1 %v355_v7  ;;  %v388_v30 = vsel %vm345_vm0, %v7410_v28, 0.0  ;;  %v391_v31 = vsel %vm345_vm0, %v7413_v29, 0.0  ;;  %v7423_v33 = vld [vmem:[%s7325_s17 + $0x88] sm:$0xff]  ;;  %v394_v34 = vsel %vm345_vm0, %v7420_v32, 0.0  ;;  %v7430_v36 = vld [vmem:[%s7325_s17 + $0x90] sm:$0xff]  ;;  %v7433_v37 = vld [vmem:[%s7325_s17 + $0x98] sm:$0xff] }
  0x64   : > { %v397_v35 = vsel %vm345_vm0, %v7423_v33, 0.0  ;;  %v400_v38 = vsel %vm345_vm0, %v7430_v36, 0.0  ;;  %v403_v39 = vsel %vm345_vm0, %v7433_v37, 0.0  ;;  %v7440_v40 = vld [vmem:[%s7325_s17 + $0xa0] sm:$0xff]  ;;  %v7443_v41 = vld [vmem:[%s7325_s17 + $0xa8] sm:$0xff]  ;;  %v7450_v44 = vld [vmem:[%s7325_s17 + $0xb0] sm:$0xff] }
  0x65   : > { %v406_v42 = vsel %vm345_vm0, %v7440_v40, 0.0  ;;  %v409_v43 = vsel %vm345_vm0, %v7443_v41, 0.0  ;;  %v7453_v45 = vld [vmem:[%s7325_s17 + $0xb8] sm:$0xff]  ;;  %v412_v46 = vsel %vm345_vm0, %v7450_v44, 0.0  ;;  %v7460_v48 = vld [vmem:[%s7325_s17 + $0xc0] sm:$0xff]  ;;  %v7463_v49 = vld [vmem:[%s7325_s17 + $0xc8] sm:$0xff] }
  0x66   : > { %v415_v47 = vsel %vm345_vm0, %v7453_v45, 0.0  ;;  %v418_v50 = vsel %vm345_vm0, %v7460_v48, 0.0  ;;  %v421_v51 = vsel %vm345_vm0, %v7463_v49, 0.0  ;;  %v7470_v52 = vld [vmem:[%s7325_s17 + $0xd0] sm:$0xff]  ;;  %v7473_v53 = vld [vmem:[%s7325_s17 + $0xd8] sm:$0xff]  ;;  %v7480_v56 = vld [vmem:[%s7325_s17 + $0xe0] sm:$0xff] }
  0x67   : > { %359 = vadd.xlane.f32.xlu0 %v358_v10  ;;  %362 = vadd.xlane.f32.xlu1 %v361_v11  ;;  %v424_v54 = vsel %vm345_vm0, %v7470_v52, 0.0  ;;  %v427_v55 = vsel %vm345_vm0, %v7473_v53, 0.0  ;;  %v7483_v57 = vld [vmem:[%s7325_s17 + $0xe8] sm:$0xff]  ;;  %v430_v58 = vsel %vm345_vm0, %v7480_v56, 0.0  ;;  %v7490_v60 = vld [vmem:[%s7325_s17 + $0xf0] sm:$0xff]  ;;  %v7493_v61 = vld [vmem:[%s7325_s17 + $0xf8] sm:$0xff] }
  0x68   : > { %v433_v59 = vsel %vm345_vm0, %v7483_v57, 0.0  ;;  %v436_v62 = vsel %vm345_vm0, %v7490_v60, 0.0  ;;  %v439_v63 = vsel %vm345_vm0, %v7493_v61, 0.0  ;;  %v341_v4 = vld [vmem:[%s7333_s29] sm:$0xff]  ;;  %v7501_v7 = vshrl.u32 %v10613_v3, 7  ;;  %s6212_s16 = sshll.u32 %s7321_s10, 6 }
  0x69   : > { %v1162_v6 = vsub.f32 1.0, %v341_v4  ;;  %vm1688_vm4 = vcmask 1043459   ;;  %vm1690_vm5 = vcmask 1044484   ;;  %vm1692_vm6 = vcmask 1045509   ;;  %s9877_s12 = scalar_lea.vmem [#allocation7], %s6212_s16  ;;  %s6260_s13 = sshll.u32 %s7108_s21, 10 }
  0x6a   : > { %v7506_v11 = vsub.s32 0, %v7501_v7  ;;  %vm1694_vm7 = vcmask 1046534   ;;  %vm1696_vm8 = vcmask 1047559   ;;  %s6086_s17 = sshll.u32 %s9877_s12, 4  ;;  %s10548_s9 = scalar_lea.hbm %s10609_s5, %s6260_s13  ;;  %s10550_s17 = int_to_ptr.vmem [resolvable:$true] %s6086_s17 }
  0x6b   : > { %365 = vadd.xlane.f32.xlu0 %v364_v14  ;;  %368 = vadd.xlane.f32.xlu1 %v367_v15  ;;  %v7503_v10 = vmul.f32 -1000000.0, %v1162_v6  ;;  %v7511_v15 = vsub.s32 1, %v7501_v7  ;;  %s7030_s30 = scalar_lea.vmem %s10550_s17, 1024  ;;  %p11297_p3 = scmp.ne.s32.totalorder %s10845_s6, 0 }
  0x6c   : > { %10853 = vst [vmem:[#allocation11_spill] sm:$0xff] %v7506_v11  ;;  %p7031_p0 = scmp.ne.s32.totalorder %s10550_s17, %s7030_s30  ;;  %s7126_s11 = smov [#allocation7]  }
  0x6d   : > { %v1171_v14 = vrot.slane %v7503_v10, %v7506_v11  ;;  %10854 = vst [vmem:[#allocation12_spill] sm:$0xff] %v7511_v15  ;;  %s7034_s15 = sshll.u32 %s7126_s11, 4  ;;  %s7035_s15 = int_to_ptr.vmem [resolvable:$false] %s7034_s15 }
  0x6e   : > { %p7032_p12 = pnand %p7031_p0, %p11297_p3  ;;  %s7036_s14 = scalar_lea.vmem %s7035_s15, 2048 }
  0x6f   : > { %371 = vadd.xlane.f32.xlu0 %v370_v18  ;;  %374 = vadd.xlane.f32.xlu1 %v373_v19  ;;  %v1182_v18 = vrot.slane %v7503_v10, %v7511_v15  ;;  %v7516_v19 = vsub.s32 2, %v7501_v7  ;;  %p7037_p7 = scmp.lt.s32.totalorder %s10550_s17, %s7035_s15  ;;  %p7038_p10 = scmp.lt.s32.totalorder %s7036_s14, %s7030_s30 }
  0x70   : > { %p7033_p13 = pneg %p7032_p12 }
  0x71   : > { %10855 = vst [vmem:[#allocation13_spill] sm:$0xff] %v7516_v19  ;;  %p7039_p9 = por %p7038_p10, %p7037_p7 }
  0x73   : > { %377 = vadd.xlane.f32.xlu0 %v376_v22  ;;  %380 = vadd.xlane.f32.xlu1 %v379_v23  ;;  %v1193_v22 = vrot.slane %v7503_v10, %v7516_v19  ;;  %v7521_v23 = vsub.s32 3, %v7501_v7  ;;  %p7040_p11 = pnand %p7039_p9, %p7033_p13 }
  0x75   : > { %10856 = vst [vmem:[#allocation14_spill] sm:$0xff] %v7521_v23 }
  0x77   : > { %383 = vadd.xlane.f32.xlu0 %v382_v26  ;;  %386 = vadd.xlane.f32.xlu1 %v385_v27  ;;  %v1204_v26 = vrot.slane %v7503_v10, %v7521_v23  ;;  %v7526_v27 = vsub.s32 4, %v7501_v7 }
  0x79   : > { %10857 = vst [vmem:[#allocation15_spill] sm:$0xff] %v7526_v27 }
  0x7b   : > { %389 = vadd.xlane.f32.xlu0 %v388_v30  ;;  %392 = vadd.xlane.f32.xlu1 %v391_v31  ;;  %v7530_v30 = vrot.slane %v7503_v10, %v7526_v27 }
  0x7f   : > { %395 = vadd.xlane.f32.xlu0 %v394_v34  ;;  %398 = vadd.xlane.f32.xlu1 %v397_v35 }
  0x83   : > { %401 = vadd.xlane.f32.xlu0 %v400_v38  ;;  %404 = vadd.xlane.f32.xlu1 %v403_v39 }
  0x87   : > { %407 = vadd.xlane.f32.xlu0 %v406_v42  ;;  %410 = vadd.xlane.f32.xlu1 %v409_v43 }
  0x8b   : > { %413 = vadd.xlane.f32.xlu0 %v412_v46  ;;  %416 = vadd.xlane.f32.xlu1 %v415_v47 }
  0x8f   : > { %419 = vadd.xlane.f32.xlu0 %v418_v50  ;;  %422 = vadd.xlane.f32.xlu1 %v421_v51 }
  0x93   : > { %425 = vadd.xlane.f32.xlu0 %v424_v54  ;;  %428 = vadd.xlane.f32.xlu1 %v427_v55 }
  0x97   : > { %431 = vadd.xlane.f32.xlu0 %v430_v58  ;;  %434 = vadd.xlane.f32.xlu1 %v433_v59 }
  0x9b   : > { %437 = vadd.xlane.f32.xlu0 %v436_v62  ;;  %440 = vadd.xlane.f32.xlu1 %v439_v63 }
  0xac   : > { %1177 = vbcast.lane.b32.xlu1 %v1171_v14, 264 }
  0xb0   : > { %1184 = vbcast.lane.b32.xlu1 %v1182_v18, 256 }
  0xb1   : > { %1173 = vbcast.lane.b32.xlu0 %v1171_v14, 256 }
  0xb4   : > { %1188 = vbcast.lane.b32.xlu1 %v1182_v18, 264 }
  0xb5   : > { %1195 = vbcast.lane.b32.xlu0 %v1193_v22, 256 }
  0xb8   : > { %1199 = vbcast.lane.b32.xlu1 %v1193_v22, 264 }
  0xb9   : > { %1206 = vbcast.lane.b32.xlu0 %v1204_v26, 256 }
  0xbc   : > { %1210 = vbcast.lane.b32.xlu1 %v1204_v26, 264 }
  0xbd   : > { %1217 = vbcast.lane.b32.xlu0 %v7530_v30, 256 }
  0xec   : > { %v348_v31 = vpop.xlane.xlu0 %347  ;;  %v354_v34 = vpop.xlane.xlu1 %353 }
  0xed   : > { %v443_v35 = vmul.f32 0.0625, %v348_v31  ;;  %v445_v38 = vmul.f32 0.0625, %v354_v34 }
  0xef   : > { %v7534_v39 = vsub.f32 %v7340_v0, %v443_v35  ;;  %v7537_v42 = vsub.f32 %v7343_v1, %v445_v38 }
  0xf0   : > { %v351_v43 = vpop.xlane.xlu0 %350  ;;  %v357_v46 = vpop.xlane.xlu1 %356 }
  0xf1   : > { %v444_v47 = vmul.f32 0.0625, %v351_v43  ;;  %v446_v50 = vmul.f32 0.0625, %v357_v46  ;;  %v507_v51 = vmul.f32 %v7534_v39, %v7534_v39  ;;  %v509_v54 = vmul.f32 %v7537_v42, %v7537_v42 }
  0xf3   : > { %v7544_v55 = vsub.f32 %v7346_v2, %v444_v47  ;;  %v7547_v58 = vsub.f32 %v7353_v5, %v446_v50  ;;  %v539_v0 = vsel %vm345_vm0, %v507_v51, 0.0  ;;  %v545_v62 = vsel %vm345_vm0, %v509_v54, 0.0 }
  0xf4   : > { %540 = vadd.xlane.f32.xlu0 %v539_v0  ;;  %v360_v1 = vpop.xlane.xlu0 %359  ;;  %v363_v59 = vpop.xlane.xlu1 %362 }
  0xf5   : > { %v447_v63 = vmul.f32 0.0625, %v360_v1  ;;  %v448_v4 = vmul.f32 0.0625, %v363_v59  ;;  %v508_v6 = vmul.f32 %v7544_v55, %v7544_v55  ;;  %v510_v14 = vmul.f32 %v7547_v58, %v7547_v58 }
  0xf7   : > { %v7556_v2 = vsub.f32 %v7360_v8, %v447_v63  ;;  %v7559_v5 = vsub.f32 %v7363_v9, %v448_v4  ;;  %v542_v18 = vsel %vm345_vm0, %v508_v6, 0.0  ;;  %v548_v31 = vsel %vm345_vm0, %v510_v14, 0.0 }
  0xf8   : > { %546 = vadd.xlane.f32.xlu0 %v545_v62  ;;  %543 = vadd.xlane.f32.xlu1 %v542_v18  ;;  %v366_v22 = vpop.xlane.xlu0 %365  ;;  %v369_v26 = vpop.xlane.xlu1 %368 }
  0xf9   : > { %v449_v34 = vmul.f32 0.0625, %v366_v22  ;;  %v450_v35 = vmul.f32 0.0625, %v369_v26  ;;  %v511_v38 = vmul.f32 %v7556_v2, %v7556_v2  ;;  %v512_v8 = vmul.f32 %v7559_v5, %v7559_v5 }
  0xfb   : > { %v7568_v43 = vsub.f32 %v7370_v12, %v449_v34  ;;  %v7571_v9 = vsub.f32 %v7373_v13, %v450_v35  ;;  %v551_v46 = vsel %vm345_vm0, %v511_v38, 0.0  ;;  %v554_v51 = vsel %vm345_vm0, %v512_v8, 0.0 }
  0xfc   : > { %549 = vadd.xlane.f32.xlu1 %v548_v31  ;;  %552 = vadd.xlane.f32.xlu0 %v551_v46  ;;  %v372_v47 = vpop.xlane.xlu0 %371  ;;  %v375_v50 = vpop.xlane.xlu1 %374 }
  0xfd   : > { %v451_v54 = vmul.f32 0.0625, %v372_v47  ;;  %v452_v0 = vmul.f32 0.0625, %v375_v50  ;;  %v513_v1 = vmul.f32 %v7568_v43, %v7568_v43  ;;  %v514_v12 = vmul.f32 %v7571_v9, %v7571_v9 }
  0xff   : > { %v7580_v59 = vsub.f32 %v7380_v16, %v451_v54  ;;  %v7583_v13 = vsub.f32 %v7383_v17, %v452_v0  ;;  %v557_v62 = vsel %vm345_vm0, %v513_v1, 0.0  ;;  %v560_v6 = vsel %vm345_vm0, %v514_v12, 0.0 }
 0x100   : > { %555 = vadd.xlane.f32.xlu1 %v554_v51  ;;  %558 = vadd.xlane.f32.xlu0 %v557_v62  ;;  %v378_v63 = vpop.xlane.xlu0 %377  ;;  %v381_v4 = vpop.xlane.xlu1 %380 }
 0x101   : > { %v453_v14 = vmul.f32 0.0625, %v378_v63  ;;  %v454_v18 = vmul.f32 0.0625, %v381_v4  ;;  %v515_v22 = vmul.f32 %v7580_v59, %v7580_v59  ;;  %v516_v16 = vmul.f32 %v7583_v13, %v7583_v13 }
 0x103   : > { %v7592_v26 = vsub.f32 %v7390_v20, %v453_v14  ;;  %v7595_v17 = vsub.f32 %v7393_v21, %v454_v18  ;;  %v563_v31 = vsel %vm345_vm0, %v515_v22, 0.0  ;;  %v566_v38 = vsel %vm345_vm0, %v516_v16, 0.0 }
 0x104   : > { %561 = vadd.xlane.f32.xlu1 %v560_v6  ;;  %564 = vadd.xlane.f32.xlu0 %v563_v31  ;;  %v384_v34 = vpop.xlane.xlu0 %383  ;;  %v387_v35 = vpop.xlane.xlu1 %386 }
 0x105   : > { %v455_v8 = vmul.f32 0.0625, %v384_v34  ;;  %v456_v46 = vmul.f32 0.0625, %v387_v35  ;;  %v517_v47 = vmul.f32 %v7592_v26, %v7592_v26  ;;  %v518_v20 = vmul.f32 %v7595_v17, %v7595_v17 }
 0x107   : > { %v7604_v50 = vsub.f32 %v7400_v24, %v455_v8  ;;  %v7607_v21 = vsub.f32 %v7403_v25, %v456_v46  ;;  %v569_v51 = vsel %vm345_vm0, %v517_v47, 0.0  ;;  %v572_v1 = vsel %vm345_vm0, %v518_v20, 0.0 }
 0x108   : > { %567 = vadd.xlane.f32.xlu1 %v566_v38  ;;  %570 = vadd.xlane.f32.xlu0 %v569_v51  ;;  %v390_v54 = vpop.xlane.xlu0 %389  ;;  %v393_v0 = vpop.xlane.xlu1 %392 }
 0x109   : > { %v457_v12 = vmul.f32 0.0625, %v390_v54  ;;  %v458_v62 = vmul.f32 0.0625, %v393_v0  ;;  %v519_v63 = vmul.f32 %v7604_v50, %v7604_v50  ;;  %v520_v24 = vmul.f32 %v7607_v21, %v7607_v21 }
 0x10b   : > { %v7616_v4 = vsub.f32 %v7410_v28, %v457_v12  ;;  %v7619_v25 = vsub.f32 %v7413_v29, %v458_v62  ;;  %v575_v6 = vsel %vm345_vm0, %v519_v63, 0.0  ;;  %v578_v22 = vsel %vm345_vm0, %v520_v24, 0.0 }
 0x10c   : > { %573 = vadd.xlane.f32.xlu1 %v572_v1  ;;  %576 = vadd.xlane.f32.xlu0 %v575_v6  ;;  %v396_v14 = vpop.xlane.xlu0 %395  ;;  %v399_v18 = vpop.xlane.xlu1 %398 }
 0x10d   : > { %v459_v16 = vmul.f32 0.0625, %v396_v14  ;;  %v460_v31 = vmul.f32 0.0625, %v399_v18  ;;  %v521_v34 = vmul.f32 %v7616_v4, %v7616_v4  ;;  %v522_v28 = vmul.f32 %v7619_v25, %v7619_v25  ;;  %v840_v18 = vld [vmem:[%s10606_s2 + $0x8] sm:$0xff] }
 0x10f   : > { %v7628_v35 = vsub.f32 %v7420_v32, %v459_v16  ;;  %v7631_v29 = vsub.f32 %v7423_v33, %v460_v31  ;;  %v581_v38 = vsel %vm345_vm0, %v521_v34, 0.0  ;;  %v584_v47 = vsel %vm345_vm0, %v522_v28, 0.0 }
 0x110   : > { %579 = vadd.xlane.f32.xlu1 %v578_v22  ;;  %582 = vadd.xlane.f32.xlu0 %v581_v38  ;;  %v402_v8 = vpop.xlane.xlu0 %401  ;;  %v405_v46 = vpop.xlane.xlu1 %404 }
 0x111   : > { %v461_v20 = vmul.f32 0.0625, %v402_v8  ;;  %v462_v51 = vmul.f32 0.0625, %v405_v46  ;;  %v523_v54 = vmul.f32 %v7628_v35, %v7628_v35  ;;  %v524_v32 = vmul.f32 %v7631_v29, %v7631_v29 }
 0x113   : > { %v7640_v0 = vsub.f32 %v7430_v36, %v461_v20  ;;  %v7643_v33 = vsub.f32 %v7433_v37, %v462_v51  ;;  %v587_v1 = vsel %vm345_vm0, %v523_v54, 0.0  ;;  %v590_v63 = vsel %vm345_vm0, %v524_v32, 0.0  ;;  %v839_v37 = vld [vmem:[%s10606_s2] sm:$0xff] }
 0x114   : > { %585 = vadd.xlane.f32.xlu1 %v584_v47  ;;  %588 = vadd.xlane.f32.xlu0 %v587_v1  ;;  %v408_v12 = vpop.xlane.xlu0 %407  ;;  %v411_v62 = vpop.xlane.xlu1 %410  ;;  %v6347_v22 = vpack.c.bf16 %v840_v18, %v839_v37 }
 0x115   : > { %v463_v24 = vmul.f32 0.0625, %v408_v12  ;;  %v464_v6 = vmul.f32 0.0625, %v411_v62  ;;  %v525_v14 = vmul.f32 %v7640_v0, %v7640_v0  ;;  %v526_v36 = vmul.f32 %v7643_v33, %v7643_v33 }
 0x116   : > { %6348 = vmatprep.subr.bf16.mxu0 %v6347_v22  ;;  %6351 = vmatprep.subr.bf16.mxu1 %v6347_v22 }
 0x117   : > { %v7658_v16 = vsub.f32 %v7440_v40, %v463_v24  ;;  %v7661_v31 = vsub.f32 %v7443_v41, %v464_v6  ;;  %v593_v34 = vsel %vm345_vm0, %v525_v14, 0.0  ;;  %v596_v8 = vsel %vm345_vm0, %v526_v36, 0.0  ;;  %6350 = vmatpush3.bf16.msra.mxu0 %v6347_v22  ;;  %6352 = vmatpush3.bf16.msra.mxu1 %v6347_v22 }
 0x118   : > { %591 = vadd.xlane.f32.xlu1 %v590_v63  ;;  %594 = vadd.xlane.f32.xlu0 %v593_v34  ;;  %v414_v28 = vpop.xlane.xlu0 %413  ;;  %v417_v38 = vpop.xlane.xlu1 %416 }
 0x119   : > { %v465_v46 = vmul.f32 0.0625, %v414_v28  ;;  %v466_v47 = vmul.f32 0.0625, %v417_v38  ;;  %v527_v20 = vmul.f32 %v7658_v16, %v7658_v16  ;;  %v528_v40 = vmul.f32 %v7661_v31, %v7661_v31 }
 0x11b   : > { %v7670_v41 = vsub.f32 %v7450_v44, %v465_v46  ;;  %v7673_v51 = vsub.f32 %v7453_v45, %v466_v47  ;;  %v599_v54 = vsel %vm345_vm0, %v527_v20, 0.0  ;;  %v602_v12 = vsel %vm345_vm0, %v528_v40, 0.0 }
 0x11c   : > { %597 = vadd.xlane.f32.xlu1 %v596_v8  ;;  %600 = vadd.xlane.f32.xlu0 %v599_v54  ;;  %v420_v32 = vpop.xlane.xlu0 %419  ;;  %v423_v1 = vpop.xlane.xlu1 %422 }
 0x11d   : > { %v467_v62 = vmul.f32 0.0625, %v420_v32  ;;  %v468_v63 = vmul.f32 0.0625, %v423_v1  ;;  %v529_v24 = vmul.f32 %v7670_v41, %v7670_v41  ;;  %v530_v44 = vmul.f32 %v7673_v51, %v7673_v51 }
 0x11f   : > { %v7682_v6 = vsub.f32 %v7460_v48, %v467_v62  ;;  %v7685_v45 = vsub.f32 %v7463_v49, %v468_v63  ;;  %v605_v14 = vsel %vm345_vm0, %v529_v24, 0.0  ;;  %v608_v18 = vsel %vm345_vm0, %v530_v44, 0.0 }
 0x120   : > { %603 = vadd.xlane.f32.xlu1 %v602_v12  ;;  %606 = vadd.xlane.f32.xlu0 %v605_v14  ;;  %v426_v36 = vpop.xlane.xlu0 %425  ;;  %v429_v37 = vpop.xlane.xlu1 %428 }
 0x121   : > { %v469_v22 = vmul.f32 0.0625, %v426_v36  ;;  %v470_v34 = vmul.f32 0.0625, %v429_v37  ;;  %v531_v28 = vmul.f32 %v7682_v6, %v7682_v6  ;;  %v532_v48 = vmul.f32 %v7685_v45, %v7685_v45 }
 0x123   : > { %v7694_v38 = vsub.f32 %v7470_v52, %v469_v22  ;;  %v7697_v49 = vsub.f32 %v7473_v53, %v470_v34  ;;  %v611_v8 = vsel %vm345_vm0, %v531_v28, 0.0  ;;  %v614_v20 = vsel %vm345_vm0, %v532_v48, 0.0 }
 0x124   : > { %609 = vadd.xlane.f32.xlu1 %v608_v18  ;;  %612 = vadd.xlane.f32.xlu0 %v611_v8  ;;  %v432_v46 = vpop.xlane.xlu0 %431  ;;  %v435_v47 = vpop.xlane.xlu1 %434  ;;  %v7736_v8 = vsub.s32 6, %v7501_v7 }
 0x125   : > { %v471_v40 = vmul.f32 0.0625, %v432_v46  ;;  %v472_v54 = vmul.f32 0.0625, %v435_v47  ;;  %v533_v32 = vmul.f32 %v7694_v38, %v7694_v38  ;;  %v534_v52 = vmul.f32 %v7697_v49, %v7697_v49  ;;  %v342_v46 = vld [vmem:[%s7333_s29 + $0x8] sm:$0xff]  ;;  %s6071_s29 = scalar_lea.sflag [#allocation4], %s7321_s10 }
 0x126   : > { %10859 = vst [vmem:[#allocation17_spill] sm:$0xff] %v7736_v8 }
 0x127   : > { %v7706_v1 = vsub.f32 %v7480_v56, %v471_v40  ;;  %v7709_v53 = vsub.f32 %v7483_v57, %v472_v54  ;;  %v617_v12 = vsel %vm345_vm0, %v533_v32, 0.0  ;;  %v620_v24 = vsel %vm345_vm0, %v534_v52, 0.0 }
 0x128   : > { %615 = vadd.xlane.f32.xlu1 %v614_v20  ;;  %618 = vadd.xlane.f32.xlu0 %v617_v12  ;;  %v438_v62 = vpop.xlane.xlu0 %437  ;;  %v441_v63 = vpop.xlane.xlu1 %440  ;;  %v1237_v20 = vrot.slane %v7503_v10, %v7736_v8  ;;  %v7744_v40 = vsub.s32 7, %v7501_v7  ;;  %v1163_v54 = vsub.f32 1.0, %v342_v46 }
 0x129   : > { %v473_v44 = vmul.f32 0.0625, %v438_v62  ;;  %v474_v14 = vmul.f32 0.0625, %v441_v63  ;;  %v535_v36 = vmul.f32 %v7706_v1, %v7706_v1  ;;  %v536_v56 = vmul.f32 %v7709_v53, %v7709_v53 }
 0x12a   : > { %10860 = vst [vmem:[#allocation18_spill] sm:$0xff] %v7744_v40  ;;  %v1165_v32 = vmul.f32 -1000000.0, %v1163_v54 }
 0x12b   : > { %v7718_v37 = vsub.f32 %v7490_v60, %v473_v44  ;;  %v7721_v57 = vsub.f32 %v7493_v61, %v474_v14  ;;  %v623_v18 = vsel %vm345_vm0, %v535_v36, 0.0  ;;  %v626_v22 = vsel %vm345_vm0, %v536_v56, 0.0 }
 0x12c   : > { %621 = vadd.xlane.f32.xlu1 %v620_v24  ;;  %624 = vadd.xlane.f32.xlu0 %v623_v18  ;;  %v7733_v61 = vsub.s32 5, %v7501_v7  ;;  %v1259_v52 = vrot.slane %v1165_v32, %v7506_v11  ;;  %v1270_v12 = vrot.slane %v1165_v32, %v7511_v15  ;;  %v7750_v62 = vpop.permute.xlu1 %1177  ;;  %v7752_v63 = vpop.permute.xlu0 %1173  ;;  %v1281_v24 = vrot.slane %v1165_v32, %v7516_v19 }
 0x12d   : > { %v537_v34 = vmul.f32 %v7718_v37, %v7718_v37  ;;  %v538_v28 = vmul.f32 %v7721_v57, %v7721_v57  ;;  %v1303_v36 = vrot.slane %v1165_v32, %v7526_v27 }
 0x12e   : > { %10858 = vst [vmem:[#allocation16_spill] sm:$0xff] %v7733_v61  ;;  %v1226_v47 = vrot.slane %v7503_v10, %v7733_v61 }
 0x12f   : > { %v629_v48 = vsel %vm345_vm0, %v537_v34, 0.0  ;;  %v632_v60 = vsel %vm345_vm0, %v538_v28, 0.0  ;;  %v1325_v28 = vrot.slane %v1165_v32, %v7736_v8 }
 0x130   : > { %627 = vadd.xlane.f32.xlu1 %v626_v22  ;;  %630 = vadd.xlane.f32.xlu0 %v629_v48  ;;  %v7755_v44 = vpop.permute.xlu1 %1184  ;;  %v7758_v14 = vpop.permute.xlu0 %1195  ;;  %v1314_v22 = vrot.slane %v1165_v32, %v7733_v61 }
 0x134   : > { %633 = vadd.xlane.f32.xlu1 %v632_v60  ;;  %v7761_v56 = vpop.permute.xlu1 %1188  ;;  %v7763_v18 = vpop.permute.xlu0 %1206  ;;  %v1336_v60 = vrot.slane %v1165_v32, %v7744_v40 }
 0x138   : > { %v7766_v34 = vpop.permute.xlu1 %1199  ;;  %v7769_v48 = vpop.permute.xlu0 %1217 }
 0x13c   : > { %v7772_v46 = vpop.permute.xlu1 %1210 }
 0x145   : > { %1221 = vbcast.lane.b32.xlu1 %v7530_v30, 264  ;;  %v1248_v30 = vrot.slane %v7503_v10, %v7744_v40  ;;  %v1292_v10 = vrot.slane %v1165_v32, %v7521_v23 }
 0x146   : > { %1228 = vbcast.lane.b32.xlu0 %v1226_v47, 256 }
 0x149   : > { %1232 = vbcast.lane.b32.xlu1 %v1226_v47, 264 }
 0x14a   : > { %1239 = vbcast.lane.b32.xlu0 %v1237_v20, 256 }
 0x14d   : > { %1243 = vbcast.lane.b32.xlu1 %v1237_v20, 264 }
 0x14e   : > { %1250 = vbcast.lane.b32.xlu0 %v1248_v30, 256 }
 0x151   : > { %1254 = vbcast.lane.b32.xlu1 %v1248_v30, 264 }
 0x152   : > { %1261 = vbcast.lane.b32.xlu0 %v1259_v52, 256 }
 0x155   : > { %1265 = vbcast.lane.b32.xlu1 %v1259_v52, 264 }
 0x156   : > { %1272 = vbcast.lane.b32.xlu0 %v1270_v12, 256 }
 0x159   : > { %1276 = vbcast.lane.b32.xlu1 %v1270_v12, 264 }
 0x15a   : > { %1283 = vbcast.lane.b32.xlu0 %v1281_v24, 256 }
 0x15d   : > { %1287 = vbcast.lane.b32.xlu1 %v1281_v24, 264 }
 0x15e   : > { %1294 = vbcast.lane.b32.xlu0 %v1292_v10, 256 }
 0x161   : > { %1298 = vbcast.lane.b32.xlu1 %v1292_v10, 264 }
 0x162   : > { %1305 = vbcast.lane.b32.xlu0 %v1303_v36, 256 }
 0x165   : > { %1309 = vbcast.lane.b32.xlu1 %v1303_v36, 264 }
 0x166   : > { %1316 = vbcast.lane.b32.xlu0 %v1314_v22, 256 }
 0x169   : > { %1320 = vbcast.lane.b32.xlu1 %v1314_v22, 264 }
 0x16a   : > { %1327 = vbcast.lane.b32.xlu0 %v1325_v28, 256 }
 0x16d   : > { %1331 = vbcast.lane.b32.xlu1 %v1325_v28, 264 }
 0x16e   : > { %1338 = vbcast.lane.b32.xlu0 %v1336_v60, 256 }
 0x171   : > { %1342 = vbcast.lane.b32.xlu1 %v1336_v60, 264 }
 0x181   : > { %v541_v47 = vpop.xlane.xlu0 %540 }
 0x182   : > { %v635_v20 = vmul.f32 0.0625, %v541_v47 }
 0x184   : > { %v667_v54 = vadd.f32 1e-05, %v635_v20 }
 0x185   : > { %v544_v30 = vpop.xlane.xlu1 %543  ;;  %v547_v52 = vpop.xlane.xlu0 %546 }
 0x186   : > { %6522 = vrsqrt.f32 %v667_v54  ;;  %v636_v12 = vmul.f32 0.0625, %v544_v30  ;;  %v637_v24 = vmul.f32 0.0625, %v547_v52  ;;  %v7777_v52 = vld [vmem:[%s10607_s3] ss:$0 sm:$0xff] }
 0x188   : > { %v668_v10 = vadd.f32 1e-05, %v636_v12  ;;  %v669_v36 = vadd.f32 1e-05, %v637_v24 }
 0x189   : > { %v550_v22 = vpop.xlane.xlu1 %549  ;;  %v553_v3 = vpop.xlane.xlu0 %552 }
 0x18a   : > { %6524 = vrsqrt.f32 %v668_v10  ;;  %v638_v28 = vmul.f32 0.0625, %v550_v22  ;;  %v639_v8 = vmul.f32 0.0625, %v553_v3 }
 0x18b   : > { %6526 = vrsqrt.f32 %v669_v36 }
 0x18c   : > { %v670_v32 = vadd.f32 1e-05, %v638_v28  ;;  %v671_v40 = vadd.f32 1e-05, %v639_v8 }
 0x18d   : > { %v556_v61 = vpop.xlane.xlu1 %555  ;;  %v559_v47 = vpop.xlane.xlu0 %558 }
 0x18e   : > { %6528 = vrsqrt.f32 %v670_v32  ;;  %v640_v60 = vmul.f32 0.0625, %v556_v61  ;;  %v641_v20 = vmul.f32 0.0625, %v559_v47  ;;  %v7783_v61 = vld [vmem:[%s10608_s4] ss:$0 sm:$0xff] }
 0x18f   : > { %6530 = vrsqrt.f32 %v671_v40 }
 0x190   : > { %v6523_v27 = vpop.eup %6522  ;;  %v672_v54 = vadd.f32 1e-05, %v640_v60  ;;  %v673_v30 = vadd.f32 1e-05, %v641_v20 }
 0x191   : > { %v562_v12 = vpop.xlane.xlu1 %561  ;;  %v565_v24 = vpop.xlane.xlu0 %564  ;;  %v731_v3 = vmul.f32 %v6523_v27, %v7534_v39 }
 0x192   : > { %6532 = vrsqrt.f32 %v672_v54  ;;  %v642_v8 = vmul.f32 0.0625, %v562_v12  ;;  %v643_v10 = vmul.f32 0.0625, %v565_v24 }
 0x193   : > { %6534 = vrsqrt.f32 %v673_v30  ;;  %v769_v40 = vmul.f32 %v7777_v52, %v731_v3 }
 0x194   : > { %v6525_v36 = vpop.eup %6524  ;;  %v674_v22 = vadd.f32 1e-05, %v642_v8  ;;  %v675_v28 = vadd.f32 1e-05, %v643_v10 }
 0x195   : > { %v6527_v32 = vpop.eup %6526  ;;  %v568_v47 = vpop.xlane.xlu1 %567  ;;  %v807_v20 = vadd.f32 %v7783_v61, %v769_v40  ;;  %v732_v27 = vmul.f32 %v6525_v36, %v7544_v55 }
 0x196   : > { %v571_v60 = vpop.xlane.xlu0 %570  ;;  %6536 = vrsqrt.f32 %v674_v22  ;;  %v644_v39 = vmul.f32 0.0625, %v568_v47  ;;  %v733_v12 = vmul.f32 %v6527_v32, %v7537_v42 }
 0x197   : > { %v645_v54 = vmul.f32 0.0625, %v571_v60  ;;  %6538 = vrsqrt.f32 %v675_v28  ;;  %6299 = vmatprep.mubr.msk.f32.mxu0 %vm345_vm0, %v807_v20  ;;  %v770_v30 = vmul.f32 %v7777_v52, %v732_v27 }
 0x198   : > { %v6529_v24 = vpop.eup %6528  ;;  %v676_v3 = vadd.f32 1e-05, %v644_v39  ;;  %v771_v10 = vmul.f32 %v7777_v52, %v733_v12 }
 0x199   : > { %v677_v8 = vadd.f32 1e-05, %v645_v54  ;;  %v6531_v23 = vpop.eup %6530  ;;  %v574_v19 = vpop.xlane.xlu1 %573  ;;  %v808_v55 = vadd.f32 %v7783_v61, %v770_v30  ;;  %v734_v36 = vmul.f32 %v6529_v24, %v7547_v58 }
 0x19a   : > { %v577_v40 = vpop.xlane.xlu0 %576  ;;  %6540 = vrsqrt.f32 %v676_v3  ;;  %v646_v22 = vmul.f32 0.0625, %v574_v19  ;;  %v809_v28 = vadd.f32 %v7783_v61, %v771_v10  ;;  %v735_v47 = vmul.f32 %v6531_v23, %v7556_v2 }
 0x19b   : > { %v647_v42 = vmul.f32 0.0625, %v577_v40  ;;  %6542 = vrsqrt.f32 %v677_v8  ;;  %6300 = vmatmul.mubr.msk.f32.vlgmr.msra.gmra.mrb[0].mxu0 %vm345_vm0, %v808_v55  ;;  %v772_v32 = vmul.f32 %v7777_v52, %v734_v36 }
 0x19c   : > { %v6533_v60 = vpop.eup %6532  ;;  %v678_v20 = vadd.f32 1e-05, %v646_v22  ;;  %6302 = vmatprep.mubr.msk.f32.mxu0 %vm345_vm0, %v809_v28  ;;  %v773_v12 = vmul.f32 %v7777_v52, %v735_v47 }
 0x19d   : > { %v679_v27 = vadd.f32 1e-05, %v647_v42  ;;  %v6535_v39 = vpop.eup %6534  ;;  %v580_v54 = vpop.xlane.xlu1 %579  ;;  %v810_v19 = vadd.f32 %v7783_v61, %v772_v32  ;;  %v736_v30 = vmul.f32 %v6533_v60, %v7559_v5 }
 0x19e   : > { %v583_v58 = vpop.xlane.xlu0 %582  ;;  %6544 = vrsqrt.f32 %v678_v20  ;;  %v648_v24 = vmul.f32 0.0625, %v580_v54  ;;  %v737_v8 = vmul.f32 %v6535_v39, %v7568_v43  ;;  %v811_v23 = vadd.f32 %v7783_v61, %v773_v12 }
 0x19f   : > { %v649_v3 = vmul.f32 0.0625, %v583_v58  ;;  %6546 = vrsqrt.f32 %v679_v27  ;;  %6303 = vmatmul.mubr.msk.f32.gmra.mrb[2].mxu0 %vm345_vm0, %v810_v19  ;;  %v774_v2 = vmul.f32 %v7777_v52, %v736_v30 }
 0x1a0   : > { %v6537_v10 = vpop.eup %6536  ;;  %v680_v40 = vadd.f32 1e-05, %v648_v24  ;;  %v775_v36 = vmul.f32 %v7777_v52, %v737_v8  ;;  %6305 = vmatprep.mubr.msk.f32.mxu0 %vm345_vm0, %v811_v23 }
 0x1a1   : > { %v681_v55 = vadd.f32 1e-05, %v649_v3  ;;  %v6539_v22 = vpop.eup %6538  ;;  %v586_v5 = vpop.xlane.xlu1 %585  ;;  %v812_v28 = vadd.f32 %v7783_v61, %v774_v2  ;;  %v738_v43 = vmul.f32 %v6537_v10, %v7571_v9 }
 0x1a2   : > { %v589_v42 = vpop.xlane.xlu0 %588  ;;  %6548 = vrsqrt.f32 %v680_v40  ;;  %v650_v32 = vmul.f32 0.0625, %v586_v5  ;;  %v813_v60 = vadd.f32 %v7783_v61, %v775_v36  ;;  %v739_v27 = vmul.f32 %v6539_v22, %v7580_v59 }
 0x1a3   : > { %v651_v47 = vmul.f32 0.0625, %v589_v42  ;;  %6550 = vrsqrt.f32 %v681_v55  ;;  %6306 = vmatmul.mubr.msk.f32.gmra.mrb[4].mxu0 %vm345_vm0, %v812_v28  ;;  %v776_v20 = vmul.f32 %v7777_v52, %v738_v43 }
 0x1a4   : > { %v6541_v39 = vpop.eup %6540  ;;  %v682_v54 = vadd.f32 1e-05, %v650_v32  ;;  %6308 = vmatprep.mubr.msk.f32.mxu0 %vm345_vm0, %v813_v60  ;;  %v777_v24 = vmul.f32 %v7777_v52, %v739_v27 }
 0x1a5   : > { %v683_v58 = vadd.f32 1e-05, %v651_v47  ;;  %v6543_v19 = vpop.eup %6542  ;;  %v592_v12 = vpop.xlane.xlu1 %591  ;;  %v814_v30 = vadd.f32 %v7783_v61, %v776_v20  ;;  %v740_v3 = vmul.f32 %v6541_v39, %v7583_v13 }
 0x1a6   : > { %v595_v9 = vpop.xlane.xlu0 %594  ;;  %6552 = vrsqrt.f32 %v682_v54  ;;  %v652_v8 = vmul.f32 0.0625, %v592_v12  ;;  %v741_v2 = vmul.f32 %v6543_v19, %v7592_v26  ;;  %v815_v59 = vadd.f32 %v7783_v61, %v777_v24 }
 0x1a7   : > { %v653_v23 = vmul.f32 0.0625, %v595_v9  ;;  %6554 = vrsqrt.f32 %v683_v58  ;;  %6309 = vmatmul.mubr.msk.f32.gmra.mrb[6].mxu0 %vm345_vm0, %v814_v30  ;;  %v778_v10 = vmul.f32 %v7777_v52, %v740_v3 }
 0x1a8   : > { %v6545_v40 = vpop.eup %6544  ;;  %v684_v55 = vadd.f32 1e-05, %v652_v8  ;;  %v779_v22 = vmul.f32 %v7777_v52, %v741_v2  ;;  %6311 = vmatprep.mubr.msk.f32.mxu0 %vm345_vm0, %v815_v59 }
 0x1a9   : > { %v685_v36 = vadd.f32 1e-05, %v653_v23  ;;  %v6547_v5 = vpop.eup %6546  ;;  %v598_v13 = vpop.xlane.xlu1 %597  ;;  %v816_v28 = vadd.f32 %v7783_v61, %v778_v10  ;;  %v742_v26 = vmul.f32 %v6545_v40, %v7595_v17 }
 0x1aa   : > { %v601_v42 = vpop.xlane.xlu0 %600  ;;  %6556 = vrsqrt.f32 %v684_v55  ;;  %v654_v43 = vmul.f32 0.0625, %v598_v13  ;;  %v817_v47 = vadd.f32 %v7783_v61, %v779_v22  ;;  %v743_v20 = vmul.f32 %v6547_v5, %v7604_v50 }
 0x1ab   : > { %v655_v32 = vmul.f32 0.0625, %v601_v42  ;;  %6558 = vrsqrt.f32 %v685_v36  ;;  %6312 = vmatmul.mubr.msk.f32.gmra.mrb[8].mxu0 %vm345_vm0, %v816_v28  ;;  %v780_v60 = vmul.f32 %v7777_v52, %v742_v26 }
 0x1ac   : > { %v6549_v27 = vpop.eup %6548  ;;  %v686_v39 = vadd.f32 1e-05, %v654_v43  ;;  %6314 = vmatprep.mubr.msk.f32.mxu0 %vm345_vm0, %v817_v47  ;;  %v781_v9 = vmul.f32 %v7777_v52, %v743_v20 }
 0x1ad   : > { %v687_v54 = vadd.f32 1e-05, %v655_v32  ;;  %v6551_v58 = vpop.eup %6550  ;;  %v604_v19 = vpop.xlane.xlu1 %603  ;;  %v818_v12 = vadd.f32 %v7783_v61, %v780_v60  ;;  %v744_v30 = vmul.f32 %v6549_v27, %v7607_v21 }
 0x1ae   : > { %v607_v17 = vpop.xlane.xlu0 %606  ;;  %6560 = vrsqrt.f32 %v686_v39  ;;  %v656_v24 = vmul.f32 0.0625, %v604_v19  ;;  %v745_v8 = vmul.f32 %v6551_v58, %v7616_v4  ;;  %v819_v50 = vadd.f32 %v7783_v61, %v781_v9 }
 0x1af   : > { %v657_v3 = vmul.f32 0.0625, %v607_v17  ;;  %6562 = vrsqrt.f32 %v687_v54  ;;  %6315 = vmatmul.mubr.msk.f32.gmra.mrb[10].mxu0 %vm345_vm0, %v818_v12  ;;  %v782_v23 = vmul.f32 %v7777_v52, %v744_v30 }
 0x1b0   : > { %v6553_v2 = vpop.eup %6552  ;;  %v688_v59 = vadd.f32 1e-05, %v656_v24  ;;  %v783_v40 = vmul.f32 %v7777_v52, %v745_v8  ;;  %6317 = vmatprep.mubr.msk.f32.mxu0 %vm345_vm0, %v819_v50 }
 0x1b1   : > { %v689_v10 = vadd.f32 1e-05, %v657_v3  ;;  %v6555_v55 = vpop.eup %6554  ;;  %v610_v21 = vpop.xlane.xlu1 %609  ;;  %v820_v22 = vadd.f32 %v7783_v61, %v782_v23  ;;  %v746_v4 = vmul.f32 %v6553_v2, %v7619_v25 }
 0x1b2   : > { %v613_v36 = vpop.xlane.xlu0 %612  ;;  %6564 = vrsqrt.f32 %v688_v59  ;;  %v658_v5 = vmul.f32 0.0625, %v610_v21  ;;  %v821_v42 = vadd.f32 %v7783_v61, %v783_v40  ;;  %v747_v26 = vmul.f32 %v6555_v55, %v7628_v35 }
 0x1b3   : > { %v659_v13 = vmul.f32 0.0625, %v613_v36  ;;  %6566 = vrsqrt.f32 %v689_v10  ;;  %6318 = vmatmul.mubr.msk.f32.gmra.mrb[12].mxu0 %vm345_vm0, %v820_v22  ;;  %v784_v28 = vmul.f32 %v7777_v52, %v746_v4 }
 0x1b4   : > { %v6557_v43 = vpop.eup %6556  ;;  %v690_v32 = vadd.f32 1e-05, %v658_v5  ;;  %6320 = vmatprep.mubr.msk.f32.mxu0 %vm345_vm0, %v821_v42  ;;  %v785_v39 = vmul.f32 %v7777_v52, %v747_v26 }
 0x1b5   : > { %v691_v47 = vadd.f32 1e-05, %v659_v13  ;;  %v6559_v60 = vpop.eup %6558  ;;  %v616_v20 = vpop.xlane.xlu1 %615  ;;  %v822_v27 = vadd.f32 %v7783_v61, %v784_v28  ;;  %v748_v54 = vmul.f32 %v6557_v43, %v7631_v29 }
 0x1b6   : > { %v619_v25 = vpop.xlane.xlu0 %618  ;;  %6568 = vrsqrt.f32 %v690_v32  ;;  %v660_v58 = vmul.f32 0.0625, %v616_v20  ;;  %v749_v17 = vmul.f32 %v6559_v60, %v7640_v0  ;;  %v823_v35 = vadd.f32 %v7783_v61, %v785_v39 }
 0x1b7   : > { %v661_v19 = vmul.f32 0.0625, %v619_v25  ;;  %6570 = vrsqrt.f32 %v691_v47  ;;  %6321 = vmatmul.mubr.msk.f32.gmra.mrb[14].mxu0 %vm345_vm0, %v822_v27  ;;  %v786_v12 = vmul.f32 %v7777_v52, %v748_v54 }
 0x1b8   : > { %v6561_v9 = vpop.eup %6560  ;;  %v692_v30 = vadd.f32 1e-05, %v660_v58  ;;  %v787_v3 = vmul.f32 %v7777_v52, %v749_v17  ;;  %6323 = vmatprep.mubr.msk.f32.mxu1 %vm345_vm0, %v823_v35 }
 0x1b9   : > { %v693_v24 = vadd.f32 1e-05, %v661_v19  ;;  %v6563_v8 = vpop.eup %6562  ;;  %v622_v29 = vpop.xlane.xlu1 %621  ;;  %v824_v23 = vadd.f32 %v7783_v61, %v786_v12  ;;  %v750_v0 = vmul.f32 %v6561_v9, %v7643_v33 }
 0x1ba   : > { %v625_v50 = vpop.xlane.xlu0 %624  ;;  %6572 = vrsqrt.f32 %v692_v30  ;;  %v662_v2 = vmul.f32 0.0625, %v622_v29  ;;  %v825_v10 = vadd.f32 %v7783_v61, %v787_v3  ;;  %v751_v55 = vmul.f32 %v6563_v8, %v7658_v16 }
 0x1bb   : > { %v663_v59 = vmul.f32 0.0625, %v625_v50  ;;  %6574 = vrsqrt.f32 %v693_v24  ;;  %6324 = vmatmul.mubr.msk.f32.vlgmr.msra.gmra.mrb[0].mxu1 %vm345_vm0, %v824_v23  ;;  %v788_v40 = vmul.f32 %v7777_v52, %v750_v0 }
 0x1bc   : > { %v6565_v21 = vpop.eup %6564  ;;  %v694_v36 = vadd.f32 1e-05, %v662_v2  ;;  %6326 = vmatprep.mubr.msk.f32.mxu1 %vm345_vm0, %v825_v10  ;;  %v789_v42 = vmul.f32 %v7777_v52, %v751_v55 }
 0x1bd   : > { %v695_v22 = vadd.f32 1e-05, %v663_v59  ;;  %v6567_v4 = vpop.eup %6566  ;;  %v628_v5 = vpop.xlane.xlu1 %627  ;;  %v826_v13 = vadd.f32 %v7783_v61, %v788_v40  ;;  %v752_v28 = vmul.f32 %v6565_v21, %v7661_v31 }
 0x1be   : > { %v631_v33 = vpop.xlane.xlu0 %630  ;;  %6576 = vrsqrt.f32 %v694_v36  ;;  %v664_v26 = vmul.f32 0.0625, %v628_v5  ;;  %v753_v32 = vmul.f32 %v6567_v4, %v7670_v41  ;;  %v827_v16 = vadd.f32 %v7783_v61, %v789_v42 }
 0x1bf   : > { %v665_v43 = vmul.f32 0.0625, %v631_v33  ;;  %6578 = vrsqrt.f32 %v695_v22  ;;  %6327 = vmatmul.mubr.msk.f32.gmra.mrb[2].mxu1 %vm345_vm0, %v826_v13  ;;  %v790_v47 = vmul.f32 %v7777_v52, %v752_v28 }
 0x1c0   : > { %v6569_v60 = vpop.eup %6568  ;;  %v696_v20 = vadd.f32 1e-05, %v664_v26  ;;  %v791_v27 = vmul.f32 %v7777_v52, %v753_v32  ;;  %6329 = vmatprep.mubr.msk.f32.mxu1 %vm345_vm0, %v827_v16  ;;  %v10628_v26 = vmov 0  }
 0x1c1   : > { %v697_v25 = vadd.f32 1e-05, %v665_v43  ;;  %v6571_v39 = vpop.eup %6570  ;;  %v634_v31 = vpop.xlane.xlu1 %633  ;;  %v828_v54 = vadd.f32 %v7783_v61, %v790_v47  ;;  %v754_v41 = vmul.f32 %v6569_v60, %v7673_v51  ;;  %6428 = vset.pattern.permute.xlu1 %v10628_v26  ;;  %6429 = vset.pattern.permute.xlu0 %v10628_v26 }
 0x1c2   : > { %6580 = vrsqrt.f32 %v696_v20  ;;  %v666_v58 = vmul.f32 0.0625, %v634_v31  ;;  %v829_v19 = vadd.f32 %v7783_v61, %v791_v27  ;;  %v755_v17 = vmul.f32 %v6571_v39, %v7682_v6  ;;  %v7917_v16 = vpop.permute.xlu0 %1228 }
 0x1c3   : > { %6582 = vrsqrt.f32 %v697_v25  ;;  %6330 = vmatmul.mubr.msk.f32.gmra.mrb[4].mxu1 %vm345_vm0, %v828_v54  ;;  %v792_v35 = vmul.f32 %v7777_v52, %v754_v41  ;;  %v10626_v20 = vmov 1  }
 0x1c4   : > { %v6573_v12 = vpop.eup %6572  ;;  %v698_v9 = vadd.f32 1e-05, %v666_v58  ;;  %6332 = vmatprep.mubr.msk.f32.mxu1 %vm345_vm0, %v829_v19  ;;  %v793_v30 = vmul.f32 %v7777_v52, %v755_v17 }
 0x1c5   : > { %v6575_v24 = vpop.eup %6574  ;;  %v830_v51 = vadd.f32 %v7783_v61, %v792_v35  ;;  %v756_v3 = vmul.f32 %v6573_v12, %v7685_v45 }
 0x1c6   : > { %6584 = vrsqrt.f32 %v698_v9  ;;  %v831_v8 = vadd.f32 %v7783_v61, %v793_v30  ;;  %v757_v6 = vmul.f32 %v6575_v24, %v7694_v38  ;;  %v7926_v60 = vpop.permute.xlu0 %1239 }
 0x1c7   : > { %6333 = vmatmul.mubr.msk.f32.gmra.mrb[6].mxu1 %vm345_vm0, %v830_v51  ;;  %v794_v29 = vmul.f32 %v7777_v52, %v756_v3 }
 0x1c8   : > { %v6577_v50 = vpop.eup %6576  ;;  %6335 = vmatprep.mubr.msk.f32.mxu1 %vm345_vm0, %v831_v8  ;;  %v795_v23 = vmul.f32 %v7777_v52, %v757_v6 }
 0x1c9   : > { %v6579_v0 = vpop.eup %6578  ;;  %v832_v2 = vadd.f32 %v7783_v61, %v794_v29  ;;  %v758_v59 = vmul.f32 %v6577_v50, %v7697_v49 }
 0x1ca   : > { %v833_v45 = vadd.f32 %v7783_v61, %v795_v23  ;;  %v759_v10 = vmul.f32 %v6579_v0, %v7706_v1  ;;  %v7939_v54 = vpop.permute.xlu0 %1250 }
 0x1cb   : > { %6336 = vmatmul.mubr.msk.f32.gmra.mrb[8].mxu1 %vm345_vm0, %v832_v2  ;;  %v796_v38 = vmul.f32 %v7777_v52, %v758_v59 }
 0x1cc   : > { %v6581_v40 = vpop.eup %6580  ;;  %6338 = vmatprep.mubr.msk.f32.mxu1 %vm345_vm0, %v833_v45  ;;  %v797_v55 = vmul.f32 %v7777_v52, %v759_v10  ;;  %v10630_v10 = vmov 2  }
 0x1cd   : > { %v6583_v21 = vpop.eup %6582  ;;  %v834_v36 = vadd.f32 %v7783_v61, %v796_v38  ;;  %v760_v22 = vmul.f32 %v6581_v40, %v7709_v53 }
 0x1ce   : > { %v835_v49 = vadd.f32 %v7783_v61, %v797_v55  ;;  %v761_v4 = vmul.f32 %v6583_v21, %v7718_v37  ;;  %v1262_v17 = vpop.permute.xlu0 %1261 }
 0x1cf   : > { %6339 = vmatmul.mubr.msk.f32.gmra.mrb[10].mxu1 %vm345_vm0, %v834_v36  ;;  %v798_v1 = vmul.f32 %v7777_v52, %v760_v22 }
 0x1d0   : > { %v6585_v5 = vpop.eup %6584  ;;  %6341 = vmatprep.mubr.msk.f32.mxu1 %vm345_vm0, %v835_v49  ;;  %v799_v33 = vmul.f32 %v7777_v52, %v761_v4 }
 0x1d1   : > { %v836_v13 = vadd.f32 %v7783_v61, %v798_v1  ;;  %v762_v42 = vmul.f32 %v6585_v5, %v7721_v57  ;;  %v10644_v1 = vmov 3  }
 0x1d2   : > { %v837_v28 = vadd.f32 %v7783_v61, %v799_v33  ;;  %v7957_v51 = vpop.permute.xlu0 %1272 }
 0x1d3   : > { %6342 = vmatmul.mubr.msk.f32.gmra.mrb[12].mxu1 %vm345_vm0, %v836_v13  ;;  %v800_v53 = vmul.f32 %v7777_v52, %v762_v42 }
 0x1d4   : > { %6344 = vmatprep.mubr.msk.f32.mxu1 %vm345_vm0, %v837_v28 }
 0x1d5   : > { %v838_v37 = vadd.f32 %v7783_v61, %v800_v53  ;;  %v7924_v61 = vpop.permute.xlu1 %1221 }
 0x1d6   : > { %v7963_v29 = vpop.permute.xlu0 %1283 }
 0x1d7   : > { %6345 = vmatmul.mubr.msk.f32.gmra.mrb[14].mxu1 %vm345_vm0, %v838_v37 }
 0x1d9   : > { %v7935_v39 = vpop.permute.xlu1 %1232 }
 0x1da   : > { %v7969_v45 = vpop.permute.xlu0 %1294 }
 0x1dd   : > { %v7945_v19 = vpop.permute.xlu1 %1243 }
 0x1de   : > { %v7981_v21 = vpop.permute.xlu0 %1305 }
 0x1e1   : > { %v7953_v30 = vpop.permute.xlu1 %1254 }
 0x1e2   : > { %v8000_v33 = vpop.permute.xlu0 %1316 }
 0x1e5   : > { %v1266_v6 = vpop.permute.xlu1 %1265 }
 0x26e   : > { %v6301_v43 = vpop.f32.mrb[0].mxu0 }
 0x26f   : > { %v7915_v57 = vadd.f32 %v6301_v43, %v7750_v62  ;;  %v1003_v32 = vpop.f32.mrb[1].mxu0 }
 0x270   : > { %v7992_v49 = vadd.f32 %v7752_v63, %v1003_v32  ;;  %v1328_v63 = vpop.permute.xlu0 %1327 }
 0x271   : > { %10861 = vst [vmem:[#allocation19_spill] sm:$0xff] %v7915_v57  ;;  %1444 = vperm.xlu1 %6428, %v7915_v57  }
 0x272   : > { %v7920_v52 = vpop.f32.mrb[2].mxu0  ;;  %10864 = vst [vmem:[#allocation22_spill] sm:$0xff] %v7992_v49 }
 0x273   : > { %v7922_v47 = vpop.f32.mrb[3].mxu0 }
 0x275   : > { %6431 = vset.pattern.permute.xlu1 %v10626_v20 }
 0x276   : > { %v7929_v25 = vpop.f32.mrb[4].mxu0 }
 0x277   : > { %v7931_v62 = vpop.f32.mrb[5].mxu0 }
 0x27a   : > { %v7933_v27 = vpop.f32.mrb[6].mxu0 }
 0x27b   : > { %v7937_v31 = vpop.f32.mrb[7].mxu0 }
 0x27e   : > { %v7941_v41 = vpop.f32.mrb[8].mxu0 }
 0x27f   : > { %v7943_v58 = vpop.f32.mrb[9].mxu0 }
 0x282   : > { %v7947_v35 = vpop.f32.mrb[10].mxu0 }
 0x283   : > { %v7949_v12 = vpop.f32.mrb[11].mxu0 }
 0x286   : > { %v7951_v9 = vpop.f32.mrb[12].mxu0 }
 0x287   : > { %v7955_v24 = vpop.f32.mrb[13].mxu0 }
 0x28a   : > { %v7959_v3 = vpop.f32.mrb[14].mxu0 }
 0x28b   : > { %v7961_v8 = vpop.f32.mrb[15].mxu0 }
 0x28e   : > { %v6325_v50 = vpop.f32.mrb[0].mxu1 }
 0x28f   : > { %v7965_v23 = vadd.f32 %v6325_v50, %v1266_v6  ;;  %v1083_v0 = vpop.f32.mrb[1].mxu1  ;;  %v1277_v6 = vpop.permute.xlu1 %1276 }
 0x290   : > { %v7979_v55 = vadd.f32 %v1262_v17, %v1083_v0  ;;  %v8028_v17 = vadd.f32 %v7920_v52, %v7761_v56  ;;  %v8044_v56 = vadd.f32 %v7755_v44, %v7922_v47  ;;  %v8065_v44 = vadd.f32 %v7929_v25, %v7766_v34 }
 0x291   : > { %10862 = vst [vmem:[#allocation20_spill] sm:$0xff] %v7965_v23  ;;  %2657 = vperm.xlu1 %6431, %v7965_v23   ;;  %1492 = vperm.xlu0 %6429, %v7965_v23   ;;  %v8087_v34 = vadd.f32 %v7758_v14, %v7931_v62  ;;  %v8105_v0 = vadd.f32 %v7933_v27, %v7772_v46 }
 0x292   : > { %v6328_v2 = vpop.f32.mrb[2].mxu1  ;;  %10863 = vst [vmem:[#allocation21_spill] sm:$0xff] %v7979_v55  ;;  %10866 = vst [vmem:[#allocation24_spill] sm:$0xff] %v8028_v17 }
 0x293   : > { %v1093_v59 = vpop.f32.mrb[3].mxu1  ;;  %v8034_v50 = vadd.f32 %v6328_v2, %v1277_v6  ;;  %10868 = vst [vmem:[#allocation26_spill] sm:$0xff] %v8044_v56  ;;  %10870 = vst [vmem:[#allocation28_spill] sm:$0xff] %v8065_v44  ;;  %v1288_v47 = vpop.permute.xlu1 %1287 }
 0x294   : > { %v8051_v52 = vadd.f32 %v7957_v51, %v1093_v59  ;;  %10872 = vst [vmem:[#allocation30_spill] sm:$0xff] %v8087_v34  ;;  %10874 = vst [vmem:[#allocation32_spill] sm:$0xff] %v8105_v0  ;;  %v8132_v59 = vpop.permute.xlu0 %1338 }
 0x295   : > { %6432 = vset.pattern.permute.xlu1 %v10630_v10  ;;  %6430 = vset.pattern.permute.xlu0 %v10626_v20  ;;  %10867 = vst [vmem:[#allocation25_spill] sm:$0xff] %v8034_v50 }
 0x296   : > { %3764 = vperm.xlu1 %6432, %v7915_v57   ;;  %2609 = vperm.xlu0 %6430, %v7915_v57   ;;  %v7975_v38 = vpop.f32.mrb[4].mxu1  ;;  %10869 = vst [vmem:[#allocation27_spill] sm:$0xff] %v8051_v52 }
 0x297   : > { %v7977_v40 = vpop.f32.mrb[5].mxu1  ;;  %v8071_v51 = vadd.f32 %v7975_v38, %v1288_v47  ;;  %v1299_v14 = vpop.permute.xlu1 %1298 }
 0x298   : > { %v8095_v25 = vadd.f32 %v7963_v29, %v7977_v40  ;;  %v8138_v40 = vadd.f32 %v7763_v18, %v7937_v31 }
 0x299   : > { %10871 = vst [vmem:[#allocation29_spill] sm:$0xff] %v8071_v51 }
 0x29a   : > { %6436 = vset.pattern.permute.xlu1 %v10628_v26  ;;  %6433 = vset.pattern.permute.xlu0 %v10630_v10  ;;  %v7985_v36 = vpop.f32.mrb[6].mxu1  ;;  %10873 = vst [vmem:[#allocation31_spill] sm:$0xff] %v8095_v25  ;;  %10876 = vst [vmem:[#allocation34_spill] sm:$0xff] %v8138_v40 }
 0x29b   : > { %3812 = vperm.xlu0 %6433, %v7965_v23   ;;  %v7988_v22 = vpop.f32.mrb[7].mxu1  ;;  %1489 = vperm.xlu1 %6436, %v7979_v55   ;;  %v1310_v62 = vpop.permute.xlu1 %1309  ;;  %v8112_v29 = vadd.f32 %v7985_v36, %v1299_v14 }
 0x29d   : > { %10875 = vst [vmem:[#allocation33_spill] sm:$0xff] %v8112_v29 }
 0x29e   : > { %v7994_v4 = vpop.f32.mrb[8].mxu1 }
 0x29f   : > { %6434 = vset.pattern.permute.xlu0 %v10644_v1  ;;  %v7997_v5 = vpop.f32.mrb[9].mxu1  ;;  %6437 = vset.pattern.permute.xlu1 %v10626_v20  ;;  %v8114_v2 = vpop.permute.xlu1 %1320 }
 0x2a0   : > { %4919 = vperm.xlu0 %6434, %v7915_v57   ;;  %2606 = vperm.xlu1 %6437, %v7992_v49  }
 0x2a2   : > { %v8004_v13 = vpop.f32.mrb[10].mxu1 }
 0x2a3   : > { %v8006_v42 = vpop.f32.mrb[11].mxu1  ;;  %v8121_v46 = vpop.permute.xlu1 %1331 }
 0x2a4   : > { %4967 = vperm.xlu0 %6434, %v7965_v23   ;;  %6440 = vset.pattern.permute.xlu1 %v10630_v10  ;;  %v10893_v23 = vmov 3  }
 0x2a5   : > { %3809 = vperm.xlu1 %6440, %v7979_v55  }
 0x2a6   : > { %v8011_v28 = vpop.f32.mrb[12].mxu1 }
 0x2a7   : > { %v1143_v53 = vpop.f32.mrb[13].mxu1  ;;  %v8127_v27 = vpop.permute.xlu1 %1342 }
 0x2a8   : > { %v8013_v37 = vadd.f32 %v1328_v63, %v1143_v53  ;;  %6435 = vset.pattern.permute.xlu0 %v10628_v26  ;;  %v8150_v53 = vadd.f32 %v7969_v45, %v7988_v22  ;;  %v8168_v22 = vadd.f32 %v7941_v41, %v7924_v61 }
 0x2a9   : > { %1441 = vperm.xlu0 %6435, %v7992_v49   ;;  %6441 = vset.pattern.permute.xlu1 %v10644_v1 }
 0x2aa   : > { %10865 = vst [vmem:[#allocation23_spill] sm:$0xff] %v8013_v37  ;;  %v8018_v43 = vpop.f32.mrb[14].mxu1  ;;  %4916 = vperm.xlu1 %6441, %v7992_v49   ;;  %10877 = vst [vmem:[#allocation35_spill] sm:$0xff] %v8150_v53 }
 0x2ab   : > { %v8021_v32 = vpop.f32.mrb[15].mxu1  ;;  %10878 = vst [vmem:[#allocation36_spill] sm:$0xff] %v8168_v22 }
 0x2ad   : > { %6438 = vset.pattern.permute.xlu0 %v10626_v20 }
 0x2ae   : > { %2654 = vperm.xlu0 %6438, %v7979_v55   ;;  %4964 = vperm.xlu1 %6441, %v7979_v55  }
 0x2b2   : > { %6439 = vset.pattern.permute.xlu0 %v10630_v10  ;;  %6443 = vset.pattern.permute.xlu1 %v10626_v20 }
 0x2b3   : > { %3761 = vperm.xlu0 %6439, %v7992_v49   ;;  %2615 = vperm.xlu1 %6443, %v8028_v17  }
 0x2b7   : > { %6442 = vset.pattern.permute.xlu0 %v10628_v26  ;;  %2663 = vperm.xlu1 %6443, %v8034_v50  }
 0x2b8   : > { %1450 = vperm.xlu0 %6442, %v8028_v17  }
 0x2bb   : > { %6445 = vset.pattern.permute.xlu1 %v10644_v1 }
 0x2bc   : > { %1498 = vperm.xlu0 %6442, %v8034_v50   ;;  %4925 = vperm.xlu1 %6445, %v8028_v17  }
 0x2c0   : > { %6444 = vset.pattern.permute.xlu0 %v10630_v10  ;;  %6447 = vset.pattern.permute.xlu1 %v10628_v26 }
 0x2c1   : > { %3770 = vperm.xlu0 %6444, %v8028_v17   ;;  %1447 = vperm.xlu1 %6447, %v8044_v56   ;;  %v8391_v17 = vadd.f32 %v8018_v43, %v8127_v27 }
 0x2c3   : > { %10907 = vst [vmem:[#allocation61_spill] sm:$0xff] %v8391_v17 }
 0x2c5   : > { %3818 = vperm.xlu0 %6444, %v8034_v50   ;;  %1495 = vperm.xlu1 %6447, %v8051_v52  }
 0x2c9   : > { %6446 = vset.pattern.permute.xlu0 %v10644_v1  ;;  %6448 = vset.pattern.permute.xlu1 %v10626_v20 }
 0x2ca   : > { %4973 = vperm.xlu0 %6446, %v8034_v50   ;;  %2612 = vperm.xlu1 %6448, %v8044_v56   ;;  %v10890_v50 = vmov 2  }
 0x2ce   : > { %6449 = vset.pattern.permute.xlu0 %v10626_v20  ;;  %6450 = vset.pattern.permute.xlu1 %v10630_v10 }
 0x2cf   : > { %2660 = vperm.xlu0 %6449, %v8051_v52   ;;  %3767 = vperm.xlu1 %6450, %v8044_v56  }
 0x2d3   : > { %6452 = vset.pattern.permute.xlu0 %v10628_v26  ;;  %3815 = vperm.xlu1 %6450, %v8051_v52  }
 0x2d4   : > { %1456 = vperm.xlu0 %6452, %v8065_v44  }
 0x2d7   : > { %6451 = vset.pattern.permute.xlu1 %v10644_v1 }
 0x2d8   : > { %1504 = vperm.xlu0 %6452, %v8071_v51   ;;  %4922 = vperm.xlu1 %6451, %v8044_v56  }
 0x2dc   : > { %6454 = vset.pattern.permute.xlu0 %v10630_v10  ;;  %4970 = vperm.xlu1 %6451, %v8051_v52   ;;  %v8253_v52 = vadd.f32 %v8004_v13, %v8114_v2 }
 0x2dd   : > { %3776 = vperm.xlu0 %6454, %v8065_v44  }
 0x2de   : > { %10891 = vst [vmem:[#allocation46_spill] sm:$0xff] %v8253_v52 }
 0x2e0   : > { %6453 = vset.pattern.permute.xlu1 %v10626_v20 }
 0x2e1   : > { %3824 = vperm.xlu0 %6454, %v8071_v51   ;;  %2621 = vperm.xlu1 %6453, %v8065_v44  }
 0x2e5   : > { %6456 = vset.pattern.permute.xlu0 %v10644_v1  ;;  %2669 = vperm.xlu1 %6453, %v8071_v51  }
 0x2e6   : > { %4979 = vperm.xlu0 %6456, %v8071_v51   ;;  %v10887_v51 = vmov 0  }
 0x2e9   : > { %6455 = vset.pattern.permute.xlu1 %v10644_v1 }
 0x2ea   : > { %6458 = vset.pattern.permute.xlu0 %v10626_v20  ;;  %4931 = vperm.xlu1 %6455, %v8065_v44  }
 0x2eb   : > { %2618 = vperm.xlu0 %6458, %v8087_v34  }
 0x2ee   : > { %6457 = vset.pattern.permute.xlu1 %v10628_v26 }
 0x2ef   : > { %1453 = vperm.xlu1 %6457, %v8087_v34   ;;  %2666 = vperm.xlu0 %6458, %v8095_v25  }
 0x2f0   : > { %v8134_v38 = vpop.permute.xlu1 %1444 }
 0x2f3   : > { %6460 = vset.pattern.permute.xlu0 %v10644_v1  ;;  %1501 = vperm.xlu1 %6457, %v8095_v25  }
 0x2f4   : > { %4928 = vperm.xlu0 %6460, %v8087_v34  }
 0x2f7   : > { %6459 = vset.pattern.permute.xlu1 %v10630_v10 }
 0x2f8   : > { %6462 = vset.pattern.permute.xlu0 %v10628_v26  ;;  %3773 = vperm.xlu1 %6459, %v8087_v34  }
 0x2f9   : > { %1462 = vperm.xlu0 %6462, %v8105_v0  }
 0x2fc   : > { %3821 = vperm.xlu1 %6459, %v8095_v25  }
 0x2fd   : > { %1510 = vperm.xlu0 %6462, %v8112_v29  }
 0x300   : > { %6461 = vset.pattern.permute.xlu1 %v10644_v1 }
 0x301   : > { %6464 = vset.pattern.permute.xlu0 %v10630_v10  ;;  %4976 = vperm.xlu1 %6461, %v8095_v25   ;;  %v8241_v25 = vadd.f32 %v7947_v35, %v7935_v39 }
 0x302   : > { %3782 = vperm.xlu0 %6464, %v8105_v0  }
 0x303   : > { %10889 = vst [vmem:[#allocation45_spill] sm:$0xff] %v8241_v25 }
 0x305   : > { %6463 = vset.pattern.permute.xlu1 %v10626_v20 }
 0x306   : > { %3830 = vperm.xlu0 %6464, %v8112_v29   ;;  %2627 = vperm.xlu1 %6463, %v8105_v0  }
 0x30a   : > { %6466 = vset.pattern.permute.xlu0 %v10644_v1  ;;  %2675 = vperm.xlu1 %6463, %v8112_v29  }
 0x30b   : > { %4985 = vperm.xlu0 %6466, %v8112_v29  }
 0x30e   : > { %6465 = vset.pattern.permute.xlu1 %v10644_v1 }
 0x30f   : > { %6468 = vset.pattern.permute.xlu0 %v10626_v20  ;;  %4937 = vperm.xlu1 %6465, %v8105_v0   ;;  %v8179_v20 = vadd.f32 %v7994_v4, %v1310_v62  ;;  %v10883_v62 = vmov 1   ;;  %v8325_v0 = vadd.f32 %v8011_v28, %v8121_v46 }
 0x310   : > { %v8143_v36 = vpop.permute.xlu1 %2657  ;;  %2624 = vperm.xlu0 %6468, %v8138_v40   ;;  %v8146_v63 = vpop.permute.xlu0 %1492 }
 0x311   : > { %10880 = vst [vmem:[#allocation38_spill] sm:$0xff] %v8179_v20  ;;  %10901 = vst [vmem:[#allocation55_spill] sm:$0xff] %v8325_v0 }
 0x313   : > { %6467 = vset.pattern.permute.xlu1 %v10628_v26 }
 0x314   : > { %1459 = vperm.xlu1 %6467, %v8138_v40   ;;  %2672 = vperm.xlu0 %6468, %v8150_v53  }
 0x315   : > { %v8155_v18 = vpop.permute.xlu1 %3764  ;;  %v8157_v31 = vpop.permute.xlu0 %2609 }
 0x318   : > { %6470 = vset.pattern.permute.xlu0 %v10644_v1  ;;  %1507 = vperm.xlu1 %6467, %v8150_v53  }
 0x319   : > { %4934 = vperm.xlu0 %6470, %v8138_v40  }
 0x31a   : > { %v8162_v6 = vpop.permute.xlu1 %1489  ;;  %v8164_v45 = vpop.permute.xlu0 %3812 }
 0x31c   : > { %6469 = vset.pattern.permute.xlu1 %v10630_v10 }
 0x31d   : > { %6472 = vset.pattern.permute.xlu0 %v10628_v26  ;;  %3779 = vperm.xlu1 %6469, %v8138_v40  }
 0x31e   : > { %1468 = vperm.xlu0 %6472, %v8168_v22  }
 0x31f   : > { %v8174_v47 = vpop.permute.xlu1 %2606  ;;  %v8176_v14 = vpop.permute.xlu0 %4919 }
 0x320   : > { %10879 = vst [vmem:[#allocation37_spill] sm:$0xff] %v8176_v14 }
 0x321   : > { %3827 = vperm.xlu1 %6469, %v8150_v53  }
 0x322   : > { %1516 = vperm.xlu0 %6472, %v8179_v20  }
 0x323   : > { %v8183_v61 = vpop.permute.xlu0 %4967 }
 0x324   : > { %10881 = vst [vmem:[#allocation39_spill] sm:$0xff] %v8183_v61  ;;  %v8185_v41 = vpop.permute.xlu1 %3809 }
 0x325   : > { %6471 = vset.pattern.permute.xlu1 %v10644_v1 }
 0x326   : > { %6474 = vset.pattern.permute.xlu0 %v10630_v10  ;;  %4982 = vperm.xlu1 %6471, %v8150_v53  }
 0x327   : > { %3788 = vperm.xlu0 %6474, %v8168_v22  }
 0x328   : > { %v8191_v26 = vpop.permute.xlu0 %1441 }
 0x329   : > { %v8193_v4 = vpop.permute.xlu1 %4916 }
 0x32a   : > { %10882 = vst [vmem:[#allocation40_spill] sm:$0xff] %v8193_v4  ;;  %6473 = vset.pattern.permute.xlu1 %v10883_v62  ;;  %v8211_v4 = vadd.f32 %v7769_v48, %v7943_v58 }
 0x32b   : > { %3836 = vperm.xlu0 %6474, %v8179_v20   ;;  %2633 = vperm.xlu1 %6473, %v8168_v22  }
 0x32c   : > { %10885 = vst [vmem:[#allocation42_spill] sm:$0xff] %v8211_v4 }
 0x32d   : > { %v8198_v61 = vpop.permute.xlu1 %4964  ;;  %v8200_v14 = vpop.permute.xlu0 %2654 }
 0x32e   : > { %10884 = vst [vmem:[#allocation41_spill] sm:$0xff] %v8198_v61 }
 0x32f   : > { %6476 = vset.pattern.permute.xlu0 %v10644_v1  ;;  %2681 = vperm.xlu1 %6473, %v8179_v20  }
 0x330   : > { %4991 = vperm.xlu0 %6476, %v8179_v20   ;;  %v8221_v20 = vadd.f32 %v7981_v21, %v7997_v5 }
 0x332   : > { %v8205_v10 = vpop.permute.xlu1 %2615  ;;  %v8207_v29 = vpop.permute.xlu0 %3761  ;;  %10886 = vst [vmem:[#allocation43_spill] sm:$0xff] %v8221_v20 }
 0x333   : > { %6475 = vset.pattern.permute.xlu1 %v10644_v1 }
 0x334   : > { %6478 = vset.pattern.permute.xlu0 %v10883_v62  ;;  %4943 = vperm.xlu1 %6475, %v8168_v22   ;;  %v8285_v22 = vadd.f32 %v7917_v16, %v7949_v12 }
 0x335   : > { %2630 = vperm.xlu0 %6478, %v8211_v4  }
 0x336   : > { %v8217_v61 = vpop.permute.xlu1 %2663  ;;  %10895 = vst [vmem:[#allocation49_spill] sm:$0xff] %v8285_v22 }
 0x337   : > { %v8223_v53 = vpop.permute.xlu0 %1450 }
 0x338   : > { %6477 = vset.pattern.permute.xlu1 %v10887_v51 }
 0x339   : > { %1465 = vperm.xlu1 %6477, %v8211_v4   ;;  %2678 = vperm.xlu0 %6478, %v8221_v20  }
 0x33b   : > { %v8228_v48 = vpop.permute.xlu1 %4925  ;;  %v8230_v58 = vpop.permute.xlu0 %1498 }
 0x33c   : > { %10888 = vst [vmem:[#allocation44_spill] sm:$0xff] %v8228_v48 }
 0x33d   : > { %6480 = vset.pattern.permute.xlu0 %v10644_v1  ;;  %1513 = vperm.xlu1 %6477, %v8221_v20  }
 0x33e   : > { %4940 = vperm.xlu0 %6480, %v8211_v4  }
 0x340   : > { %v8235_v21 = vpop.permute.xlu1 %1447  ;;  %v8237_v5 = vpop.permute.xlu0 %3770 }
 0x341   : > { %6479 = vset.pattern.permute.xlu1 %v10890_v50 }
 0x342   : > { %6482 = vset.pattern.permute.xlu0 %v10887_v51  ;;  %3785 = vperm.xlu1 %6479, %v8211_v4  }
 0x343   : > { %1474 = vperm.xlu0 %6482, %v8241_v25  }
 0x344   : > { %v8247_v1 = vpop.permute.xlu1 %1495  ;;  %v8249_v48 = vpop.permute.xlu0 %3818 }
 0x346   : > { %3833 = vperm.xlu1 %6479, %v8221_v20  }
 0x347   : > { %1522 = vperm.xlu0 %6482, %v8253_v52  }
 0x349   : > { %v8257_v39 = vpop.permute.xlu1 %2612  ;;  %v8259_v35 = vpop.permute.xlu0 %4973 }
 0x34a   : > { %10892 = vst [vmem:[#allocation47_spill] sm:$0xff] %v8259_v35  ;;  %6481 = vset.pattern.permute.xlu1 %v10893_v23 }
 0x34b   : > { %6484 = vset.pattern.permute.xlu0 %v10890_v50  ;;  %4988 = vperm.xlu1 %6481, %v8221_v20  }
 0x34c   : > { %3794 = vperm.xlu0 %6484, %v8241_v25  }
 0x34e   : > { %v8265_v55 = vpop.permute.xlu1 %3767  ;;  %v8267_v13 = vpop.permute.xlu0 %2660 }
 0x34f   : > { %6483 = vset.pattern.permute.xlu1 %v10883_v62 }
 0x350   : > { %3842 = vperm.xlu0 %6484, %v8253_v52   ;;  %2639 = vperm.xlu1 %6483, %v8241_v25  }
 0x352   : > { %v8272_v2 = vpop.permute.xlu1 %3815 }
 0x353   : > { %v8274_v35 = vpop.permute.xlu0 %1456 }
 0x354   : > { %6486 = vset.pattern.permute.xlu0 %v10893_v23  ;;  %2687 = vperm.xlu1 %6483, %v8253_v52  }
 0x355   : > { %4997 = vperm.xlu0 %6486, %v8253_v52   ;;  %v8295_v52 = vadd.f32 %v8000_v33, %v8006_v42 }
 0x357   : > { %v8279_v20 = vpop.permute.xlu1 %4922  ;;  %v8281_v4 = vpop.permute.xlu0 %1504  ;;  %10897 = vst [vmem:[#allocation51_spill] sm:$0xff] %v8295_v52 }
 0x358   : > { %10894 = vst [vmem:[#allocation48_spill] sm:$0xff] %v8279_v20  ;;  %6485 = vset.pattern.permute.xlu1 %v10893_v23 }
 0x359   : > { %6488 = vset.pattern.permute.xlu0 %v10883_v62  ;;  %4949 = vperm.xlu1 %6485, %v8241_v25  }
 0x35a   : > { %2636 = vperm.xlu0 %6488, %v8285_v22  }
 0x35b   : > { %v8291_v40 = vpop.permute.xlu1 %4970 }
 0x35c   : > { %10896 = vst [vmem:[#allocation50_spill] sm:$0xff] %v8291_v40  ;;  %v8297_v20 = vpop.permute.xlu0 %3776  ;;  %v8315_v40 = vadd.f32 %v7951_v9, %v7945_v19 }
 0x35d   : > { %6487 = vset.pattern.permute.xlu1 %v10887_v51 }
 0x35e   : > { %1471 = vperm.xlu1 %6487, %v8285_v22   ;;  %2684 = vperm.xlu0 %6488, %v8295_v52   ;;  %10899 = vst [vmem:[#allocation53_spill] sm:$0xff] %v8315_v40 }
 0x360   : > { %v8302_v16 = vpop.permute.xlu1 %2621  ;;  %v8304_v12 = vpop.permute.xlu0 %3824 }
 0x362   : > { %6490 = vset.pattern.permute.xlu0 %v10893_v23  ;;  %1519 = vperm.xlu1 %6487, %v8295_v52  }
 0x363   : > { %4946 = vperm.xlu0 %6490, %v8285_v22  }
 0x364   : > { %v8309_v33 = vpop.permute.xlu1 %2669 }
 0x365   : > { %v8311_v42 = vpop.permute.xlu0 %4979 }
 0x366   : > { %10898 = vst [vmem:[#allocation52_spill] sm:$0xff] %v8311_v42  ;;  %6489 = vset.pattern.permute.xlu1 %v10890_v50 }
 0x367   : > { %6492 = vset.pattern.permute.xlu0 %v10887_v51  ;;  %3791 = vperm.xlu1 %6489, %v8285_v22  }
 0x368   : > { %1480 = vperm.xlu0 %6492, %v8315_v40  }
 0x369   : > { %v8321_v25 = vpop.permute.xlu1 %4931 }
 0x36a   : > { %10900 = vst [vmem:[#allocation54_spill] sm:$0xff] %v8321_v25  ;;  %v8327_v34 = vpop.permute.xlu0 %2618  ;;  %v8350_v25 = vadd.f32 %v7926_v60, %v7955_v24 }
 0x36b   : > { %3839 = vperm.xlu1 %6489, %v8295_v52  }
 0x36c   : > { %1528 = vperm.xlu0 %6492, %v8325_v0   ;;  %10903 = vst [vmem:[#allocation57_spill] sm:$0xff] %v8350_v25 }
 0x36e   : > { %v8331_v19 = vpop.permute.xlu1 %1453  ;;  %v8333_v9 = vpop.permute.xlu0 %2666 }
 0x36f   : > { %6491 = vset.pattern.permute.xlu1 %v10893_v23 }
 0x370   : > { %4994 = vperm.xlu1 %6491, %v8295_v52   ;;  %6494 = vset.pattern.permute.xlu0 %v10890_v50 }
 0x371   : > { %3800 = vperm.xlu0 %6494, %v8315_v40  }
 0x372   : > { %v8339_v28 = vpop.permute.xlu1 %1501 }
 0x373   : > { %v8341_v46 = vpop.permute.xlu0 %4928 }
 0x374   : > { %10902 = vst [vmem:[#allocation56_spill] sm:$0xff] %v8341_v46  ;;  %6493 = vset.pattern.permute.xlu1 %v10883_v62 }
 0x375   : > { %2645 = vperm.xlu1 %6493, %v8315_v40   ;;  %3848 = vperm.xlu0 %6494, %v8325_v0  }
 0x377   : > { %v8346_v42 = vpop.permute.xlu1 %3773 }
 0x378   : > { %v8352_v52 = vpop.permute.xlu0 %1462 }
 0x379   : > { %2693 = vperm.xlu1 %6493, %v8325_v0   ;;  %6497 = vset.pattern.permute.xlu0 %v10883_v62 }
 0x37a   : > { %2642 = vperm.xlu0 %6497, %v8350_v25  }
 0x37b   : > { %v8357_v46 = vpop.permute.xlu1 %3821 }
 0x37c   : > { %v8359_v22 = vpop.permute.xlu0 %1510 }
 0x37d   : > { %6495 = vset.pattern.permute.xlu1 %v10893_v23 }
 0x37e   : > { %4955 = vperm.xlu1 %6495, %v8315_v40   ;;  %2690 = vperm.xlu0 %6497, %v8013_v37  }
 0x380   : > { %v8364_v60 = vpop.permute.xlu1 %4976 }
 0x381   : > { %10904 = vst [vmem:[#allocation58_spill] sm:$0xff] %v8364_v60  ;;  %v8366_v24 = vpop.permute.xlu0 %3782  ;;  %v8382_v60 = vadd.f32 %v7959_v3, %v7953_v30 }
 0x382   : > { %5003 = vperm.xlu1 %6495, %v8325_v0   ;;  %6499 = vset.pattern.permute.xlu0 %v10893_v23 }
 0x383   : > { %4952 = vperm.xlu0 %6499, %v8350_v25   ;;  %10905 = vst [vmem:[#allocation59_spill] sm:$0xff] %v8382_v60 }
 0x385   : > { %v8371_v44 = vpop.permute.xlu1 %2627  ;;  %v8373_v56 = vpop.permute.xlu0 %3830 }
 0x386   : > { %6496 = vset.pattern.permute.xlu1 %v10887_v51 }
 0x387   : > { %1477 = vperm.xlu1 %6496, %v8350_v25   ;;  %5000 = vperm.xlu0 %6499, %v8013_v37  }
 0x389   : > { %v8378_v40 = vpop.permute.xlu1 %2675 }
 0x38a   : > { %v8384_v0 = vpop.permute.xlu0 %4985 }
 0x38b   : > { %10906 = vst [vmem:[#allocation60_spill] sm:$0xff] %v8384_v0  ;;  %1525 = vperm.xlu1 %6496, %v8013_v37   ;;  %6500 = vset.pattern.permute.xlu0 %v10887_v51  ;;  %v8416_v0 = vadd.f32 %v7939_v54, %v7961_v8 }
 0x38c   : > { %1486 = vperm.xlu0 %6500, %v8382_v60  }
 0x38d   : > { %10910 = vst [vmem:[#allocation64_spill] sm:$0xff] %v8416_v0 }
 0x38e   : > { %v8393_v57 = vpop.permute.xlu1 %4937 }
 0x38f   : > { %10908 = vst [vmem:[#allocation62_spill] sm:$0xff] %v8393_v57  ;;  %6498 = vset.pattern.permute.xlu1 %v10890_v50  ;;  %v8396_v49 = vpop.permute.xlu0 %2624 }
 0x390   : > { %3797 = vperm.xlu1 %6498, %v8350_v25   ;;  %1534 = vperm.xlu0 %6500, %v8391_v17  }
 0x393   : > { %v8400_v30 = vpop.permute.xlu1 %1459  ;;  %v8402_v3 = vpop.permute.xlu0 %2672 }
 0x394   : > { %3845 = vperm.xlu1 %6498, %v8013_v37   ;;  %6502 = vset.pattern.permute.xlu0 %v10890_v50 }
 0x395   : > { %3806 = vperm.xlu0 %6502, %v8382_v60  }
 0x397   : > { %v8407_v43 = vpop.permute.xlu1 %1507 }
 0x398   : > { %6501 = vset.pattern.permute.xlu1 %v10883_v62  ;;  %v8410_v27 = vpop.permute.xlu0 %4934 }
 0x399   : > { %10909 = vst [vmem:[#allocation63_spill] sm:$0xff] %v8410_v27  ;;  %2651 = vperm.xlu1 %6501, %v8382_v60   ;;  %3854 = vperm.xlu0 %6502, %v8391_v17   ;;  %v8427_v27 = vadd.f32 %v8132_v59, %v8021_v32 }
 0x39b   : > { %10912 = vst [vmem:[#allocation66_spill] sm:$0xff] %v8427_v27 }
 0x39c   : > { %v8418_v57 = vpop.permute.xlu1 %3779 }
 0x39d   : > { %2699 = vperm.xlu1 %6501, %v8391_v17   ;;  %6505 = vset.pattern.permute.xlu0 %v10883_v62  ;;  %v8422_v37 = vpop.permute.xlu0 %1468 }
 0x39e   : > { %10911 = vst [vmem:[#allocation65_spill] sm:$0xff] %v8422_v37  ;;  %2648 = vperm.xlu0 %6505, %v8416_v0  }
 0x3a0   : > { %v8429_v25 = vpop.permute.xlu1 %3827 }
 0x3a1   : > { %10913 = vst [vmem:[#allocation67_spill] sm:$0xff] %v8429_v25  ;;  %6503 = vset.pattern.permute.xlu1 %v10893_v23  ;;  %v8432_v54 = vpop.permute.xlu0 %1516 }
 0x3a2   : > { %10914 = vst [vmem:[#allocation68_spill] sm:$0xff] %v8432_v54  ;;  %4961 = vperm.xlu1 %6503, %v8382_v60   ;;  %2696 = vperm.xlu0 %6505, %v8427_v27  }
 0x3a5   : > { %v8436_v8 = vpop.permute.xlu1 %4982 }
 0x3a6   : > { %10915 = vst [vmem:[#allocation69_spill] sm:$0xff] %v8436_v8  ;;  %5009 = vperm.xlu1 %6503, %v8391_v17   ;;  %6507 = vset.pattern.permute.xlu0 %v10893_v23  ;;  %v8440_v62 = vpop.permute.xlu0 %3788 }
 0x3a7   : > { %10916 = vst [vmem:[#allocation70_spill] sm:$0xff] %v8440_v62  ;;  %4958 = vperm.xlu0 %6507, %v8416_v0  }
 0x3aa   : > { %v8443_v32 = vpop.permute.xlu1 %2633  ;;  %6504 = vset.pattern.permute.xlu1 %v10887_v51  ;;  %v8446_v59 = vpop.permute.xlu0 %3836 }
 0x3ab   : > { %10917 = vst [vmem:[#allocation71_spill] sm:$0xff] %v8443_v32  ;;  %10918 = vst [vmem:[#allocation72_spill] sm:$0xff] %v8446_v59  ;;  %1483 = vperm.xlu1 %6504, %v8416_v0   ;;  %5006 = vperm.xlu0 %6507, %v8427_v27  }
 0x3ae   : > { %v8450_v60 = vpop.permute.xlu1 %2681 }
 0x3af   : > { %10919 = vst [vmem:[#allocation73_spill] sm:$0xff] %v8450_v60  ;;  %1531 = vperm.xlu1 %6504, %v8427_v27   ;;  %v8453_v8 = vpop.permute.xlu0 %4991  ;;  %6508 = vset.pattern.permute.xlu0 %v10887_v51 }
 0x3b0   : > { %10920 = vst [vmem:[#allocation74_spill] sm:$0xff] %v8453_v8 }
 0x3b3   : > { %v8456_v23 = vpop.permute.xlu1 %4943  ;;  %6506 = vset.pattern.permute.xlu1 %v10890_v50 }
 0x3b4   : > { %10921 = vst [vmem:[#allocation75_spill] sm:$0xff] %v8456_v23  ;;  %3803 = vperm.xlu1 %6506, %v8416_v0   ;;  %v8460_v17 = vpop.permute.xlu0 %2630 }
 0x3b8   : > { %v8462_v15 = vpop.permute.xlu1 %1465  ;;  %3851 = vperm.xlu1 %6506, %v8427_v27   ;;  %v8465_v11 = vpop.permute.xlu0 %2678 }
 0x3bc   : > { %v8467_v59 = vpop.permute.xlu1 %1513  ;;  %6509 = vset.pattern.permute.xlu1 %v10887_v51 }
 0x3bd   : > { %v8470_v8 = vpop.permute.xlu0 %4940 }
 0x3be   : > { %10922 = vst [vmem:[#allocation76_spill] sm:$0xff] %v8470_v8 }
 0x3c1   : > { %v8472_v62 = vpop.permute.xlu1 %3785 }
 0x3c2   : > { %10923 = vst [vmem:[#allocation77_spill] sm:$0xff] %v8472_v62  ;;  %v8474_v23 = vpop.permute.xlu0 %1474 }
 0x3c3   : > { %10924 = vst [vmem:[#allocation78_spill] sm:$0xff] %v8474_v23 }
 0x3c5   : > { %v8476_v50 = vpop.permute.xlu1 %3833 }
 0x3c6   : > { %10925 = vst [vmem:[#allocation79_spill] sm:$0xff] %v8476_v50  ;;  %v8478_v0 = vpop.permute.xlu0 %1522 }
 0x3c7   : > { %10926 = vst [vmem:[#allocation80_spill] sm:$0xff] %v8478_v0 }
 0x3ca   : > { %v8480_v60 = vpop.permute.xlu1 %4988 }
 0x3cb   : > { %10927 = vst [vmem:[#allocation81_spill] sm:$0xff] %v8480_v60  ;;  %v8482_v54 = vpop.permute.xlu0 %3794 }
 0x3cc   : > { %10928 = vst [vmem:[#allocation82_spill] sm:$0xff] %v8482_v54 }
 0x3cf   : > { %v8484_v27 = vpop.permute.xlu1 %2639  ;;  %v8486_v32 = vpop.permute.xlu0 %3842 }
 0x3d0   : > { %10929 = vst [vmem:[#allocation83_spill] sm:$0xff] %v8484_v27  ;;  %10930 = vst [vmem:[#allocation84_spill] sm:$0xff] %v8486_v32 }
 0x3d3   : > { %v8488_v25 = vpop.permute.xlu1 %2687 }
 0x3d4   : > { %10931 = vst [vmem:[#allocation85_spill] sm:$0xff] %v8488_v25  ;;  %v8490_v51 = vpop.permute.xlu0 %4997 }
 0x3d5   : > { %10932 = vst [vmem:[#allocation86_spill] sm:$0xff] %v8490_v51 }
 0x3d8   : > { %v8492_v8 = vpop.permute.xlu1 %4949 }
 0x3d9   : > { %10933 = vst [vmem:[#allocation87_spill] sm:$0xff] %v8492_v8  ;;  %v8494_v62 = vpop.permute.xlu0 %2636 }
 0x3da   : > { %10934 = vst [vmem:[#allocation88_spill] sm:$0xff] %v8494_v62 }
 0x3dd   : > { %v8496_v23 = vpop.permute.xlu1 %1471  ;;  %v8498_v50 = vpop.permute.xlu0 %2684 }
 0x3de   : > { %10935 = vst [vmem:[#allocation89_spill] sm:$0xff] %v8496_v23  ;;  %10936 = vst [vmem:[#allocation90_spill] sm:$0xff] %v8498_v50 }
 0x3e1   : > { %v8500_v0 = vpop.permute.xlu1 %1519 }
 0x3e2   : > { %10937 = vst [vmem:[#allocation91_spill] sm:$0xff] %v8500_v0  ;;  %v8502_v60 = vpop.permute.xlu0 %4946 }
 0x3e3   : > { %10938 = vst [vmem:[#allocation92_spill] sm:$0xff] %v8502_v60 }
 0x3e6   : > { %v8504_v54 = vpop.permute.xlu1 %3791 }
 0x3e7   : > { %10939 = vst [vmem:[#allocation93_spill] sm:$0xff] %v8504_v54  ;;  %v8506_v27 = vpop.permute.xlu0 %1480 }
 0x3e8   : > { %10940 = vst [vmem:[#allocation94_spill] sm:$0xff] %v8506_v27  ;;  %v10949_v27 = vlaneseq }
 0x3ea   : > { %v8508_v32 = vpop.permute.xlu1 %3839 }
 0x3eb   : > { %10941 = vst [vmem:[#allocation95_spill] sm:$0xff] %v8508_v32  ;;  %v8510_v25 = vpop.permute.xlu0 %1528  ;;  %v1537_v32 = vand.u32 127, %v10949_v27 }
 0x3ec   : > { %10942 = vst [vmem:[#allocation96_spill] sm:$0xff] %v8510_v25 }
 0x3ef   : > { %v8512_v51 = vpop.permute.xlu1 %4994 }
 0x3f0   : > { %10943 = vst [vmem:[#allocation97_spill] sm:$0xff] %v8512_v51  ;;  %v8514_v8 = vpop.permute.xlu0 %3800  ;;  %v1542_v51 = vadd.s32 4294967288, %v1537_v32 }
 0x3f1   : > { %10944 = vst [vmem:[#allocation98_spill] sm:$0xff] %v8514_v8  ;;  %v8534_v8 = vsub.s32 %v1537_v32, %v7501_v7 }
 0x3f3   : > { %v2704_v27 = vrot.slane %v8174_v47, %v8534_v8  ;;  %v1552_v32 = vrot.slane %v8235_v21, %v8534_v8  ;;  %v1541_v47 = vrot.slane %v8191_v26, %v8534_v8  ;;  %v2776_v21 = vrot.slane %v8200_v14, %v8534_v8 }
 0x3f4   : > { %v8516_v62 = vpop.permute.xlu1 %2645  ;;  %v8518_v23 = vpop.permute.xlu0 %3848 }
 0x3f5   : > { %10945 = vst [vmem:[#allocation99_spill] sm:$0xff] %v8516_v62  ;;  %10946 = vst [vmem:[#allocation100_spill] sm:$0xff] %v8518_v23 }
 0x3f8   : > { %v8520_v50 = vpop.permute.xlu1 %2693 }
 0x3f9   : > { %10947 = vst [vmem:[#allocation101_spill] sm:$0xff] %v8520_v50  ;;  %v8522_v0 = vpop.permute.xlu0 %2642  ;;  %v8541_v50 = vsub.s32 %v1542_v51, %v7501_v7 }
 0x3fb   : > { %v1546_v7 = vrot.slane %v8134_v38, %v8541_v50  ;;  %v1619_v51 = vrot.slane %v8146_v63, %v8541_v50  ;;  %v3859_v38 = vrot.slane %v8207_v29, %v8534_v8  ;;  %v1556_v63 = vrot.slane %v8223_v53, %v8541_v50 }
 0x3fc   : > { %v3863_v26 = vrot.slane %v8155_v18, %v8541_v50  ;;  %v2713_v53 = vrot.slane %v8257_v39, %v8534_v8  ;;  %v1628_v18 = vrot.slane %v8230_v58, %v8541_v50  ;;  %v2717_v39 = vrot.slane %v8205_v10, %v8541_v50 }
 0x3fd   : > { %v8524_v60 = vpop.permute.xlu1 %4955  ;;  %v8526_v54 = vpop.permute.xlu0 %2690  ;;  %v1557_v29 = vsel %vm1547_vm1, %v1556_v63, %v1552_v32  ;;  %v2789_v58 = vrot.slane %v8217_v61, %v8541_v50  ;;  %v2722_v10 = vrot.slane %v8327_v34, %v8534_v8  ;;  %v2794_v61 = vrot.slane %v8333_v9, %v8534_v8 }
 0x3fe   : > { %10948 = vst [vmem:[#allocation102_spill] sm:$0xff] %v8524_v60  ;;  %v1615_v60 = vrot.slane %v8162_v6, %v8534_v8  ;;  %v2708_v6 = vrot.slane %v8157_v31, %v8541_v50  ;;  %v2780_v31 = vrot.slane %v8143_v36, %v8541_v50  ;;  %v1548_v36 = vsel %vm1547_vm1, %v1546_v7, %v1541_v47 }
 0x3ff   : > { %v3864_v7 = vsel %vm1547_vm1, %v3863_v26, %v3859_v38  ;;  %v2718_v47 = vsel %vm1547_vm1, %v2717_v39, %v2713_v53  ;;  %v3940_v38 = vrot.slane %v8272_v2, %v8534_v8  ;;  %v1565_v34 = vrot.slane %v8274_v35, %v8541_v50 }
 0x400   : > { %v2781_v32 = vsel %vm1547_vm1, %v2780_v31, %v2776_v21  ;;  %v2798_v9 = vrot.slane %v8309_v33, %v8541_v50  ;;  %v3877_v31 = vrot.slane %v8346_v42, %v8534_v8  ;;  %v3881_v35 = vrot.slane %v8297_v20, %v8541_v50 }
 0x401   : > { %v8529_v37 = vpop.permute.xlu1 %5003  ;;  %v2731_v42 = vrot.slane %v8396_v49, %v8534_v8  ;;  %v2735_v49 = vrot.slane %v8371_v44, %v8541_v50  ;;  %v1642_v44 = vrot.slane %v8407_v43, %v8534_v8  ;;  %v2807_v43 = vrot.slane %v8378_v40, %v8541_v50 }
 0x402   : > { %10950 = vst [vmem:[#allocation103_spill] sm:$0xff] %v8529_v37  ;;  %v8531_v25 = vpop.permute.xlu0 %4952  ;;  %v3931_v37 = vrot.slane %v8185_v41, %v8534_v8  ;;  %v3935_v41 = vrot.slane %v8164_v45, %v8541_v50  ;;  %v1624_v45 = vrot.slane %v8247_v1, %v8534_v8  ;;  %v2785_v1 = vrot.slane %v8267_v13, %v8534_v8 }
 0x403   : > { %10951 = vst [vmem:[#allocation104_spill] sm:$0xff] %v8531_v25  ;;  %v2799_v33 = vsel %vm1547_vm1, %v2798_v9, %v2794_v61  ;;  %v2812_v40 = vrot.slane %v8465_v11, %v8534_v8  ;;  %v10959_v11 = vld [vmem:[#allocation68_spill] sm:$0xff] }
 0x404   : > { %v8580_v14 = vsel %vm1547_vm1, %v3935_v41, %v3931_v37  ;;  %v1629_v13 = vsel %vm1547_vm1, %v1628_v18, %v1624_v45  ;;  %v1561_v41 = vrot.slane %v8331_v19, %v8534_v8  ;;  %v2726_v19 = vrot.slane %v8302_v16, %v8541_v50 }
 0x405   : > { %v1637_v45 = vrot.slane %v8281_v4, %v8541_v50  ;;  %v3949_v4 = vrot.slane %v8357_v46, %v8534_v8  ;;  %v3882_v18 = vsel %vm1547_vm1, %v3881_v35, %v3877_v31  ;;  %v1570_v46 = vrot.slane %v8400_v30, %v8534_v8 }
 0x406   : > { %v8536_v62 = vpop.permute.xlu1 %1477  ;;  %v8538_v23 = vpop.permute.xlu0 %5000  ;;  %v2727_v16 = vsel %vm1547_vm1, %v2726_v19, %v2722_v10  ;;  %v3886_v10 = vrot.slane %v8418_v57, %v8534_v8  ;;  %v1651_v57 = vrot.slane %v8467_v59, %v8534_v8  ;;  %v10960_v59 = vld [vmem:[#allocation73_spill] sm:$0xff] }
 0x407   : > { %10952 = vst [vmem:[#allocation105_spill] sm:$0xff] %v8538_v23 }
 0x40a   : > { %v8551_v25 = vpop.permute.xlu1 %1525 }
 0x40b   : > { %10953 = vst [vmem:[#allocation106_spill] sm:$0xff] %v8551_v25  ;;  %v8561_v23 = vpop.permute.xlu0 %1486  ;;  %v2709_v25 = vsel %vm1547_vm1, %v2708_v6, %v2704_v27  ;;  %v3944_v6 = vrot.slane %v8249_v48, %v8541_v50  ;;  %v1633_v48 = vrot.slane %v8339_v28, %v8534_v8 }
 0x40c   : > { %10954 = vst [vmem:[#allocation107_spill] sm:$0xff] %v8561_v23  ;;  %v1620_v23 = vsel %vm1547_vm1, %v1619_v51, %v1615_v60  ;;  %v3868_v60 = vrot.slane %v8265_v55, %v8534_v8  ;;  %v1685_v51 = vsel %vm1684_vm2, %v1557_v29, %v1548_v36  ;;  %v3872_v55 = vrot.slane %v8237_v5, %v8541_v50 }
 0x40d   : > { %v2790_v5 = vsel %vm1547_vm1, %v2789_v58, %v2785_v1  ;;  %v1698_v2 = vsel %vm1684_vm2, %v1629_v13, %v1620_v23  ;;  %v2845_v28 = vsel %vm1684_vm2, %v2718_v47, %v2709_v25  ;;  %v1566_v29 = vsel %vm1547_vm1, %v1565_v34, %v1561_v41 }
 0x40e   : > { %v3873_v21 = vsel %vm1547_vm1, %v3872_v55, %v3868_v60  ;;  %v2852_v23 = vsel %vm1684_vm2, %v2790_v5, %v2781_v32  ;;  %v1638_v25 = vsel %vm1547_vm1, %v1637_v45, %v1633_v48  ;;  %v8650_v20 = vsel %vm1547_vm1, %v3944_v6, %v3940_v38  ;;  %v10955_v5 = vld [vmem:[#allocation65_spill] sm:$0xff]  ;;  %v10956_v48 = vld [vmem:[#allocation67_spill] sm:$0xff] }
 0x40f   : > { %v8592_v27 = vpop.permute.xlu1 %3797  ;;  %v8594_v37 = vpop.permute.xlu0 %1534  ;;  %v4000_v53 = vsel %vm1684_vm2, %v3873_v21, %v3864_v7  ;;  %v3953_v36 = vrot.slane %v8304_v12, %v8541_v50  ;;  %v2846_v1 = vsel %vm1686_vm3, %v2727_v16, %v2845_v28  ;;  %v1687_v32 = vsel %vm1686_vm3, %v1566_v29, %v1685_v51  ;;  %v10961_v29 = vld [vmem:[#allocation70_spill] sm:$0xff] }
 0x410   : > { %v2853_v39 = vsel %vm1686_vm3, %v2799_v33, %v2852_v23  ;;  %v1699_v7 = vsel %vm1686_vm3, %v1638_v25, %v1698_v2  ;;  %v2736_v12 = vsel %vm1547_vm1, %v2735_v49, %v2731_v42  ;;  %v2803_v58 = vrot.slane %v8402_v3, %v8534_v8 }
 0x411   : > { %v4001_v51 = vsel %vm1686_vm3, %v3882_v18, %v4000_v53  ;;  %v1574_v13 = vrot.slane %v8352_v52, %v8541_v50  ;;  %v8676_v30 = vsel %vm1547_vm1, %v3953_v36, %v3949_v4  ;;  %v1646_v6 = vrot.slane %v8359_v22, %v8541_v50  ;;  %v10963_v18 = vld [vmem:[#allocation89_spill] sm:$0xff] }
 0x412   : > { %v3890_v47 = vrot.slane %v8366_v24, %v8541_v50  ;;  %v3962_v3 = vrot.slane %v8373_v56, %v8541_v50  ;;  %v2847_v52 = vsel %vm1688_vm4, %v2736_v12, %v2846_v1  ;;  %v2740_v22 = vrot.slane %v8460_v17, %v8534_v8  ;;  %v10957_v17 = vld [vmem:[#allocation71_spill] sm:$0xff] }
 0x413   : > { %v8621_v63 = vpop.permute.xlu1 %3845  ;;  %v1575_v61 = vsel %vm1547_vm1, %v1574_v13, %v1570_v46  ;;  %v1579_v24 = vrot.slane %v8462_v15, %v8534_v8  ;;  %v2808_v56 = vsel %vm1547_vm1, %v2807_v43, %v2803_v58  ;;  %v1647_v21 = vsel %vm1547_vm1, %v1646_v6, %v1642_v44  ;;  %v10958_v15 = vld [vmem:[#allocation77_spill] sm:$0xff]  ;;  %v10964_v46 = vld [vmem:[#allocation90_spill] sm:$0xff]  ;;  %v10965_v58 = vld [vmem:[#allocation72_spill] sm:$0xff] }
 0x414   : > { %v8631_v26 = vpop.permute.xlu0 %3806  ;;  %v1583_v38 = vrot.slane %v10955_v5, %v8541_v50  ;;  %v3958_v34 = vrot.slane %v10956_v48, %v8534_v8  ;;  %v2744_v19 = vrot.slane %v10957_v17, %v8541_v50  ;;  %v3895_v9 = vrot.slane %v10958_v15, %v8534_v8  ;;  %v10966_v6 = vld [vmem:[#allocation78_spill] sm:$0xff]  ;;  %v10967_v43 = vld [vmem:[#allocation85_spill] sm:$0xff] }
 0x415   : > { %v1689_v31 = vsel %vm1688_vm4, %v1575_v61, %v1687_v32  ;;  %v3891_v2 = vsel %vm1547_vm1, %v3890_v47, %v3886_v10  ;;  %v1655_v28 = vrot.slane %v10959_v11, %v8541_v50  ;;  %v2816_v45 = vrot.slane %v10960_v59, %v8541_v50  ;;  %v10968_v61 = vld [vmem:[#allocation88_spill] sm:$0xff] }
 0x416   : > { %v2854_v16 = vsel %vm1688_vm4, %v2808_v56, %v2853_v39  ;;  %v3899_v33 = vrot.slane %v10961_v29, %v8541_v50  ;;  %v2745_v42 = vsel %vm1547_vm1, %v2744_v19, %v2740_v22  ;;  %v1584_v53 = vsel %vm1547_vm1, %v1583_v38, %v1579_v24  ;;  %v10970_v56 = vld [vmem:[#allocation79_spill] sm:$0xff]  ;;  %v10971_v38 = vld [vmem:[#allocation80_spill] sm:$0xff] }
 0x417   : > { %v1700_v25 = vsel %vm1688_vm4, %v1647_v21, %v1699_v7  ;;  %v2817_v4 = vsel %vm1547_vm1, %v2816_v45, %v2812_v40  ;;  %v1656_v36 = vsel %vm1547_vm1, %v1655_v28, %v1651_v57  ;;  %v1588_v49 = vrot.slane %v10963_v18, %v8534_v8 }
 0x418   : > { %v8657_v60 = vpop.permute.xlu1 %2651  ;;  %v8670_v55 = vpop.permute.xlu0 %3854  ;;  %v4002_v1 = vsel %vm1688_vm4, %v3891_v2, %v4001_v51  ;;  %v8732_v32 = vsel %vm1547_vm1, %v3962_v3, %v3958_v34  ;;  %v3900_v39 = vsel %vm1547_vm1, %v3899_v33, %v3895_v9  ;;  %v2821_v12 = vrot.slane %v10964_v46, %v8534_v8  ;;  %v10972_v34 = vld [vmem:[#allocation83_spill] sm:$0xff]  ;;  %v10973_v9 = vld [vmem:[#allocation82_spill] sm:$0xff] }
 0x419   : > { %v3971_v7 = vrot.slane %v10965_v58, %v8541_v50  ;;  %v2848_v44 = vsel %vm1690_vm5, %v2745_v42, %v2847_v52  ;;  %v1691_v13 = vsel %vm1690_vm5, %v1584_v53, %v1689_v31  ;;  %v1592_v47 = vrot.slane %v10966_v6, %v8541_v50  ;;  %v10974_v2 = vld [vmem:[#allocation91_spill] sm:$0xff]  ;;  %v10980_v6 = vld [vmem:[#allocation93_spill] sm:$0xff] }
 0x41a   : > { %v2855_v51 = vsel %vm1690_vm5, %v2817_v4, %v2854_v16  ;;  %v1701_v3 = vsel %vm1690_vm5, %v1656_v36, %v1700_v25  ;;  %v2825_v10 = vrot.slane %v10967_v43, %v8541_v50  ;;  %v2749_v22 = vrot.slane %v10968_v61, %v8534_v8  ;;  %v10976_v16 = vld [vmem:[#allocation101_spill] sm:$0xff]  ;;  %v10977_v42 = vld [vmem:[#allocation99_spill] sm:$0xff]  ;;  %v10978_v4 = vld [vmem:[#allocation106_spill] sm:$0xff] }
 0x41b   : > { %v8752_v52 = vsel %vm1690_vm5, %v3900_v39, %v4002_v1  ;;  %v3967_v21 = vrot.slane %v10970_v56, %v8534_v8  ;;  %v1593_v40 = vsel %vm1547_vm1, %v1592_v47, %v1588_v49  ;;  %v1597_v57 = vrot.slane %v8536_v62, %v8534_v8  ;;  %v10975_v62 = vld [vmem:[#allocation94_spill] sm:$0xff]  ;;  %v10979_v1 = vld [vmem:[#allocation107_spill] sm:$0xff]  ;;  %v10981_v43 = vld [vmem:[#allocation96_spill] sm:$0xff] }
 0x41c   : > { %v8688_v41 = vpop.permute.xlu1 %2699  ;;  %v1664_v48 = vrot.slane %v10971_v38, %v8541_v50  ;;  %v2753_v17 = vrot.slane %v10972_v34, %v8541_v50  ;;  %v2826_v19 = vsel %vm1547_vm1, %v2825_v10, %v2821_v12  ;;  %v2830_v15 = vrot.slane %v8526_v54, %v8534_v8 }
 0x41d   : > { %v8716_v35 = vpop.permute.xlu0 %2648  ;;  %v3908_v31 = vrot.slane %v10973_v9, %v8541_v50  ;;  %v1660_v11 = vrot.slane %v10974_v2, %v8534_v8  ;;  %v1601_v28 = vrot.slane %v10975_v62, %v8541_v50  ;;  %v2758_v59 = vrot.slane %v8522_v0, %v8534_v8  ;;  %v10982_v9 = vld [vmem:[#allocation84_spill] sm:$0xff] }
 0x41e   : > { %v2754_v45 = vsel %vm1547_vm1, %v2753_v17, %v2749_v22  ;;  %v2834_v29 = vrot.slane %v10976_v16, %v8541_v50  ;;  %v1693_v54 = vsel %vm1692_vm6, %v1593_v40, %v1691_v13  ;;  %v2762_v53 = vrot.slane %v10977_v42, %v8541_v50 }
 0x41f   : > { %v1602_v25 = vsel %vm1547_vm1, %v1601_v28, %v1597_v57  ;;  %v1669_v36 = vrot.slane %v10978_v4, %v8534_v8  ;;  %v2856_v0 = vsel %vm1692_vm6, %v2826_v19, %v2855_v51  ;;  %v1610_v39 = vrot.slane %v10979_v1, %v8541_v50  ;;  %v10983_v28 = vld [vmem:[#allocation98_spill] sm:$0xff] }
 0x420   : > { %v2835_v49 = vsel %vm1547_vm1, %v2834_v29, %v2830_v15  ;;  %v2843_v46 = vrot.slane %v8688_v41, %v8541_v50  ;;  %v1665_v13 = vsel %vm1547_vm1, %v1664_v48, %v1660_v11  ;;  %v3904_v47 = vrot.slane %v10980_v6, %v8534_v8 }
 0x421   : > { %v8723_v23 = vpop.permute.xlu1 %4961  ;;  %v2697_v5 = vpop.permute.xlu0 %2696  ;;  %v1673_v10 = vrot.slane %v10981_v43, %v8541_v50  ;;  %v2763_v51 = vsel %vm1547_vm1, %v2762_v53, %v2758_v59  ;;  %v2767_v61 = vrot.slane %v8716_v35, %v8534_v8  ;;  %v1695_v40 = vsel %vm1694_vm7, %v1602_v25, %v1693_v54 }
 0x422   : > { %10962 = vst [vmem:[#allocation65_spill] sm:$0xff] %v8723_v23  ;;  %v2839_v33 = vrot.slane %v2697_v5, %v8534_v8  ;;  %v3913_v5 = vrot.slane %v8592_v27, %v8534_v8  ;;  %v2857_v34 = vsel %vm1694_vm7, %v2835_v49, %v2856_v0  ;;  %v1682_v17 = vrot.slane %v8594_v37, %v8541_v50  ;;  %v11032_v23 = vld [vmem:[#allocation43_spill] sm:$0xff] }
 0x423   : > { %v1674_v57 = vsel %vm1547_vm1, %v1673_v10, %v1669_v36  ;;  %v2771_v35 = vrot.slane %v8657_v60, %v8541_v50  ;;  %v3980_v2 = vrot.slane %v10982_v9, %v8541_v50  ;;  %v1702_v27 = vsel %vm1692_vm6, %v1665_v13, %v1701_v3 }
 0x424   : > { %v2844_v41 = vsel %vm1547_vm1, %v2843_v46, %v2839_v33  ;;  %v2849_v62 = vsel %vm1692_vm6, %v2754_v45, %v2848_v44  ;;  %v3917_v37 = vrot.slane %v10983_v28, %v8541_v50  ;;  %v1703_v60 = vsel %vm1694_vm7, %v1674_v57, %v1702_v27  ;;  %v10984_v33 = vld [vmem:[#allocation95_spill] sm:$0xff]  ;;  %v10988_v57 = vld [vmem:[#allocation22_spill] sm:$0xff]  ;;  %v10994_v28 = vld [vmem:[#allocation28_spill] sm:$0xff] }
 0x425   : > { %v8749_v24 = vpop.permute.xlu1 %5009  ;;  %v2858_v11 = vsel %vm1696_vm8, %v2844_v41, %v2857_v34  ;;  %v2772_v16 = vsel %vm1547_vm1, %v2771_v35, %v2767_v61  ;;  %v3909_v29 = vsel %vm1547_vm1, %v3908_v31, %v3904_v47  ;;  %v3976_v54 = vrot.slane %v10984_v33, %v8534_v8  ;;  %v10990_v34 = vld [vmem:[#allocation13_spill] sm:$0xff]  ;;  %v10991_v35 = vld [vmem:[#allocation24_spill] sm:$0xff]  ;;  %v10996_v33 = vld [vmem:[#allocation15_spill] sm:$0xff] }
 0x426   : > { %10969 = vst [vmem:[#allocation67_spill] sm:$0xff] %v8749_v24  ;;  %v2850_v42 = vsel %vm1694_vm7, %v2763_v51, %v2849_v62  ;;  %v3918_v44 = vsel %vm1547_vm1, %v3917_v37, %v3913_v5  ;;  %v3985_v45 = vrot.slane %v8621_v63, %v8534_v8  ;;  %v2864_v4 = vsel %vm345_vm0, %v2858_v11, -inf  ;;  %v10993_v11 = vld [vmem:[#allocation14_spill] sm:$0xff] }
 0x427   : > { %v3926_v31 = vrot.slane %v8631_v26, %v8541_v50  ;;  %v4007_v0 = vsel %vm1684_vm2, %v8650_v20, %v8580_v14  ;;  %v3972_v63 = vsel %vm1547_vm1, %v3971_v7, %v3967_v21  ;;  %v10985_v26 = vld [vmem:[#allocation100_spill] sm:$0xff]  ;;  %v4004_v1 = vsel %vm1692_vm6, %v3909_v29, %v8752_v52 }
 0x428   : > { %v3989_v49 = vrot.slane %v10985_v26, %v8541_v50  ;;  %v3981_v46 = vsel %vm1547_vm1, %v3980_v2, %v3976_v54  ;;  %v4005_v20 = vsel %vm1694_vm7, %v3918_v44, %v4004_v1  ;;  %v11002_v26 = vld [vmem:[#allocation42_spill] sm:$0xff] }
 0x42a   : > { %v1484_v18 = vpop.permute.xlu1 %1483  ;;  %v3990_v7 = vsel %vm1547_vm1, %v3989_v49, %v3985_v45  ;;  %v10998_v45 = vld [vmem:[#allocation34_spill] sm:$0xff] }
 0x42b   : > { %v1606_v12 = vrot.slane %v1484_v18, %v8534_v8  ;;  %v2851_v18 = vsel %vm1696_vm8, %v2772_v16, %v2850_v42 }
 0x42c   : > { %v2861_v21 = vsel %vm345_vm0, %v2851_v18, -inf  ;;  %v11001_v18 = vld [vmem:[#allocation36_spill] sm:$0xff] }
 0x42d   : > { %v1611_v22 = vsel %vm1547_vm1, %v1610_v39, %v1606_v12  ;;  %v4008_v39 = vsel %vm1686_vm3, %v8676_v30, %v4007_v0  ;;  %v3998_v30 = vrot.slane %v8670_v55, %v8541_v50 }
 0x42e   : > { %v1532_v38 = vpop.permute.xlu1 %1531  ;;  %v1697_v48 = vsel %vm1696_vm8, %v1611_v22, %v1695_v40  ;;  %v4009_v58 = vsel %vm1688_vm4, %v8732_v32, %v4008_v39  ;;  %v10986_v22 = vld [vmem:[#allocation11_spill] sm:$0xff]  ;;  %v10987_v40 = vld [vmem:[#allocation12_spill] sm:$0xff] }
 0x42f   : > { %v1678_v19 = vrot.slane %v1532_v38, %v8534_v8  ;;  %v1707_v15 = vsel %vm345_vm0, %v1697_v48, -inf  ;;  %v4010_v52 = vsel %vm1690_vm5, %v3972_v63, %v4009_v58  ;;  %v10989_v38 = vld [vmem:[#allocation19_spill] sm:$0xff]  ;;  %v11004_v58 = vld [vmem:[#allocation45_spill] sm:$0xff] }
 0x430   : > { %1708 = vmax.xlane.f32.xlu1 %v1707_v15  ;;  %v4011_v32 = vsel %vm1692_vm6, %v3981_v46, %v4010_v52  ;;  %v10992_v15 = vld [vmem:[#allocation26_spill] sm:$0xff] }
 0x431   : > { %v1683_v59 = vsel %vm1547_vm1, %v1682_v17, %v1678_v19  ;;  %v4012_v43 = vsel %vm1694_vm7, %v3990_v7, %v4011_v32  ;;  %v11007_v32 = vld [vmem:[#allocation18_spill] sm:$0xff] }
 0x432   : > { %v1704_v3 = vsel %vm1696_vm8, %v1683_v59, %v1703_v60  ;;  %v10995_v60 = vld [vmem:[#allocation30_spill] sm:$0xff] }
 0x433   : > { %v3804_v53 = vpop.permute.xlu1 %3803  ;;  %v1710_v25 = vsel %vm345_vm0, %v1704_v3, -inf  ;;  %v10997_v3 = vld [vmem:[#allocation32_spill] sm:$0xff] }
 0x434   : > { %v3922_v36 = vrot.slane %v3804_v53, %v8534_v8  ;;  %1711 = vmax.xlane.f32.xlu0 %v1710_v25  ;;  %2865 = vmax.xlane.f32.xlu1 %v2864_v4  ;;  %v8884_v4 = vpop.permute.xlu0 %4958 }
 0x435   : > { %10999 = vst [vmem:[#allocation71_spill] sm:$0xff] %v8884_v4 }
 0x436   : > { %v3927_v14 = vsel %vm1547_vm1, %v3926_v31, %v3922_v36  ;;  %v11000_v31 = vld [vmem:[#allocation16_spill] sm:$0xff] }
 0x437   : > { %v3852_v56 = vpop.permute.xlu1 %3851  ;;  %v4006_v12 = vsel %vm1696_vm8, %v3927_v14, %v4005_v20  ;;  %v11003_v14 = vld [vmem:[#allocation17_spill] sm:$0xff] }
 0x438   : > { %v3994_v13 = vrot.slane %v3852_v56, %v8534_v8  ;;  %2862 = vmax.xlane.f32.xlu0 %v2861_v21  ;;  %v4016_v6 = vsel %vm345_vm0, %v4006_v12, -inf  ;;  %v8897_v21 = vpop.permute.xlu0 %5006  ;;  %v11006_v12 = vld [vmem:[#allocation49_spill] sm:$0xff] }
 0x439   : > { %4017 = vmax.xlane.f32.xlu1 %v4016_v6  ;;  %11005 = vst [vmem:[#allocation77_spill] sm:$0xff] %v8897_v21 }
 0x43a   : > { %v3999_v47 = vsel %vm1547_vm1, %v3998_v30, %v3994_v13 }
 0x43b   : > { %v4013_v10 = vsel %vm1696_vm8, %v3999_v47, %v4012_v43  ;;  %v11008_v43 = vld [vmem:[#allocation53_spill] sm:$0xff] }
 0x43c   : > { %v4019_v51 = vsel %vm345_vm0, %v4013_v10, -inf }
 0x43d   : > { %4020 = vmax.xlane.f32.xlu0 %v4019_v51 }
 0x4bd   : > { %v1709_v61 = vpop.xlane.xlu1 %1708 }
 0x4be   : > { %v1718_v55 = vrot.slane %v1709_v61, %v10986_v22  ;;  %v1722_v41 = vrot.slane %v1709_v61, %v10987_v40  ;;  %v1726_v17 = vrot.slane %v1709_v61, %v10990_v34  ;;  %v1730_v62 = vrot.slane %v1709_v61, %v10993_v11 }
 0x4bf   : > { %v1734_v54 = vrot.slane %v1709_v61, %v10996_v33  ;;  %v1738_v36 = vrot.slane %v1709_v61, %v11000_v31  ;;  %v1742_v20 = vrot.slane %v1709_v61, %v11003_v14  ;;  %v1746_v47 = vrot.slane %v1709_v61, %v11007_v32 }
 0x4c0   : > { %v1795_v5 = vsub.f32 %v10988_v57, %v1718_v55  ;;  %v1796_v48 = vsub.f32 %v10989_v38, %v1718_v55  ;;  %v1798_v19 = vsub.f32 %v10991_v35, %v1722_v41  ;;  %v1797_v9 = vsub.f32 %v10992_v15, %v1722_v41  ;;  %v11009_v55 = vld [vmem:[#allocation57_spill] sm:$0xff] }
 0x4c1   : > { %v1800_v37 = vsub.f32 %v10994_v28, %v1726_v17  ;;  %v1799_v16 = vsub.f32 %v10995_v60, %v1726_v17  ;;  %v1802_v42 = vsub.f32 %v10997_v3, %v1730_v62  ;;  %v1801_v53 = vsub.f32 %v10998_v45, %v1730_v62  ;;  %v11013_v62 = vld [vmem:[#allocation64_spill] sm:$0xff] }
 0x4c2   : > { %v1827_v2 = vmul.f32 1.442695, %v1795_v5  ;;  %v1829_v27 = vmul.f32 1.442695, %v1796_v48  ;;  %v1833_v59 = vmul.f32 1.442695, %v1798_v19  ;;  %v1804_v0 = vsub.f32 %v11001_v18, %v1734_v54  ;;  %v8909_v48 = vpop.xlane.xlu0 %1711 }
 0x4c3   : > { %v1831_v29 = vmul.f32 1.442695, %v1797_v9  ;;  %v1837_v44 = vmul.f32 1.442695, %v1800_v37  ;;  %v1835_v25 = vmul.f32 1.442695, %v1799_v16  ;;  %v1803_v49 = vsub.f32 %v11002_v26, %v1734_v54 }
 0x4c4   : > { %6586 = vpow2.f32 %v1827_v2  ;;  %v1841_v63 = vmul.f32 1.442695, %v1802_v42  ;;  %v1839_v1 = vmul.f32 1.442695, %v1801_v53  ;;  %v1806_v7 = vsub.f32 %v11004_v58, %v1738_v36  ;;  %v11012_v9 = vld [vmem:[#allocation59_spill] sm:$0xff] }
 0x4c5   : > { %6588 = vpow2.f32 %v1829_v27  ;;  %v1845_v56 = vmul.f32 1.442695, %v1804_v0  ;;  %v1805_v52 = vsub.f32 %v11006_v12, %v1738_v36  ;;  %v1843_v30 = vmul.f32 1.442695, %v1803_v49  ;;  %v11017_v36 = vld [vmem:[#allocation20_spill] sm:$0xff] }
 0x4c6   : > { %6590 = vpow2.f32 %v1833_v59  ;;  %v1808_v10 = vsub.f32 %v11008_v43, %v1742_v20  ;;  %v1849_v51 = vmul.f32 1.442695, %v1806_v7  ;;  %v1807_v41 = vsub.f32 %v11009_v55, %v1742_v20  ;;  %v11020_v20 = vld [vmem:[#allocation27_spill] sm:$0xff] }
 0x4c7   : > { %6592 = vpow2.f32 %v1831_v29  ;;  %v1847_v5 = vmul.f32 1.442695, %v1805_v52  ;;  %v1810_v61 = vsub.f32 %v11012_v9, %v1746_v47  ;;  %v1750_v27 = vrot.slane %v8909_v48, %v10986_v22  ;;  %v11021_v52 = vld [vmem:[#allocation25_spill] sm:$0xff] }
 0x4c8   : > { %6594 = vpow2.f32 %v1837_v44  ;;  %v1853_v2 = vmul.f32 1.442695, %v1808_v10  ;;  %v1809_v37 = vsub.f32 %v11013_v62, %v1746_v47  ;;  %v1851_v59 = vmul.f32 1.442695, %v1807_v41  ;;  %v11016_v44 = vld [vmem:[#allocation21_spill] sm:$0xff] }
 0x4c9   : > { %6596 = vpow2.f32 %v1835_v25  ;;  %v1857_v54 = vmul.f32 1.442695, %v1810_v61  ;;  %v1754_v42 = vrot.slane %v8909_v48, %v10987_v40  ;;  %v1811_v53 = vsub.f32 %v11016_v44, %v1750_v27 }
 0x4ca   : > { %6598 = vpow2.f32 %v1841_v63  ;;  %v1855_v25 = vmul.f32 1.442695, %v1809_v37  ;;  %v1812_v0 = vsub.f32 %v11017_v36, %v1750_v27  ;;  %v1762_v41 = vrot.slane %v8909_v48, %v10993_v11  ;;  %v11025_v27 = vld [vmem:[#allocation29_spill] sm:$0xff] }
 0x4cb   : > { %6600 = vpow2.f32 %v1839_v1  ;;  %v1758_v1 = vrot.slane %v8909_v48, %v10990_v34  ;;  %v1813_v7 = vsub.f32 %v11020_v20, %v1754_v42  ;;  %v1770_v21 = vrot.slane %v8909_v48, %v11000_v31 }
 0x4cc   : > { %6602 = vpow2.f32 %v1845_v56  ;;  %v1859_v56 = vmul.f32 1.442695, %v1811_v53  ;;  %v1861_v47 = vmul.f32 1.442695, %v1812_v0  ;;  %v1766_v53 = vrot.slane %v8909_v48, %v10996_v33 }
 0x4cd   : > { %6604 = vpow2.f32 %v1843_v30  ;;  %v1814_v30 = vsub.f32 %v11021_v52, %v1754_v42  ;;  %v1816_v37 = vsub.f32 %v11025_v27, %v1758_v1 }
 0x4ce   : > { %v8889_v39 = vpop.eup %6586  ;;  %6606 = vpow2.f32 %v1849_v51  ;;  %v1819_v4 = vsub.f32 %v11032_v23, %v1766_v53 }
 0x4cf   : > { %v8891_v46 = vpop.eup %6588  ;;  %1924 = vperm.xlu0 %6508, %v8889_v39   ;;  %6608 = vpow2.f32 %v1847_v5  ;;  %v11024_v5 = vld [vmem:[#allocation31_spill] sm:$0xff] }
 0x4d0   : > { %1927 = vperm.xlu1 %6509, %v8891_v46   ;;  %v8900_v13 = vpop.eup %6590  ;;  %6610 = vpow2.f32 %v1853_v2  ;;  %v1815_v61 = vsub.f32 %v11024_v5, %v1758_v1  ;;  %v1863_v2 = vmul.f32 1.442695, %v1813_v7  ;;  %v11029_v7 = vld [vmem:[#allocation33_spill] sm:$0xff]  ;;  %v1869_v1 = vmul.f32 1.442695, %v1816_v37 }
 0x4d1   : > { %v8902_v6 = vpop.eup %6592  ;;  %6612 = vpow2.f32 %v1851_v59  ;;  %v1865_v59 = vmul.f32 1.442695, %v1814_v30  ;;  %v1818_v24 = vsub.f32 %v11029_v7, %v1762_v41 }
 0x4d2   : > { %v8911_v17 = vpop.eup %6594  ;;  %6614 = vpow2.f32 %v1857_v54 }
 0x4d3   : > { %1933 = vperm.xlu0 %6508, %v8900_v13   ;;  %11010 = vst [vmem:[#allocation68_spill] sm:$0xff] %v8911_v17  ;;  %v8913_v19 = vpop.eup %6596  ;;  %6616 = vpow2.f32 %v1855_v25  ;;  %v11028_v25 = vld [vmem:[#allocation35_spill] sm:$0xff] }
 0x4d4   : > { %1930 = vperm.xlu1 %6509, %v8902_v6   ;;  %11011 = vst [vmem:[#allocation73_spill] sm:$0xff] %v8913_v19  ;;  %v8921_v16 = vpop.eup %6598  ;;  %6618 = vpow2.f32 %v1859_v56  ;;  %v1817_v0 = vsub.f32 %v11028_v25, %v1762_v41  ;;  %v1867_v56 = vmul.f32 1.442695, %v1815_v61  ;;  %v11033_v61 = vld [vmem:[#allocation38_spill] sm:$0xff]  ;;  %v1873_v41 = vmul.f32 1.442695, %v1818_v24 }
 0x4d5   : > { %11014 = vst [vmem:[#allocation70_spill] sm:$0xff] %v8921_v16  ;;  %v8923_v29 = vpop.eup %6600  ;;  %6620 = vpow2.f32 %v1861_v47 }
 0x4d6   : > { %11015 = vst [vmem:[#allocation89_spill] sm:$0xff] %v8923_v29  ;;  %v8931_v63 = vpop.eup %6602  ;;  %6622 = vpow2.f32 %v1863_v2  ;;  %v1871_v2 = vmul.f32 1.442695, %v1817_v0  ;;  %v11037_v0 = vld [vmem:[#allocation46_spill] sm:$0xff] }
 0x4d7   : > { %1939 = vperm.xlu0 %6508, %v8911_v17   ;;  %11018 = vst [vmem:[#allocation90_spill] sm:$0xff] %v8931_v63  ;;  %v8933_v49 = vpop.eup %6604  ;;  %6624 = vpow2.f32 %v1865_v59 }
 0x4d8   : > { %1936 = vperm.xlu1 %6509, %v8913_v19   ;;  %11019 = vst [vmem:[#allocation72_spill] sm:$0xff] %v8933_v49  ;;  %v8941_v10 = vpop.eup %6606  ;;  %6626 = vpow2.f32 %v1867_v56  ;;  %v1822_v56 = vsub.f32 %v11037_v0, %v1770_v21 }
 0x4d9   : > { %11022 = vst [vmem:[#allocation78_spill] sm:$0xff] %v8941_v10  ;;  %v8943_v51 = vpop.eup %6608  ;;  %6628 = vpow2.f32 %v1869_v1 }
 0x4da   : > { %11023 = vst [vmem:[#allocation85_spill] sm:$0xff] %v8943_v51  ;;  %v8951_v54 = vpop.eup %6610  ;;  %6630 = vpow2.f32 %v1871_v2 }
 0x4db   : > { %1945 = vperm.xlu0 %6508, %v8921_v16   ;;  %11026 = vst [vmem:[#allocation88_spill] sm:$0xff] %v8951_v54  ;;  %v8953_v42 = vpop.eup %6612  ;;  %6632 = vpow2.f32 %v1873_v41  ;;  %v8993_v41 = vpop.xlane.xlu0 %2862  ;;  %v11044_v16 = vld [vmem:[#allocation66_spill] sm:$0xff] }
 0x4dc   : > { %1942 = vperm.xlu1 %6509, %v8923_v29   ;;  %11027 = vst [vmem:[#allocation79_spill] sm:$0xff] %v8953_v42  ;;  %v8961_v30 = vpop.eup %6614 }
 0x4dd   : > { %11030 = vst [vmem:[#allocation80_spill] sm:$0xff] %v8961_v30  ;;  %v8963_v47 = vpop.eup %6616 }
 0x4de   : > { %11031 = vst [vmem:[#allocation83_spill] sm:$0xff] %v8963_v47  ;;  %v8971_v37 = vpop.eup %6618 }
 0x4df   : > { %1951 = vperm.xlu0 %6508, %v8931_v63   ;;  %11034 = vst [vmem:[#allocation82_spill] sm:$0xff] %v8971_v37  ;;  %v8973_v59 = vpop.eup %6620  ;;  %v11040_v63 = vld [vmem:[#allocation23_spill] sm:$0xff] }
 0x4e0   : > { %1948 = vperm.xlu1 %6509, %v8933_v49   ;;  %11035 = vst [vmem:[#allocation91_spill] sm:$0xff] %v8973_v59  ;;  %v8981_v24 = vpop.eup %6622 }
 0x4e1   : > { %11038 = vst [vmem:[#allocation94_spill] sm:$0xff] %v8981_v24  ;;  %v8983_v1 = vpop.eup %6624 }
 0x4e2   : > { %11039 = vst [vmem:[#allocation101_spill] sm:$0xff] %v8983_v1 }
 0x4e3   : > { %1957 = vperm.xlu0 %6508, %v8941_v10  }
 0x4e4   : > { %1954 = vperm.xlu1 %6509, %v8943_v51   ;;  %v1875_v51 = vmul.f32 1.442695, %v1819_v4  ;;  %v11041_v4 = vld [vmem:[#allocation55_spill] sm:$0xff] }
 0x4e6   : > { %6634 = vpow2.f32 %v1875_v51 }
 0x4e7   : > { %1963 = vperm.xlu0 %6508, %v8951_v54   ;;  %v1820_v54 = vsub.f32 %v11033_v61, %v1766_v53 }
 0x4e8   : > { %1960 = vperm.xlu1 %6509, %v8953_v42   ;;  %v11036_v42 = vld [vmem:[#allocation51_spill] sm:$0xff] }
 0x4e9   : > { %v1821_v10 = vsub.f32 %v11036_v42, %v1770_v21  ;;  %v1877_v53 = vmul.f32 1.442695, %v1820_v54  ;;  %v1881_v21 = vmul.f32 1.442695, %v1822_v56  ;;  %v8991_v54 = vpop.eup %6626  ;;  %v2872_v56 = vrot.slane %v8993_v41, %v10986_v22 }
 0x4ea   : > { %11042 = vst [vmem:[#allocation99_spill] sm:$0xff] %v8991_v54 }
 0x4eb   : > { %1969 = vperm.xlu0 %6508, %v8961_v30   ;;  %v1774_v30 = vrot.slane %v8909_v48, %v11003_v14  ;;  %v1879_v2 = vmul.f32 1.442695, %v1821_v10  ;;  %6636 = vpow2.f32 %v1877_v53  ;;  %v11045_v10 = vld [vmem:[#allocation61_spill] sm:$0xff] }
 0x4ec   : > { %1966 = vperm.xlu1 %6509, %v8963_v47   ;;  %v1778_v47 = vrot.slane %v8909_v48, %v11007_v32 }
 0x4ed   : > { %v1823_v49 = vsub.f32 %v11040_v63, %v1774_v30  ;;  %6638 = vpow2.f32 %v1879_v2 }
 0x4ee   : > { %v1825_v48 = vsub.f32 %v11044_v16, %v1778_v47  ;;  %v1826_v51 = vsub.f32 %v11045_v10, %v1778_v47  ;;  %6640 = vpow2.f32 %v1881_v21  ;;  %v2876_v47 = vrot.slane %v8993_v41, %v10987_v40 }
 0x4ef   : > { %1975 = vperm.xlu0 %6508, %v8973_v59   ;;  %v8995_v59 = vpop.eup %6628  ;;  %v1883_v29 = vmul.f32 1.442695, %v1823_v49  ;;  %v2950_v21 = vsub.f32 %v10989_v38, %v2872_v56 }
 0x4f0   : > { %1972 = vperm.xlu1 %6509, %v8971_v37   ;;  %v1824_v37 = vsub.f32 %v11041_v4, %v1774_v30  ;;  %11043 = vst [vmem:[#allocation106_spill] sm:$0xff] %v8995_v59  ;;  %v9003_v53 = vpop.eup %6630  ;;  %v1889_v49 = vmul.f32 1.442695, %v1826_v51 }
 0x4f1   : > { %11046 = vst [vmem:[#allocation107_spill] sm:$0xff] %v9003_v53  ;;  %6642 = vpow2.f32 %v1883_v29  ;;  %v2880_v29 = vrot.slane %v8993_v41, %v10990_v34 }
 0x4f2   : > { %v1885_v30 = vmul.f32 1.442695, %v1824_v37  ;;  %v2949_v37 = vsub.f32 %v10988_v57, %v2872_v56 }
 0x4f3   : > { %1981 = vperm.xlu0 %6508, %v8983_v1   ;;  %v1887_v1 = vmul.f32 1.442695, %v1825_v48  ;;  %v2951_v48 = vsub.f32 %v10992_v15, %v2876_v47 }
 0x4f4   : > { %1978 = vperm.xlu1 %6509, %v8981_v24   ;;  %v9005_v24 = vpop.eup %6632  ;;  %6644 = vpow2.f32 %v1885_v30  ;;  %v2981_v51 = vmul.f32 1.442695, %v2949_v37  ;;  %v2954_v37 = vsub.f32 %v10994_v28, %v2880_v29 }
 0x4f5   : > { %11047 = vst [vmem:[#allocation93_spill] sm:$0xff] %v9005_v24  ;;  %v9012_v2 = vpop.eup %6634  ;;  %6646 = vpow2.f32 %v1887_v1  ;;  %v2884_v1 = vrot.slane %v8993_v41, %v10993_v11 }
 0x4f6   : > { %11048 = vst [vmem:[#allocation96_spill] sm:$0xff] %v9012_v2  ;;  %6648 = vpow2.f32 %v1889_v49  ;;  %v2953_v49 = vsub.f32 %v10995_v60, %v2880_v29  ;;  %v2892_v29 = vrot.slane %v8993_v41, %v11000_v31 }
 0x4f7   : > { %1987 = vperm.xlu0 %6508, %v8995_v59   ;;  %6650 = vpow2.f32 %v2981_v51  ;;  %v2956_v59 = vsub.f32 %v10997_v3, %v2884_v1 }
 0x4f8   : > { %1984 = vperm.xlu1 %6509, %v8991_v54   ;;  %v9015_v54 = vpop.eup %6636  ;;  %v2989_v51 = vmul.f32 1.442695, %v2953_v49 }
 0x4f9   : > { %11049 = vst [vmem:[#allocation84_spill] sm:$0xff] %v9015_v54  ;;  %v9022_v30 = vpop.eup %6638 }
 0x4fa   : > { %11050 = vst [vmem:[#allocation98_spill] sm:$0xff] %v9022_v30  ;;  %v9025_v56 = vpop.eup %6640 }
 0x4fb   : > { %1993 = vperm.xlu0 %6508, %v9005_v24   ;;  %v2983_v24 = vmul.f32 1.442695, %v2950_v21  ;;  %11051 = vst [vmem:[#allocation95_spill] sm:$0xff] %v9025_v56 }
 0x4fc   : > { %1990 = vperm.xlu1 %6509, %v9003_v53   ;;  %v2952_v53 = vsub.f32 %v10991_v35, %v2876_v47 }
 0x4fd   : > { %6652 = vpow2.f32 %v2983_v24  ;;  %v2991_v24 = vmul.f32 1.442695, %v2954_v37 }
 0x4fe   : > { %v2987_v47 = vmul.f32 1.442695, %v2952_v53 }
 0x4ff   : > { %1999 = vperm.xlu0 %6508, %v9015_v54   ;;  %v9032_v54 = vpop.eup %6642 }
 0x500   : > { %1996 = vperm.xlu1 %6509, %v9012_v2   ;;  %v2985_v2 = vmul.f32 1.442695, %v2951_v48  ;;  %11052 = vst [vmem:[#allocation100_spill] sm:$0xff] %v9032_v54  ;;  %v9035_v21 = vpop.eup %6644 }
 0x501   : > { %11053 = vst [vmem:[#allocation11_spill] sm:$0xff] %v9035_v21  ;;  %v9042_v48 = vpop.eup %6646 }
 0x502   : > { %6654 = vpow2.f32 %v2985_v2  ;;  %11054 = vst [vmem:[#allocation12_spill] sm:$0xff] %v9042_v48  ;;  %v9045_v53 = vpop.eup %6648 }
 0x503   : > { %2005 = vperm.xlu0 %6508, %v9025_v56   ;;  %v2955_v56 = vsub.f32 %v10998_v45, %v2884_v1  ;;  %6656 = vpow2.f32 %v2987_v47  ;;  %11055 = vst [vmem:[#allocation13_spill] sm:$0xff] %v9045_v53  ;;  %v9053_v1 = vpop.eup %6650  ;;  %v11058_v47 = vmov 1  }
 0x504   : > { %2002 = vperm.xlu1 %6509, %v9022_v30   ;;  %v2888_v30 = vrot.slane %v8993_v41, %v10996_v33  ;;  %6658 = vpow2.f32 %v2989_v51  ;;  %11056 = vst [vmem:[#allocation14_spill] sm:$0xff] %v9053_v1 }
 0x505   : > { %v2993_v2 = vmul.f32 1.442695, %v2955_v56  ;;  %6660 = vpow2.f32 %v2991_v24 }
 0x506   : > { %v2958_v49 = vsub.f32 %v11001_v18, %v2888_v30 }
 0x507   : > { %2011 = vperm.xlu0 %6508, %v9035_v21   ;;  %v2995_v21 = vmul.f32 1.442695, %v2956_v59  ;;  %v9055_v37 = vpop.eup %6652  ;;  %6662 = vpow2.f32 %v2993_v2  ;;  %v2960_v59 = vsub.f32 %v11004_v58, %v2892_v29 }
 0x508   : > { %2008 = vperm.xlu1 %6509, %v9032_v54   ;;  %v2957_v54 = vsub.f32 %v11002_v26, %v2888_v30  ;;  %11057 = vst [vmem:[#allocation15_spill] sm:$0xff] %v9055_v37  ;;  %v2999_v30 = vmul.f32 1.442695, %v2958_v49 }
 0x509   : > { %6664 = vpow2.f32 %v2995_v21 }
 0x50a   : > { %v2997_v51 = vmul.f32 1.442695, %v2957_v54  ;;  %v9074_v54 = vpop.xlane.xlu1 %2865 }
 0x50b   : > { %2017 = vperm.xlu0 %6508, %v9045_v53   ;;  %v2959_v53 = vsub.f32 %v11006_v12, %v2892_v29  ;;  %v3003_v29 = vmul.f32 1.442695, %v2960_v59 }
 0x50c   : > { %2014 = vperm.xlu1 %6509, %v9042_v48   ;;  %v2896_v48 = vrot.slane %v8993_v41, %v11003_v14  ;;  %v9065_v56 = vpop.eup %6654  ;;  %6666 = vpow2.f32 %v2997_v51 }
 0x50d   : > { %11059 = vst [vmem:[#allocation16_spill] sm:$0xff] %v9065_v56  ;;  %v9067_v24 = vpop.eup %6656  ;;  %v3001_v2 = vmul.f32 1.442695, %v2959_v53  ;;  %6668 = vpow2.f32 %v2999_v30 }
 0x50e   : > { %11060 = vst [vmem:[#allocation17_spill] sm:$0xff] %v9067_v24  ;;  %v2961_v17 = vsub.f32 %v11009_v55, %v2896_v48  ;;  %v2962_v21 = vsub.f32 %v11008_v43, %v2896_v48  ;;  %v9077_v49 = vpop.eup %6658 }
 0x50f   : > { %6510 = vset.pattern.permute.xlu0 %v11058_v47  ;;  %11061 = vst [vmem:[#allocation108_spill] sm:$0xff] %v9077_v49  ;;  %6670 = vpow2.f32 %v3001_v2 }
 0x510   : > { %6511 = vset.pattern.permute.xlu1 %v11058_v47  ;;  %3078 = vperm.xlu0 %6510, %v9053_v1   ;;  %v2900_v47 = vrot.slane %v8993_v41, %v11007_v32  ;;  %v9079_v1 = vpop.eup %6660  ;;  %v2904_v41 = vrot.slane %v9074_v54, %v10986_v22  ;;  %v3005_v53 = vmul.f32 1.442695, %v2961_v17  ;;  %6672 = vpow2.f32 %v3003_v29 }
 0x511   : > { %3081 = vperm.xlu1 %6511, %v9055_v37   ;;  %11062 = vst [vmem:[#allocation109_spill] sm:$0xff] %v9079_v1  ;;  %v3007_v48 = vmul.f32 1.442695, %v2962_v21  ;;  %v9087_v59 = vpop.eup %6662 }
 0x512   : > { %v2963_v51 = vsub.f32 %v11013_v62, %v2900_v47  ;;  %11063 = vst [vmem:[#allocation110_spill] sm:$0xff] %v9087_v59  ;;  %v2965_v37 = vsub.f32 %v11016_v44, %v2904_v41  ;;  %6674 = vpow2.f32 %v3005_v53  ;;  %v2966_v17 = vsub.f32 %v11017_v36, %v2904_v41 }
 0x513   : > { %v9089_v30 = vpop.eup %6664  ;;  %6676 = vpow2.f32 %v3007_v48  ;;  %v2916_v48 = vrot.slane %v9074_v54, %v10993_v11 }
 0x514   : > { %3084 = vperm.xlu0 %6510, %v9065_v56   ;;  %v2964_v56 = vsub.f32 %v11012_v9, %v2900_v47  ;;  %v3009_v2 = vmul.f32 1.442695, %v2963_v51  ;;  %v3013_v19 = vmul.f32 1.442695, %v2965_v37  ;;  %v3015_v41 = vmul.f32 1.442695, %v2966_v17 }
 0x515   : > { %3087 = vperm.xlu1 %6511, %v9067_v24   ;;  %v2908_v24 = vrot.slane %v9074_v54, %v10987_v40 }
 0x516   : > { %v3011_v47 = vmul.f32 1.442695, %v2964_v56  ;;  %v9097_v21 = vpop.eup %6666  ;;  %6678 = vpow2.f32 %v3009_v2 }
 0x517   : > { %11064 = vst [vmem:[#allocation111_spill] sm:$0xff] %v9097_v21  ;;  %v9099_v29 = vpop.eup %6668  ;;  %v2968_v51 = vsub.f32 %v11021_v52, %v2908_v24 }
 0x518   : > { %3090 = vperm.xlu0 %6510, %v9077_v49   ;;  %11065 = vst [vmem:[#allocation112_spill] sm:$0xff] %v9099_v29  ;;  %v2912_v49 = vrot.slane %v9074_v54, %v10990_v34  ;;  %6680 = vpow2.f32 %v3011_v47 }
 0x519   : > { %3093 = vperm.xlu1 %6511, %v9079_v1   ;;  %v2967_v1 = vsub.f32 %v11020_v20, %v2908_v24  ;;  %v9107_v56 = vpop.eup %6670  ;;  %6682 = vpow2.f32 %v3013_v19  ;;  %v3019_v24 = vmul.f32 1.442695, %v2968_v51 }
 0x51a   : > { %11066 = vst [vmem:[#allocation113_spill] sm:$0xff] %v9107_v56  ;;  %v9109_v53 = vpop.eup %6672  ;;  %v2970_v2 = vsub.f32 %v11025_v27, %v2912_v49  ;;  %6684 = vpow2.f32 %v3015_v41 }
 0x51b   : > { %11067 = vst [vmem:[#allocation114_spill] sm:$0xff] %v9109_v53  ;;  %v3017_v37 = vmul.f32 1.442695, %v2967_v1  ;;  %v2972_v1 = vsub.f32 %v11029_v7, %v2916_v48 }
 0x51c   : > { %3096 = vperm.xlu0 %6510, %v9087_v59   ;;  %v2969_v59 = vsub.f32 %v11024_v5, %v2912_v49  ;;  %v9117_v17 = vpop.eup %6674  ;;  %v3023_v49 = vmul.f32 1.442695, %v2970_v2 }
 0x51d   : > { %3099 = vperm.xlu1 %6511, %v9089_v30   ;;  %11068 = vst [vmem:[#allocation115_spill] sm:$0xff] %v9117_v17  ;;  %v9119_v47 = vpop.eup %6676  ;;  %6686 = vpow2.f32 %v3017_v37 }
 0x51e   : > { %11069 = vst [vmem:[#allocation116_spill] sm:$0xff] %v9119_v47  ;;  %v3021_v19 = vmul.f32 1.442695, %v2969_v59  ;;  %6688 = vpow2.f32 %v3019_v24 }
 0x520   : > { %3102 = vperm.xlu0 %6510, %v9097_v21   ;;  %v2920_v21 = vrot.slane %v9074_v54, %v10996_v33  ;;  %v9127_v51 = vpop.eup %6678  ;;  %6690 = vpow2.f32 %v3021_v19 }
 0x521   : > { %3105 = vperm.xlu1 %6511, %v9099_v29   ;;  %v2971_v29 = vsub.f32 %v11028_v25, %v2916_v48  ;;  %11070 = vst [vmem:[#allocation117_spill] sm:$0xff] %v9127_v51  ;;  %6692 = vpow2.f32 %v3023_v49  ;;  %v3027_v48 = vmul.f32 1.442695, %v2972_v1 }
 0x522   : > { %v9129_v41 = vpop.eup %6680  ;;  %v2974_v59 = vsub.f32 %v11033_v61, %v2920_v21 }
 0x523   : > { %11071 = vst [vmem:[#allocation118_spill] sm:$0xff] %v9129_v41  ;;  %v3025_v37 = vmul.f32 1.442695, %v2971_v29  ;;  %v9137_v2 = vpop.eup %6682 }
 0x524   : > { %3108 = vperm.xlu0 %6510, %v9107_v56   ;;  %v2924_v56 = vrot.slane %v9074_v54, %v11000_v31  ;;  %11072 = vst [vmem:[#allocation119_spill] sm:$0xff] %v9137_v2  ;;  %v9139_v24 = vpop.eup %6684 }
 0x525   : > { %3111 = vperm.xlu1 %6511, %v9109_v53   ;;  %v2973_v53 = vsub.f32 %v11032_v23, %v2920_v21  ;;  %11073 = vst [vmem:[#allocation120_spill] sm:$0xff] %v9139_v24  ;;  %6694 = vpow2.f32 %v3025_v37  ;;  %v3031_v21 = vmul.f32 1.442695, %v2974_v59 }
 0x526   : > { %v2976_v29 = vsub.f32 %v11037_v0, %v2924_v56  ;;  %6696 = vpow2.f32 %v3027_v48  ;;  %v9159_v48 = vpop.xlane.xlu1 %4017 }
 0x527   : > { %v3029_v19 = vmul.f32 1.442695, %v2973_v53  ;;  %v9147_v1 = vpop.eup %6686 }
 0x528   : > { %3114 = vperm.xlu0 %6510, %v9117_v17   ;;  %v2928_v17 = vrot.slane %v9074_v54, %v11003_v14  ;;  %11074 = vst [vmem:[#allocation121_spill] sm:$0xff] %v9147_v1  ;;  %v9149_v49 = vpop.eup %6688 }
 0x529   : > { %3117 = vperm.xlu1 %6511, %v9119_v47   ;;  %v2975_v47 = vsub.f32 %v11036_v42, %v2924_v56  ;;  %6698 = vpow2.f32 %v3029_v19  ;;  %v3035_v56 = vmul.f32 1.442695, %v2976_v29  ;;  %v4027_v19 = vrot.slane %v9159_v48, %v10986_v22 }
 0x52a   : > { %v2978_v53 = vsub.f32 %v11041_v4, %v2928_v17  ;;  %6700 = vpow2.f32 %v3031_v21  ;;  %v9157_v59 = vpop.eup %6690 }
 0x52b   : > { %v3033_v37 = vmul.f32 1.442695, %v2975_v47  ;;  %11075 = vst [vmem:[#allocation122_spill] sm:$0xff] %v9157_v59 }
 0x52c   : > { %3120 = vperm.xlu0 %6510, %v9127_v51   ;;  %v2932_v51 = vrot.slane %v9074_v54, %v11007_v32 }
 0x52d   : > { %3123 = vperm.xlu1 %6511, %v9129_v41   ;;  %v2977_v41 = vsub.f32 %v11040_v63, %v2928_v17  ;;  %6702 = vpow2.f32 %v3033_v37  ;;  %v3039_v17 = vmul.f32 1.442695, %v2978_v53  ;;  %v4104_v37 = vsub.f32 %v10988_v57, %v4027_v19 }
 0x52e   : > { %v2979_v54 = vsub.f32 %v11044_v16, %v2932_v51  ;;  %v2980_v47 = vsub.f32 %v11045_v10, %v2932_v51  ;;  %6704 = vpow2.f32 %v3035_v56  ;;  %v4031_v51 = vrot.slane %v9159_v48, %v10987_v40 }
 0x52f   : > { %v4105_v56 = vsub.f32 %v10989_v38, %v4027_v19 }
 0x530   : > { %3126 = vperm.xlu0 %6510, %v9137_v2   ;;  %v9161_v2 = vpop.eup %6692  ;;  %v4107_v57 = vsub.f32 %v10991_v35, %v4031_v51  ;;  %v4043_v35 = vrot.slane %v9159_v48, %v10996_v33 }
 0x531   : > { %3129 = vperm.xlu1 %6511, %v9139_v24   ;;  %v3037_v24 = vmul.f32 1.442695, %v2977_v41  ;;  %v9169_v29 = vpop.eup %6694  ;;  %v3043_v41 = vmul.f32 1.442695, %v2980_v47  ;;  %v4136_v47 = vmul.f32 1.442695, %v4104_v37 }
 0x532   : > { %11076 = vst [vmem:[#allocation123_spill] sm:$0xff] %v9169_v29  ;;  %v9171_v21 = vpop.eup %6696 }
 0x533   : > { %6706 = vpow2.f32 %v3037_v24  ;;  %v9178_v53 = vpop.eup %6698  ;;  %v4035_v24 = vrot.slane %v9159_v48, %v10990_v34 }
 0x534   : > { %3132 = vperm.xlu0 %6510, %v9147_v1   ;;  %v3041_v1 = vmul.f32 1.442695, %v2979_v54  ;;  %6708 = vpow2.f32 %v3039_v17  ;;  %11077 = vst [vmem:[#allocation124_spill] sm:$0xff] %v9178_v53  ;;  %v4106_v54 = vsub.f32 %v10992_v15, %v4031_v51  ;;  %v4142_v51 = vmul.f32 1.442695, %v4107_v57 }
 0x535   : > { %3135 = vperm.xlu1 %6511, %v9149_v49   ;;  %v4109_v37 = vsub.f32 %v10994_v28, %v4035_v24  ;;  %v4047_v28 = vrot.slane %v9159_v48, %v11000_v31 }
 0x536   : > { %6710 = vpow2.f32 %v3041_v1  ;;  %v4039_v1 = vrot.slane %v9159_v48, %v10993_v11  ;;  %v4140_v38 = vmul.f32 1.442695, %v4106_v54  ;;  %v9208_v54 = vpop.xlane.xlu0 %4020 }
 0x537   : > { %6712 = vpow2.f32 %v3043_v41  ;;  %v4108_v41 = vsub.f32 %v10995_v60, %v4035_v24  ;;  %v4146_v57 = vmul.f32 1.442695, %v4109_v37 }
 0x538   : > { %3138 = vperm.xlu0 %6510, %v9157_v59   ;;  %v9181_v59 = vpop.eup %6700  ;;  %6714 = vpow2.f32 %v4136_v47 }
 0x539   : > { %3141 = vperm.xlu1 %6511, %v9161_v2   ;;  %v9188_v17 = vpop.eup %6702  ;;  %v4144_v47 = vmul.f32 1.442695, %v4108_v41 }
 0x53a   : > { %11078 = vst [vmem:[#allocation125_spill] sm:$0xff] %v9188_v17  ;;  %v9191_v19 = vpop.eup %6704 }
 0x53b   : > { %11079 = vst [vmem:[#allocation126_spill] sm:$0xff] %v9191_v19 }
 0x53c   : > { %3144 = vperm.xlu0 %6510, %v9169_v29   ;;  %v4138_v29 = vmul.f32 1.442695, %v4105_v56 }
 0x53d   : > { %3147 = vperm.xlu1 %6511, %v9171_v21   ;;  %v9198_v15 = vpop.eup %6706 }
 0x53e   : > { %11080 = vst [vmem:[#allocation127_spill] sm:$0xff] %v9198_v15  ;;  %6716 = vpow2.f32 %v4138_v29  ;;  %v9201_v56 = vpop.eup %6708  ;;  %v4111_v29 = vsub.f32 %v10997_v3, %v4039_v1 }
 0x53f   : > { %11081 = vst [vmem:[#allocation128_spill] sm:$0xff] %v9201_v56  ;;  %6718 = vpow2.f32 %v4140_v38  ;;  %v4112_v38 = vsub.f32 %v11002_v26, %v4043_v35 }
 0x540   : > { %3150 = vperm.xlu0 %6510, %v9178_v53   ;;  %v9210_v60 = vpop.eup %6710  ;;  %6720 = vpow2.f32 %v4142_v51 }
 0x541   : > { %3153 = vperm.xlu1 %6511, %v9181_v59   ;;  %11082 = vst [vmem:[#allocation129_spill] sm:$0xff] %v9210_v60  ;;  %v9213_v24 = vpop.eup %6712  ;;  %6722 = vpow2.f32 %v4144_v47  ;;  %v4051_v47 = vrot.slane %v9159_v48, %v11003_v14  ;;  %v4152_v26 = vmul.f32 1.442695, %v4112_v38 }
 0x542   : > { %11083 = vst [vmem:[#allocation130_spill] sm:$0xff] %v9213_v24  ;;  %6724 = vpow2.f32 %v4146_v57  ;;  %v9225_v51 = vpop.eup %6714 }
 0x543   : > { %11084 = vst [vmem:[#allocation131_spill] sm:$0xff] %v9225_v51  ;;  %v4116_v38 = vsub.f32 %v11009_v55, %v4051_v47 }
 0x544   : > { %3156 = vperm.xlu0 %6510, %v9188_v17   ;;  %v4110_v17 = vsub.f32 %v10998_v45, %v4039_v1  ;;  %v4150_v1 = vmul.f32 1.442695, %v4111_v29  ;;  %v4115_v29 = vsub.f32 %v11004_v58, %v4047_v28 }
 0x545   : > { %3159 = vperm.xlu1 %6511, %v9191_v19  }
 0x546   : > { %v4148_v41 = vmul.f32 1.442695, %v4110_v17  ;;  %v4114_v17 = vsub.f32 %v11006_v12, %v4047_v28 }
 0x548   : > { %3162 = vperm.xlu0 %6510, %v9198_v15   ;;  %v4113_v15 = vsub.f32 %v11001_v18, %v4043_v35  ;;  %v9227_v3 = vpop.eup %6716  ;;  %6726 = vpow2.f32 %v4148_v41  ;;  %v4055_v41 = vrot.slane %v9159_v48, %v11007_v32  ;;  %v4156_v12 = vmul.f32 1.442695, %v4114_v17 }
 0x549   : > { %3165 = vperm.xlu1 %6511, %v9201_v56   ;;  %11085 = vst [vmem:[#allocation132_spill] sm:$0xff] %v9227_v3  ;;  %6728 = vpow2.f32 %v4150_v1  ;;  %v4158_v1 = vmul.f32 1.442695, %v4115_v29  ;;  %v4059_v17 = vrot.slane %v9208_v54, %v10986_v22 }
 0x54a   : > { %v4154_v57 = vmul.f32 1.442695, %v4113_v15  ;;  %6730 = vpow2.f32 %v4152_v26  ;;  %v4117_v15 = vsub.f32 %v11008_v43, %v4051_v47  ;;  %v4118_v48 = vsub.f32 %v11013_v62, %v4055_v41 }
 0x54b   : > { %v4160_v26 = vmul.f32 1.442695, %v4116_v38  ;;  %v4119_v29 = vsub.f32 %v11012_v9, %v4055_v41  ;;  %v4063_v38 = vrot.slane %v9208_v54, %v10987_v40 }
 0x54c   : > { %3168 = vperm.xlu0 %6510, %v9210_v60   ;;  %v11086_v60 = vmov 2   ;;  %6732 = vpow2.f32 %v4154_v57  ;;  %v4162_v57 = vmul.f32 1.442695, %v4117_v15 }
 0x54d   : > { %3171 = vperm.xlu1 %6511, %v9213_v24   ;;  %6734 = vpow2.f32 %v4156_v12  ;;  %v4164_v12 = vmul.f32 1.442695, %v4118_v48  ;;  %v4166_v15 = vmul.f32 1.442695, %v4119_v29 }
 0x54e   : > { %v9220_v45 = vpop.permute.xlu0 %1924  ;;  %6736 = vpow2.f32 %v4158_v1  ;;  %v4121_v1 = vsub.f32 %v11017_v36, %v4059_v17 }
 0x54f   : > { %v9223_v37 = vpop.permute.xlu1 %1927  ;;  %6738 = vpow2.f32 %v4160_v26  ;;  %v4067_v26 = vrot.slane %v9208_v54, %v10990_v34 }
 0x550   : > { %6512 = vset.pattern.permute.xlu0 %v11086_v60  ;;  %6740 = vpow2.f32 %v4162_v57  ;;  %v4170_v57 = vmul.f32 1.442695, %v4121_v1 }
 0x551   : > { %6513 = vset.pattern.permute.xlu1 %v11086_v60  ;;  %4233 = vperm.xlu0 %6512, %v9225_v51   ;;  %v9241_v60 = vpop.eup %6718  ;;  %6742 = vpow2.f32 %v4164_v12 }
 0x552   : > { %4236 = vperm.xlu1 %6513, %v9227_v3   ;;  %v9236_v35 = vpop.permute.xlu0 %1933  ;;  %11087 = vst [vmem:[#allocation133_spill] sm:$0xff] %v9241_v60  ;;  %v9243_v24 = vpop.eup %6720  ;;  %6744 = vpow2.f32 %v4166_v15 }
 0x553   : > { %v9239_v18 = vpop.permute.xlu1 %1930  ;;  %11088 = vst [vmem:[#allocation134_spill] sm:$0xff] %v9243_v24  ;;  %v9255_v51 = vpop.eup %6722 }
 0x554   : > { %11089 = vst [vmem:[#allocation135_spill] sm:$0xff] %v9255_v51  ;;  %v9257_v3 = vpop.eup %6724 }
 0x555   : > { %4242 = vperm.xlu0 %6512, %v9243_v24   ;;  %11090 = vst [vmem:[#allocation136_spill] sm:$0xff] %v9257_v3  ;;  %v9269_v55 = vpop.eup %6726 }
 0x556   : > { %4239 = vperm.xlu1 %6513, %v9241_v60   ;;  %v9250_v28 = vpop.permute.xlu0 %1939  ;;  %11091 = vst [vmem:[#allocation137_spill] sm:$0xff] %v9269_v55  ;;  %v9271_v62 = vpop.eup %6728 }
 0x557   : > { %v9253_v58 = vpop.permute.xlu1 %1936  ;;  %11092 = vst [vmem:[#allocation138_spill] sm:$0xff] %v9271_v62 }
 0x558   : > { %v2040_v60 = vrot.slane %v9253_v58, %v8534_v8 }
 0x559   : > { %4248 = vperm.xlu0 %6512, %v9257_v3   ;;  %v9283_v3 = vpop.eup %6730 }
 0x55a   : > { %4245 = vperm.xlu1 %6513, %v9255_v51   ;;  %v9264_v47 = vpop.permute.xlu0 %1945  ;;  %v4120_v51 = vsub.f32 %v11016_v44, %v4059_v17  ;;  %11093 = vst [vmem:[#allocation139_spill] sm:$0xff] %v9283_v3  ;;  %v9285_v48 = vpop.eup %6732  ;;  %v4122_v44 = vsub.f32 %v11020_v20, %v4063_v38  ;;  %v4123_v17 = vsub.f32 %v11021_v52, %v4063_v38 }
 0x55b   : > { %v9267_v43 = vpop.permute.xlu1 %1942  ;;  %11094 = vst [vmem:[#allocation140_spill] sm:$0xff] %v9285_v48  ;;  %v4071_v20 = vrot.slane %v9208_v54, %v10993_v11  ;;  %v4125_v38 = vsub.f32 %v11025_v27, %v4067_v26  ;;  %v2053_v58 = vrot.slane %v9264_v47, %v8541_v50 }
 0x55c   : > { %v4174_v1 = vmul.f32 1.442695, %v4123_v17 }
 0x55d   : > { %4254 = vperm.xlu0 %6512, %v9271_v62   ;;  %v9297_v62 = vpop.eup %6734  ;;  %v4127_v17 = vsub.f32 %v11029_v7, %v4071_v20 }
 0x55e   : > { %4251 = vperm.xlu1 %6513, %v9269_v55   ;;  %v9278_v41 = vpop.permute.xlu0 %1951  ;;  %v4168_v55 = vmul.f32 1.442695, %v4120_v51  ;;  %11095 = vst [vmem:[#allocation141_spill] sm:$0xff] %v9297_v62  ;;  %v9299_v12 = vpop.eup %6736  ;;  %v4124_v51 = vsub.f32 %v11024_v5, %v4067_v26 }
 0x55f   : > { %v9281_v9 = vpop.permute.xlu1 %1948  ;;  %11096 = vst [vmem:[#allocation142_spill] sm:$0xff] %v9299_v12 }
 0x560   : > { %6746 = vpow2.f32 %v4168_v55  ;;  %v4075_v55 = vrot.slane %v9208_v54, %v10996_v33  ;;  %v4176_v5 = vmul.f32 1.442695, %v4124_v51 }
 0x561   : > { %4260 = vperm.xlu0 %6512, %v9285_v48   ;;  %6748 = vpow2.f32 %v4170_v57  ;;  %v9311_v48 = vpop.eup %6738  ;;  %v4178_v57 = vmul.f32 1.442695, %v4125_v38  ;;  %v4182_v38 = vmul.f32 1.442695, %v4127_v17 }
 0x562   : > { %4257 = vperm.xlu1 %6513, %v9283_v3   ;;  %v9292_v29 = vpop.permute.xlu0 %1957  ;;  %v4172_v3 = vmul.f32 1.442695, %v4122_v44  ;;  %11097 = vst [vmem:[#allocation143_spill] sm:$0xff] %v9311_v48  ;;  %v9313_v24 = vpop.eup %6740  ;;  %v4126_v44 = vsub.f32 %v11028_v25, %v4071_v20  ;;  %v4128_v51 = vsub.f32 %v11032_v23, %v4075_v55  ;;  %v4129_v20 = vsub.f32 %v11033_v61, %v4075_v55 }
 0x563   : > { %v9295_v36 = vpop.permute.xlu1 %1954  ;;  %11098 = vst [vmem:[#allocation144_spill] sm:$0xff] %v9313_v24 }
 0x564   : > { %6750 = vpow2.f32 %v4172_v3  ;;  %v4079_v3 = vrot.slane %v9208_v54, %v11000_v31  ;;  %v4180_v25 = vmul.f32 1.442695, %v4126_v44  ;;  %v4184_v23 = vmul.f32 1.442695, %v4128_v51 }
 0x565   : > { %4266 = vperm.xlu0 %6512, %v9299_v12   ;;  %6752 = vpow2.f32 %v4174_v1  ;;  %v9325_v12 = vpop.eup %6742  ;;  %v4186_v17 = vmul.f32 1.442695, %v4129_v20 }
 0x566   : > { %4263 = vperm.xlu1 %6513, %v9297_v62   ;;  %v9306_v15 = vpop.permute.xlu0 %1963  ;;  %11099 = vst [vmem:[#allocation145_spill] sm:$0xff] %v9325_v12  ;;  %v9327_v62 = vpop.eup %6744  ;;  %6754 = vpow2.f32 %v4176_v5  ;;  %v4083_v5 = vrot.slane %v9208_v54, %v11003_v14  ;;  %v4130_v44 = vsub.f32 %v11036_v42, %v4079_v3  ;;  %v4131_v55 = vsub.f32 %v11037_v0, %v4079_v3 }
 0x567   : > { %v9309_v52 = vpop.permute.xlu1 %1960  ;;  %11100 = vst [vmem:[#allocation146_spill] sm:$0xff] %v9327_v62  ;;  %6756 = vpow2.f32 %v4178_v57 }
 0x568   : > { %6758 = vpow2.f32 %v4180_v25  ;;  %v4087_v25 = vrot.slane %v9208_v54, %v11007_v32  ;;  %v4132_v51 = vsub.f32 %v11040_v63, %v4083_v5  ;;  %v4188_v42 = vmul.f32 1.442695, %v4130_v44 }
 0x569   : > { %4272 = vperm.xlu0 %6512, %v9313_v24   ;;  %6760 = vpow2.f32 %v4182_v38  ;;  %v4133_v3 = vsub.f32 %v11041_v4, %v4083_v5  ;;  %v4190_v20 = vmul.f32 1.442695, %v4131_v55 }
 0x56a   : > { %4269 = vperm.xlu1 %6513, %v9311_v48   ;;  %v9320_v26 = vpop.permute.xlu0 %1969  ;;  %v9339_v24 = vpop.eup %6746  ;;  %6762 = vpow2.f32 %v4184_v23  ;;  %v4134_v54 = vsub.f32 %v11044_v16, %v4087_v25  ;;  %v4192_v23 = vmul.f32 1.442695, %v4132_v51  ;;  %v4135_v5 = vsub.f32 %v11045_v10, %v4087_v25 }
 0x56b   : > { %v9323_v27 = vpop.permute.xlu1 %1966  ;;  %11101 = vst [vmem:[#allocation147_spill] sm:$0xff] %v9339_v24  ;;  %v9341_v48 = vpop.eup %6748  ;;  %6764 = vpow2.f32 %v4186_v17  ;;  %v4194_v44 = vmul.f32 1.442695, %v4133_v3 }
 0x56c   : > { %11102 = vst [vmem:[#allocation148_spill] sm:$0xff] %v9341_v48  ;;  %6766 = vpow2.f32 %v4188_v42  ;;  %v4196_v16 = vmul.f32 1.442695, %v4134_v54  ;;  %v4198_v42 = vmul.f32 1.442695, %v4135_v5 }
 0x56d   : > { %4278 = vperm.xlu0 %6512, %v9327_v62   ;;  %6768 = vpow2.f32 %v4190_v20 }
 0x56e   : > { %4275 = vperm.xlu1 %6513, %v9325_v12   ;;  %v9337_v7 = vpop.permute.xlu0 %1975  ;;  %v9353_v62 = vpop.eup %6750  ;;  %6770 = vpow2.f32 %v4192_v23 }
 0x56f   : > { %v9335_v1 = vpop.permute.xlu1 %1972  ;;  %11103 = vst [vmem:[#allocation149_spill] sm:$0xff] %v9353_v62  ;;  %v9355_v12 = vpop.eup %6752  ;;  %6772 = vpow2.f32 %v4194_v44 }
 0x570   : > { %11104 = vst [vmem:[#allocation150_spill] sm:$0xff] %v9355_v12  ;;  %6774 = vpow2.f32 %v4196_v16 }
 0x571   : > { %4284 = vperm.xlu0 %6512, %v9341_v48   ;;  %6776 = vpow2.f32 %v4198_v42 }
 0x572   : > { %4281 = vperm.xlu1 %6513, %v9339_v24   ;;  %v9351_v61 = vpop.permute.xlu0 %1981  ;;  %v9367_v24 = vpop.eup %6754 }
 0x573   : > { %v9349_v57 = vpop.permute.xlu1 %1978  ;;  %11105 = vst [vmem:[#allocation151_spill] sm:$0xff] %v9367_v24  ;;  %v9369_v48 = vpop.eup %6756 }
 0x574   : > { %11106 = vst [vmem:[#allocation152_spill] sm:$0xff] %v9369_v48  ;;  %v9379_v4 = vpop.eup %6758 }
 0x575   : > { %4290 = vperm.xlu0 %6512, %v9355_v12   ;;  %11107 = vst [vmem:[#allocation153_spill] sm:$0xff] %v9379_v4  ;;  %v9381_v63 = vpop.eup %6760 }
 0x576   : > { %4287 = vperm.xlu1 %6513, %v9353_v62   ;;  %v9365_v0 = vpop.permute.xlu0 %1987  ;;  %11108 = vst [vmem:[#allocation154_spill] sm:$0xff] %v9381_v63  ;;  %v9389_v3 = vpop.eup %6762  ;;  %v2031_v62 = vrot.slane %v9239_v18, %v8534_v8 }
 0x577   : > { %v9363_v38 = vpop.permute.xlu1 %1984  ;;  %11109 = vst [vmem:[#allocation155_spill] sm:$0xff] %v9389_v3  ;;  %v9391_v20 = vpop.eup %6764 }
 0x578   : > { %11110 = vst [vmem:[#allocation156_spill] sm:$0xff] %v9391_v20  ;;  %v9399_v44 = vpop.eup %6766 }
 0x579   : > { %4296 = vperm.xlu0 %6512, %v9369_v48   ;;  %11111 = vst [vmem:[#allocation157_spill] sm:$0xff] %v9399_v44  ;;  %v9401_v5 = vpop.eup %6768  ;;  %v11117_v48 = vmov 0  }
 0x57a   : > { %4293 = vperm.xlu1 %6513, %v9367_v24   ;;  %v9377_v17 = vpop.permute.xlu0 %1993  ;;  %11112 = vst [vmem:[#allocation158_spill] sm:$0xff] %v9401_v5 }
 0x57b   : > { %v9375_v55 = vpop.permute.xlu1 %1990 }
 0x57c   : > { %v2121_v47 = vrot.slane %v9375_v55, %v8534_v8  ;;  %v2062_v55 = vrot.slane %v9278_v41, %v8541_v50 }
 0x57d   : > { %4302 = vperm.xlu0 %6512, %v9381_v63  }
 0x57e   : > { %4299 = vperm.xlu1 %6513, %v9379_v4   ;;  %v9387_v25 = vpop.permute.xlu0 %1999 }
 0x57f   : > { %v9385_v51 = vpop.permute.xlu1 %1996 }
 0x581   : > { %4308 = vperm.xlu0 %6512, %v9391_v20   ;;  %v9409_v20 = vpop.eup %6770 }
 0x582   : > { %4305 = vperm.xlu1 %6513, %v9389_v3   ;;  %v9397_v23 = vpop.permute.xlu0 %2005  ;;  %11113 = vst [vmem:[#allocation159_spill] sm:$0xff] %v9409_v20  ;;  %v9411_v3 = vpop.eup %6772 }
 0x583   : > { %v9395_v54 = vpop.permute.xlu1 %2002  ;;  %11114 = vst [vmem:[#allocation160_spill] sm:$0xff] %v9411_v3  ;;  %v9419_v63 = vpop.eup %6774 }
 0x584   : > { %11115 = vst [vmem:[#allocation161_spill] sm:$0xff] %v9419_v63 }
 0x585   : > { %4314 = vperm.xlu0 %6512, %v9401_v5   ;;  %v9421_v5 = vpop.eup %6776 }
 0x586   : > { %4311 = vperm.xlu1 %6513, %v9399_v44   ;;  %v9407_v16 = vpop.permute.xlu0 %2011  ;;  %11116 = vst [vmem:[#allocation162_spill] sm:$0xff] %v9421_v5 }
 0x587   : > { %v9405_v10 = vpop.permute.xlu1 %2008  ;;  %v2152_v41 = vrot.slane %v9407_v16, %v8541_v50  ;;  %v2076_v16 = vrot.slane %v9309_v52, %v8534_v8 }
 0x589   : > { %4320 = vperm.xlu0 %6512, %v9411_v3   ;;  %v2022_v3 = vrot.slane %v9220_v45, %v8534_v8  ;;  %v2107_v45 = vrot.slane %v9351_v61, %v8541_v50  ;;  %v2049_v61 = vrot.slane %v9267_v43, %v8534_v8  ;;  %v2134_v43 = vrot.slane %v9387_v25, %v8541_v50 }
 0x58a   : > { %4317 = vperm.xlu1 %6513, %v9409_v20   ;;  %v9417_v4 = vpop.permute.xlu0 %2017  ;;  %v2026_v20 = vrot.slane %v9223_v37, %v8541_v50  ;;  %v2103_v37 = vrot.slane %v9349_v57, %v8534_v8  ;;  %v2098_v57 = vrot.slane %v9337_v7, %v8541_v50  ;;  %v2130_v7 = vrot.slane %v9385_v51, %v8534_v8 }
 0x58b   : > { %v9415_v42 = vpop.permute.xlu1 %2014 }
 0x58c   : > { %v2027_v18 = vsel %vm1547_vm1, %v2026_v20, %v2022_v3  ;;  %v2135_v25 = vsel %vm1547_vm1, %v2134_v43, %v2130_v7 }
 0x58d   : > { %4326 = vperm.xlu0 %6512, %v9421_v5  }
 0x58e   : > { %4323 = vperm.xlu1 %6513, %v9419_v63   ;;  %v2035_v63 = vrot.slane %v9236_v35, %v8541_v50 }
 0x58f   : > { %v9427_v24 = vpop.permute.xlu0 %3078 }
 0x590   : > { %v9425_v44 = vpop.permute.xlu1 %3081  ;;  %v2036_v35 = vsel %vm1547_vm1, %v2035_v63, %v2031_v62  ;;  %v2108_v62 = vsel %vm1547_vm1, %v2107_v45, %v2103_v37  ;;  %v2112_v63 = vrot.slane %v9363_v38, %v8534_v8  ;;  %v2054_v37 = vsel %vm1547_vm1, %v2053_v58, %v2049_v61 }
 0x591   : > { %6514 = vset.pattern.permute.xlu0 %v11117_v48  ;;  %v2163_v3 = vsel %vm1684_vm2, %v2036_v35, %v2027_v18  ;;  %v2139_v18 = vrot.slane %v9395_v54, %v8534_v8  ;;  %v2148_v35 = vrot.slane %v9405_v10, %v8534_v8  ;;  %v2157_v58 = vrot.slane %v9415_v42, %v8534_v8 }
 0x592   : > { %6515 = vset.pattern.permute.xlu1 %v11117_v48  ;;  %v2044_v48 = vrot.slane %v9250_v28, %v8541_v50  ;;  %v2094_v28 = vrot.slane %v9335_v1, %v8534_v8  ;;  %v2125_v1 = vrot.slane %v9377_v17, %v8541_v50  ;;  %v2058_v54 = vrot.slane %v9281_v9, %v8534_v8 }
 0x593   : > { %v9441_v12 = vpop.permute.xlu0 %3084  ;;  %v2071_v10 = vrot.slane %v9292_v29, %v8541_v50  ;;  %v2080_v42 = vrot.slane %v9306_v15, %v8541_v50  ;;  %v2153_v52 = vsel %vm1547_vm1, %v2152_v41, %v2148_v35  ;;  %v3180_v43 = vrot.slane %v9425_v44, %v8541_v50 }
 0x594   : > { %v9439_v5 = vpop.permute.xlu1 %3087  ;;  %v2045_v53 = vsel %vm1547_vm1, %v2044_v48, %v2040_v60  ;;  %v2116_v60 = vrot.slane %v9365_v0, %v8541_v50  ;;  %v2099_v0 = vsel %vm1547_vm1, %v2098_v57, %v2094_v28  ;;  %v2126_v45 = vsel %vm1547_vm1, %v2125_v1, %v2121_v47 }
 0x595   : > { %v2164_v38 = vsel %vm1686_vm3, %v2045_v53, %v2163_v3  ;;  %v2170_v17 = vsel %vm1684_vm2, %v2108_v62, %v2099_v0  ;;  %v2143_v53 = vrot.slane %v9397_v23, %v8541_v50  ;;  %v2161_v28 = vrot.slane %v9417_v4, %v8541_v50 }
 0x596   : > { %v2117_v51 = vsel %vm1547_vm1, %v2116_v60, %v2112_v63  ;;  %v2067_v23 = vrot.slane %v9295_v36, %v8534_v8  ;;  %v2089_v4 = vrot.slane %v9320_v26, %v8541_v50  ;;  %v3189_v29 = vrot.slane %v9439_v5, %v8541_v50 }
 0x597   : > { %v9455_v19 = vpop.permute.xlu0 %3090  ;;  %v2171_v62 = vsel %vm1686_vm3, %v2117_v51, %v2170_v17  ;;  %v2144_v36 = vsel %vm1547_vm1, %v2143_v53, %v2139_v18  ;;  %v3185_v60 = vrot.slane %v9441_v12, %v8534_v8  ;;  %v2162_v7 = vsel %vm1547_vm1, %v2161_v28, %v2157_v58 }
 0x598   : > { %v9453_v56 = vpop.permute.xlu1 %3093  ;;  %v2172_v63 = vsel %vm1688_vm4, %v2126_v45, %v2171_v62  ;;  %v3194_v26 = vrot.slane %v9455_v19, %v8534_v8  ;;  %v3176_v5 = vrot.slane %v9427_v24, %v8534_v8 }
 0x599   : > { %v2173_v9 = vsel %vm1690_vm5, %v2135_v25, %v2172_v63  ;;  %v3198_v15 = vrot.slane %v9453_v56, %v8541_v50  ;;  %v2085_v56 = vrot.slane %v9323_v27, %v8534_v8  ;;  %v3190_v51 = vsel %vm1547_vm1, %v3189_v29, %v3185_v60 }
 0x59a   : > { %v2174_v17 = vsel %vm1692_vm6, %v2144_v36, %v2173_v9  ;;  %v3181_v35 = vsel %vm1547_vm1, %v3180_v43, %v3176_v5 }
 0x59b   : > { %v3097_v48 = vpop.permute.xlu0 %3096  ;;  %v2175_v24 = vsel %vm1694_vm7, %v2153_v52, %v2174_v17  ;;  %v3199_v27 = vsel %vm1547_vm1, %v3198_v15, %v3194_v26  ;;  %v2090_v63 = vsel %vm1547_vm1, %v2089_v4, %v2085_v56 }
 0x59c   : > { %v3100_v20 = vpop.permute.xlu1 %3099  ;;  %v3203_v3 = vrot.slane %v3097_v48, %v8534_v8  ;;  %v2072_v48 = vsel %vm1547_vm1, %v2071_v10, %v2067_v23  ;;  %v2176_v53 = vsel %vm1696_vm8, %v2162_v7, %v2175_v24 }
 0x59d   : > { %v3207_v12 = vrot.slane %v3100_v20, %v8541_v50  ;;  %v2063_v20 = vsel %vm1547_vm1, %v2062_v55, %v2058_v54  ;;  %v2081_v55 = vsel %vm1547_vm1, %v2080_v42, %v2076_v16 }
 0x59f   : > { %v3103_v61 = vpop.permute.xlu0 %3102  ;;  %v3208_v41 = vsel %vm1547_vm1, %v3207_v12, %v3203_v3 }
 0x5a0   : > { %v3106_v57 = vpop.permute.xlu1 %3105  ;;  %v3212_v19 = vrot.slane %v3103_v61, %v8534_v8  ;;  %v3317_v61 = vsel %vm1684_vm2, %v3190_v51, %v3181_v35 }
 0x5a1   : > { %v3216_v0 = vrot.slane %v3106_v57, %v8541_v50  ;;  %v2165_v57 = vsel %vm1688_vm4, %v2054_v37, %v2164_v38  ;;  %v3318_v10 = vsel %vm1686_vm3, %v3199_v27, %v3317_v61  ;;  %v2182_v37 = vsel %vm345_vm0, %v2176_v53, 0.0 }
 0x5a2   : > { %v2166_v23 = vsel %vm1690_vm5, %v2063_v20, %v2165_v57  ;;  %v3319_v9 = vsel %vm1688_vm4, %v3208_v41, %v3318_v10 }
 0x5a3   : > { %v3109_v1 = vpop.permute.xlu0 %3108  ;;  %v3217_v54 = vsel %vm1547_vm1, %v3216_v0, %v3212_v19  ;;  %v2167_v16 = vsel %vm1692_vm6, %v2072_v48, %v2166_v23 }
 0x5a4   : > { %v3112_v47 = vpop.permute.xlu1 %3111  ;;  %v3221_v45 = vrot.slane %v3109_v1, %v8534_v8  ;;  %v3320_v42 = vsel %vm1690_vm5, %v3217_v54, %v3319_v9  ;;  %v2168_v15 = vsel %vm1694_vm7, %v2081_v55, %v2167_v16 }
 0x5a5   : > { %v3225_v44 = vrot.slane %v3112_v47, %v8541_v50  ;;  %v2169_v4 = vsel %vm1696_vm8, %v2090_v63, %v2168_v15 }
 0x5a6   : > { %v2179_v12 = vsel %vm345_vm0, %v2169_v4, 0.0 }
 0x5a7   : > { %v3115_v18 = vpop.permute.xlu0 %3114  ;;  %v3226_v62 = vsel %vm1547_vm1, %v3225_v44, %v3221_v45 }
 0x5a8   : > { %v3118_v25 = vpop.permute.xlu1 %3117  ;;  %v3230_v28 = vrot.slane %v3115_v18, %v8534_v8  ;;  %v3321_v26 = vsel %vm1692_vm6, %v3226_v62, %v3320_v42 }
 0x5a9   : > { %v3234_v58 = vrot.slane %v3118_v25, %v8541_v50 }
 0x5ab   : > { %v3235_v36 = vsel %vm1547_vm1, %v3234_v58, %v3230_v28  ;;  %v3121_v38 = vpop.permute.xlu0 %3120 }
 0x5ac   : > { %v3124_v29 = vpop.permute.xlu1 %3123  ;;  %v3239_v52 = vrot.slane %v3121_v38, %v8534_v8  ;;  %2183 = vadd.xlane.f32.xlu0 %v2182_v37  ;;  %v3322_v1 = vsel %vm1694_vm7, %v3235_v36, %v3321_v26 }
 0x5ad   : > { %v3243_v60 = vrot.slane %v3124_v29, %v8541_v50 }
 0x5af   : > { %v3244_v47 = vsel %vm1547_vm1, %v3243_v60, %v3239_v52  ;;  %v3127_v43 = vpop.permute.xlu0 %3126 }
 0x5b0   : > { %v3130_v7 = vpop.permute.xlu1 %3129  ;;  %v3323_v5 = vsel %vm1696_vm8, %v3244_v47, %v3322_v1  ;;  %v3248_v41 = vrot.slane %v3127_v43, %v8534_v8 }
 0x5b1   : > { %v3333_v3 = vsel %vm345_vm0, %v3323_v5, 0.0  ;;  %v3252_v35 = vrot.slane %v3130_v7, %v8541_v50 }
 0x5b2   : > { %2180 = vadd.xlane.f32.xlu1 %v2179_v12  ;;  %3334 = vadd.xlane.f32.xlu0 %v3333_v3 }
 0x5b3   : > { %v3133_v0 = vpop.permute.xlu0 %3132  ;;  %v3253_v9 = vsel %vm1547_vm1, %v3252_v35, %v3248_v41 }
 0x5b4   : > { %v3136_v56 = vpop.permute.xlu1 %3135  ;;  %v3257_v48 = vrot.slane %v3133_v0, %v8534_v8 }
 0x5b5   : > { %v3261_v20 = vrot.slane %v3136_v56, %v8541_v50 }
 0x5b7   : > { %v3139_v17 = vpop.permute.xlu0 %3138  ;;  %v3262_v61 = vsel %vm1547_vm1, %v3261_v20, %v3257_v48 }
 0x5b8   : > { %v3142_v19 = vpop.permute.xlu1 %3141  ;;  %v3266_v25 = vrot.slane %v3139_v17, %v8534_v8  ;;  %v3324_v37 = vsel %vm1684_vm2, %v3262_v61, %v3253_v9 }
 0x5b9   : > { %v3270_v27 = vrot.slane %v3142_v19, %v8541_v50 }
 0x5bb   : > { %v3145_v44 = vpop.permute.xlu0 %3144  ;;  %v3271_v10 = vsel %vm1547_vm1, %v3270_v27, %v3266_v25 }
 0x5bc   : > { %v3148_v51 = vpop.permute.xlu1 %3147  ;;  %v3275_v28 = vrot.slane %v3145_v44, %v8534_v8  ;;  %v3325_v42 = vsel %vm1686_vm3, %v3271_v10, %v3324_v37 }
 0x5bd   : > { %v3279_v58 = vrot.slane %v3148_v51, %v8541_v50 }
 0x5bf   : > { %v3151_v24 = vpop.permute.xlu0 %3150  ;;  %v3280_v36 = vsel %vm1547_vm1, %v3279_v58, %v3275_v28 }
 0x5c0   : > { %v3154_v45 = vpop.permute.xlu1 %3153  ;;  %v3284_v55 = vrot.slane %v3151_v24, %v8534_v8  ;;  %v3326_v52 = vsel %vm1688_vm4, %v3280_v36, %v3325_v42 }
 0x5c1   : > { %v3288_v57 = vrot.slane %v3154_v45, %v8541_v50 }
 0x5c3   : > { %v3157_v53 = vpop.permute.xlu0 %3156  ;;  %v3289_v16 = vsel %vm1547_vm1, %v3288_v57, %v3284_v55 }
 0x5c4   : > { %v3160_v18 = vpop.permute.xlu1 %3159  ;;  %v3293_v23 = vrot.slane %v3157_v53, %v8534_v8  ;;  %v3327_v47 = vsel %vm1690_vm5, %v3289_v16, %v3326_v52 }
 0x5c5   : > { %v3297_v54 = vrot.slane %v3160_v18, %v8541_v50 }
 0x5c7   : > { %v3163_v63 = vpop.permute.xlu0 %3162  ;;  %v3298_v60 = vsel %vm1547_vm1, %v3297_v54, %v3293_v23 }
 0x5c8   : > { %v3166_v62 = vpop.permute.xlu1 %3165  ;;  %v3302_v38 = vrot.slane %v3163_v63, %v8534_v8  ;;  %v3328_v43 = vsel %vm1692_vm6, %v3298_v60, %v3327_v47 }
 0x5c9   : > { %v3306_v29 = vrot.slane %v3166_v62, %v8541_v50 }
 0x5cb   : > { %v3307_v15 = vsel %vm1547_vm1, %v3306_v29, %v3302_v38  ;;  %v3169_v26 = vpop.permute.xlu0 %3168 }
 0x5cc   : > { %v3172_v4 = vpop.permute.xlu1 %3171  ;;  %v3311_v7 = vrot.slane %v3169_v26, %v8534_v8  ;;  %v3329_v12 = vsel %vm1694_vm7, %v3307_v15, %v3328_v43 }
 0x5cd   : > { %v3315_v1 = vrot.slane %v3172_v4, %v8541_v50 }
 0x5cf   : > { %v3316_v5 = vsel %vm1547_vm1, %v3315_v1, %v3311_v7 }
 0x5d0   : > { %v3330_v3 = vsel %vm1696_vm8, %v3316_v5, %v3329_v12  ;;  %v4234_v0 = vpop.permute.xlu0 %4233 }
 0x5d1   : > { %v4237_v56 = vpop.permute.xlu1 %4236  ;;  %v3336_v19 = vsel %vm345_vm0, %v3330_v3, 0.0  ;;  %v4331_v57 = vrot.slane %v4234_v0, %v8534_v8 }
 0x5d2   : > { %3337 = vadd.xlane.f32.xlu1 %v3336_v19  ;;  %v4335_v28 = vrot.slane %v4237_v56, %v8541_v50 }
 0x5d4   : > { %v4243_v51 = vpop.permute.xlu0 %4242  ;;  %v4336_v38 = vsel %vm1547_vm1, %v4335_v28, %v4331_v57 }
 0x5d5   : > { %v4240_v17 = vpop.permute.xlu1 %4239  ;;  %v4344_v18 = vrot.slane %v4243_v51, %v8541_v50 }
 0x5d6   : > { %v4340_v25 = vrot.slane %v4240_v17, %v8534_v8 }
 0x5d8   : > { %v4249_v45 = vpop.permute.xlu0 %4248  ;;  %v4345_v10 = vsel %vm1547_vm1, %v4344_v18, %v4340_v25 }
 0x5d9   : > { %v4246_v44 = vpop.permute.xlu1 %4245  ;;  %v4353_v35 = vrot.slane %v4249_v45, %v8541_v50  ;;  %v4472_v60 = vsel %vm1684_vm2, %v4345_v10, %v4336_v38 }
 0x5da   : > { %v4349_v53 = vrot.slane %v4246_v44, %v8534_v8 }
 0x5dc   : > { %v4255_v20 = vpop.permute.xlu0 %4254  ;;  %v4354_v9 = vsel %vm1547_vm1, %v4353_v35, %v4349_v53 }
 0x5dd   : > { %v4252_v24 = vpop.permute.xlu1 %4251  ;;  %v4362_v61 = vrot.slane %v4255_v20, %v8541_v50  ;;  %v4473_v15 = vsel %vm1686_vm3, %v4354_v9, %v4472_v60 }
 0x5de   : > { %v4358_v55 = vrot.slane %v4252_v24, %v8534_v8 }
 0x5e0   : > { %v4261_v27 = vpop.permute.xlu0 %4260  ;;  %v4363_v37 = vsel %vm1547_vm1, %v4362_v61, %v4358_v55 }
 0x5e1   : > { %v4258_v48 = vpop.permute.xlu1 %4257  ;;  %v4371_v23 = vrot.slane %v4261_v27, %v8541_v50  ;;  %v4474_v26 = vsel %vm1688_vm4, %v4363_v37, %v4473_v15 }
 0x5e2   : > { %v4367_v54 = vrot.slane %v4258_v48, %v8534_v8 }
 0x5e4   : > { %v4267_v58 = vpop.permute.xlu0 %4266  ;;  %v4372_v52 = vsel %vm1547_vm1, %v4371_v23, %v4367_v54 }
 0x5e5   : > { %v4264_v41 = vpop.permute.xlu1 %4263  ;;  %v4380_v63 = vrot.slane %v4267_v58, %v8541_v50  ;;  %v4475_v43 = vsel %vm1690_vm5, %v4372_v52, %v4474_v26 }
 0x5e6   : > { %v4376_v62 = vrot.slane %v4264_v41, %v8534_v8 }
 0x5e8   : > { %v4273_v29 = vpop.permute.xlu0 %4272  ;;  %v4381_v4 = vsel %vm1547_vm1, %v4380_v63, %v4376_v62 }
 0x5e9   : > { %v4270_v36 = vpop.permute.xlu1 %4269  ;;  %v4389_v42 = vrot.slane %v4273_v29, %v8541_v50  ;;  %v4476_v3 = vsel %vm1692_vm6, %v4381_v4, %v4475_v43 }
 0x5ea   : > { %v4385_v16 = vrot.slane %v4270_v36, %v8534_v8 }
 0x5ec   : > { %v4390_v47 = vsel %vm1547_vm1, %v4389_v42, %v4385_v16  ;;  %v4279_v7 = vpop.permute.xlu0 %4278 }
 0x5ed   : > { %v4276_v1 = vpop.permute.xlu1 %4275  ;;  %v4398_v12 = vrot.slane %v4279_v7, %v8541_v50  ;;  %v4477_v0 = vsel %vm1694_vm7, %v4390_v47, %v4476_v3 }
 0x5ee   : > { %v4394_v5 = vrot.slane %v4276_v1, %v8534_v8 }
 0x5f0   : > { %v4399_v56 = vsel %vm1547_vm1, %v4398_v12, %v4394_v5  ;;  %v4285_v17 = vpop.permute.xlu0 %4284 }
 0x5f1   : > { %v4282_v19 = vpop.permute.xlu1 %4281  ;;  %v4478_v51 = vsel %vm1696_vm8, %v4399_v56, %v4477_v0  ;;  %v4407_v54 = vrot.slane %v4285_v17, %v8541_v50 }
 0x5f2   : > { %v4488_v44 = vsel %vm345_vm0, %v4478_v51, 0.0  ;;  %v4403_v61 = vrot.slane %v4282_v19, %v8534_v8 }
 0x5f3   : > { %4489 = vadd.xlane.f32.xlu1 %v4488_v44 }
 0x5f4   : > { %v4291_v24 = vpop.permute.xlu0 %4290  ;;  %v4408_v42 = vsel %vm1547_vm1, %v4407_v54, %v4403_v61 }
 0x5f5   : > { %v4288_v45 = vpop.permute.xlu1 %4287  ;;  %v4416_v41 = vrot.slane %v4291_v24, %v8541_v50 }
 0x5f6   : > { %v4412_v35 = vrot.slane %v4288_v45, %v8534_v8 }
 0x5f8   : > { %v4297_v48 = vpop.permute.xlu0 %4296  ;;  %v4417_v9 = vsel %vm1547_vm1, %v4416_v41, %v4412_v35 }
 0x5f9   : > { %v4294_v20 = vpop.permute.xlu1 %4293  ;;  %v4425_v28 = vrot.slane %v4297_v48, %v8541_v50  ;;  %v4479_v4 = vsel %vm1684_vm2, %v4417_v9, %v4408_v42 }
 0x5fa   : > { %v4421_v58 = vrot.slane %v4294_v20, %v8534_v8 }
 0x5fc   : > { %v4303_v25 = vpop.permute.xlu0 %4302  ;;  %v4426_v38 = vsel %vm1547_vm1, %v4425_v28, %v4421_v58 }
 0x5fd   : > { %v4300_v27 = vpop.permute.xlu1 %4299  ;;  %v4434_v10 = vrot.slane %v4303_v25, %v8541_v50  ;;  %v4480_v47 = vsel %vm1686_vm3, %v4426_v38, %v4479_v4 }
 0x5fe   : > { %v4430_v23 = vrot.slane %v4300_v27, %v8534_v8 }
 0x600   : > { %v4309_v53 = vpop.permute.xlu0 %4308  ;;  %v4435_v60 = vsel %vm1547_vm1, %v4434_v10, %v4430_v23  ;;  %v11118_v23 = vld [vmem:[#allocation73_spill] sm:$0xff]  ;;  %v11119_v10 = vld [vmem:[#allocation68_spill] sm:$0xff] }
 0x601   : > { %v4306_v18 = vpop.permute.xlu1 %4305  ;;  %v4443_v63 = vrot.slane %v4309_v53, %v8541_v50  ;;  %v4481_v7 = vsel %vm1688_vm4, %v4435_v60, %v4480_v47  ;;  %v11123_v60 = vld [vmem:[#allocation90_spill] sm:$0xff] }
 0x602   : > { %v4439_v62 = vrot.slane %v4306_v18, %v8534_v8 }
 0x604   : > { %v4315_v55 = vpop.permute.xlu0 %4314  ;;  %v4444_v26 = vsel %vm1547_vm1, %v4443_v63, %v4439_v62 }
 0x605   : > { %v4312_v57 = vpop.permute.xlu1 %4311  ;;  %v4452_v29 = vrot.slane %v4315_v55, %v8541_v50  ;;  %v4482_v3 = vsel %vm1690_vm5, %v4444_v26, %v4481_v7  ;;  %v11124_v26 = vld [vmem:[#allocation85_spill] sm:$0xff] }
 0x606   : > { %v4448_v36 = vrot.slane %v4312_v57, %v8534_v8 }
 0x608   : > { %v4321_v16 = vpop.permute.xlu0 %4320  ;;  %v4453_v1 = vsel %vm1547_vm1, %v4452_v29, %v4448_v36  ;;  %v11121_v36 = vld [vmem:[#allocation70_spill] sm:$0xff] }
 0x609   : > { %v4318_v37 = vpop.permute.xlu1 %4317  ;;  %v4461_v15 = vrot.slane %v4321_v16, %v8541_v50  ;;  %v4483_v19 = vsel %vm1692_vm6, %v4453_v1, %v4482_v3  ;;  %v11122_v16 = vld [vmem:[#allocation72_spill] sm:$0xff]  ;;  %v11125_v1 = vld [vmem:[#allocation78_spill] sm:$0xff] }
 0x60a   : > { %v4457_v52 = vrot.slane %v4318_v37, %v8534_v8 }
 0x60c   : > { %v4462_v43 = vsel %vm1547_vm1, %v4461_v15, %v4457_v52  ;;  %v4327_v12 = vpop.permute.xlu0 %4326 }
 0x60d   : > { %v4324_v5 = vpop.permute.xlu1 %4323  ;;  %v4470_v0 = vrot.slane %v4327_v12, %v8541_v50  ;;  %v4484_v51 = vsel %vm1694_vm7, %v4462_v43, %v4483_v19  ;;  %v11126_v12 = vld [vmem:[#allocation79_spill] sm:$0xff] }
 0x60e   : > { %v4466_v56 = vrot.slane %v4324_v5, %v8534_v8 }
 0x610   : > { %v4471_v17 = vsel %vm1547_vm1, %v4470_v0, %v4466_v56  ;;  %v11127_v56 = vld [vmem:[#allocation88_spill] sm:$0xff] }
 0x611   : > { %v4485_v44 = vsel %vm1696_vm8, %v4471_v17, %v4484_v51  ;;  %v11128_v51 = vld [vmem:[#allocation83_spill] sm:$0xff] }
 0x612   : > { %v4491_v45 = vsel %vm345_vm0, %v4485_v44, 0.0 }
 0x613   : > { %4492 = vadd.xlane.f32.xlu0 %v4491_v45  ;;  %v11129_v45 = vld [vmem:[#allocation80_spill] sm:$0xff] }
 0x639   : > { %v9683_v9 = vpop.xlane.xlu0 %2183 }
 0x63a   : > { %v2222_v37 = vrot.slane %v9683_v9, %v10986_v22  ;;  %v2226_v4 = vrot.slane %v9683_v9, %v10987_v40  ;;  %v2230_v5 = vrot.slane %v9683_v9, %v10990_v34  ;;  %v2234_v17 = vrot.slane %v9683_v9, %v10993_v11 }
 0x63f   : > { %v2181_v24 = vpop.xlane.xlu1 %2180 }
 0x640   : > { %v2190_v20 = vrot.slane %v2181_v24, %v10986_v22  ;;  %v2194_v48 = vrot.slane %v2181_v24, %v10987_v40  ;;  %v2198_v27 = vrot.slane %v2181_v24, %v10990_v34  ;;  %v2202_v25 = vrot.slane %v2181_v24, %v10993_v11 }
 0x641   : > { %v2206_v53 = vrot.slane %v2181_v24, %v10996_v33  ;;  %v2210_v28 = vrot.slane %v2181_v24, %v11000_v31  ;;  %v2214_v54 = vrot.slane %v2181_v24, %v11003_v14  ;;  %v2218_v63 = vrot.slane %v2181_v24, %v11007_v32 }
 0x642   : > { %6778 = vrcp.f32 %v2190_v20 }
 0x643   : > { %6780 = vrcp.f32 %v2194_v48  ;;  %v2238_v48 = vrot.slane %v9683_v9, %v10996_v33 }
 0x644   : > { %6782 = vrcp.f32 %v2198_v27  ;;  %v11130_v27 = vld [vmem:[#allocation91_spill] sm:$0xff] }
 0x645   : > { %6784 = vrcp.f32 %v2202_v25 }
 0x646   : > { %6786 = vrcp.f32 %v2206_v53 }
 0x647   : > { %6788 = vrcp.f32 %v2210_v28 }
 0x648   : > { %6790 = vrcp.f32 %v2214_v54  ;;  %v2246_v54 = vrot.slane %v9683_v9, %v11003_v14 }
 0x649   : > { %6792 = vrcp.f32 %v2218_v63  ;;  %v2250_v63 = vrot.slane %v9683_v9, %v11007_v32 }
 0x64a   : > { %6794 = vrcp.f32 %v2222_v37  ;;  %v3335_v37 = vpop.xlane.xlu0 %3334 }
 0x64b   : > { %6796 = vrcp.f32 %v2226_v4 }
 0x64c   : > { %v6779_v18 = vpop.eup %6778  ;;  %6798 = vrcp.f32 %v2230_v5  ;;  %v11142_v5 = vld [vmem:[#allocation11_spill] sm:$0xff] }
 0x64d   : > { %v2269_v35 = vmul.f32 %v6779_v18, %v8891_v46  ;;  %v2268_v41 = vmul.f32 %v6779_v18, %v8889_v39  ;;  %v6781_v58 = vpop.eup %6780  ;;  %6800 = vrcp.f32 %v2234_v17  ;;  %v11131_v18 = vld [vmem:[#allocation82_spill] sm:$0xff]  ;;  %v11144_v17 = vld [vmem:[#allocation13_spill] sm:$0xff] }
 0x64e   : > { %v2271_v57 = vmul.f32 %v6781_v58, %v8902_v6  ;;  %v2272_v55 = vmul.f32 %v6781_v58, %v8900_v13  ;;  %v6783_v61 = vpop.eup %6782  ;;  %v11120_v6 = vld [vmem:[#allocation89_spill] sm:$0xff]  ;;  %6802 = vrcp.f32 %v2238_v48  ;;  %v3360_v48 = vrot.slane %v3335_v37, %v10996_v33 }
 0x64f   : > { %2351 = vperm.xlu1 %6515, %v2269_v35   ;;  %2348 = vperm.xlu0 %6514, %v2268_v41   ;;  %v2274_v46 = vmul.f32 %v6783_v61, %v11118_v23  ;;  %v2275_v39 = vmul.f32 %v6783_v61, %v11119_v10  ;;  %v6785_v62 = vpop.eup %6784  ;;  %v2242_v41 = vrot.slane %v9683_v9, %v11000_v31  ;;  %v11132_v58 = vld [vmem:[#allocation101_spill] sm:$0xff]  ;;  %v11134_v23 = vld [vmem:[#allocation106_spill] sm:$0xff]  ;;  %v11135_v10 = vld [vmem:[#allocation99_spill] sm:$0xff] }
 0x650   : > { %v2277_v13 = vmul.f32 %v6785_v62, %v11120_v6  ;;  %v2278_v29 = vmul.f32 %v6785_v62, %v11121_v36  ;;  %v6787_v38 = vpop.eup %6786  ;;  %v11136_v6 = vld [vmem:[#allocation93_spill] sm:$0xff]  ;;  %v11137_v36 = vld [vmem:[#allocation107_spill] sm:$0xff] }
 0x651   : > { %v2280_v42 = vmul.f32 %v6787_v38, %v11122_v16  ;;  %v2281_v52 = vmul.f32 %v6787_v38, %v11123_v60  ;;  %v6789_v15 = vpop.eup %6788  ;;  %6804 = vrcp.f32 %v2242_v41  ;;  %v11138_v16 = vld [vmem:[#allocation84_spill] sm:$0xff]  ;;  %v11148_v41 = vmov 1  }
 0x652   : > { %v2283_v47 = vmul.f32 %v6789_v15, %v11124_v26  ;;  %v2284_v7 = vmul.f32 %v6789_v15, %v11125_v1  ;;  %v6791_v43 = vpop.eup %6790  ;;  %6806 = vrcp.f32 %v2246_v54  ;;  %v11139_v60 = vld [vmem:[#allocation96_spill] sm:$0xff]  ;;  %v3344_v15 = vrot.slane %v3335_v37, %v10986_v22  ;;  %v11140_v26 = vld [vmem:[#allocation95_spill] sm:$0xff] }
 0x653   : > { %2354 = vperm.xlu1 %6515, %v2271_v57   ;;  %2357 = vperm.xlu0 %6514, %v2272_v55   ;;  %v2286_v3 = vmul.f32 %v6791_v43, %v11126_v12  ;;  %v2287_v0 = vmul.f32 %v6791_v43, %v11127_v56  ;;  %v6793_v19 = vpop.eup %6792  ;;  %v11133_v57 = vld [vmem:[#allocation94_spill] sm:$0xff]  ;;  %6808 = vrcp.f32 %v2250_v63 }
 0x654   : > { %v2289_v44 = vmul.f32 %v6793_v19, %v11128_v51  ;;  %v2290_v24 = vmul.f32 %v6793_v19, %v11129_v45  ;;  %v6795_v20 = vpop.eup %6794  ;;  %6810 = vrcp.f32 %v3344_v15  ;;  %v11155_v15 = vld [vmem:[#allocation111_spill] sm:$0xff] }
 0x655   : > { %v2293_v25 = vmul.f32 %v6795_v20, %v11130_v27  ;;  %v2292_v53 = vmul.f32 %v6795_v20, %v11131_v18  ;;  %v6797_v35 = vpop.eup %6796  ;;  %v11146_v27 = vld [vmem:[#allocation15_spill] sm:$0xff]  ;;  %v11147_v18 = vld [vmem:[#allocation14_spill] sm:$0xff] }
 0x656   : > { %v2296_v28 = vmul.f32 %v6797_v35, %v11132_v58  ;;  %v2295_v55 = vmul.f32 %v6797_v35, %v11133_v57  ;;  %v6799_v61 = vpop.eup %6798  ;;  %v3364_v58 = vrot.slane %v3335_v37, %v11000_v31 }
 0x657   : > { %2360 = vperm.xlu1 %6515, %v2274_v46   ;;  %2363 = vperm.xlu0 %6514, %v2275_v39   ;;  %v2299_v46 = vmul.f32 %v6799_v61, %v11134_v23  ;;  %v2298_v39 = vmul.f32 %v6799_v61, %v11135_v10  ;;  %v6801_v62 = vpop.eup %6800  ;;  %v3368_v23 = vrot.slane %v3335_v37, %v11003_v14 }
 0x658   : > { %v6803_v38 = vpop.eup %6802 }
 0x65b   : > { %2366 = vperm.xlu1 %6515, %v2277_v13   ;;  %2369 = vperm.xlu0 %6514, %v2278_v29   ;;  %v2302_v13 = vmul.f32 %v6801_v62, %v11136_v6  ;;  %v2301_v29 = vmul.f32 %v6801_v62, %v11137_v36  ;;  %v6805_v4 = vpop.eup %6804  ;;  %v3372_v6 = vrot.slane %v3335_v37, %v11007_v32 }
 0x65c   : > { %v2308_v9 = vmul.f32 %v6805_v4, %v11140_v26  ;;  %v6807_v43 = vpop.eup %6806 }
 0x65d   : > { %v2311_v12 = vmul.f32 %v6807_v43, %v11142_v5  ;;  %v6809_v19 = vpop.eup %6808  ;;  %v11158_v5 = vld [vmem:[#allocation116_spill] sm:$0xff] }
 0x65e   : > { %v2314_v51 = vmul.f32 %v6809_v19, %v11144_v17  ;;  %v6811_v20 = vpop.eup %6810  ;;  %v11160_v17 = vld [vmem:[#allocation118_spill] sm:$0xff] }
 0x65f   : > { %2372 = vperm.xlu1 %6515, %v2280_v42   ;;  %2375 = vperm.xlu0 %6514, %v2281_v52   ;;  %v2305_v42 = vmul.f32 %v6803_v38, %v11138_v16  ;;  %v2304_v52 = vmul.f32 %v6803_v38, %v11139_v60  ;;  %v11154_v60 = vld [vmem:[#allocation112_spill] sm:$0xff] }
 0x663   : > { %2378 = vperm.xlu1 %6515, %v2283_v47   ;;  %2381 = vperm.xlu0 %6514, %v2284_v7   ;;  %v11141_v47 = vld [vmem:[#allocation98_spill] sm:$0xff]  ;;  %v3348_v7 = vrot.slane %v3335_v37, %v10987_v40 }
 0x664   : > { %v2307_v1 = vmul.f32 %v6805_v4, %v11141_v47  ;;  %v11157_v47 = vld [vmem:[#allocation113_spill] sm:$0xff] }
 0x665   : > { %6812 = vrcp.f32 %v3348_v7 }
 0x667   : > { %2384 = vperm.xlu1 %6515, %v2286_v3   ;;  %2387 = vperm.xlu0 %6514, %v2287_v0   ;;  %v11143_v3 = vld [vmem:[#allocation100_spill] sm:$0xff]  ;;  %v3352_v0 = vrot.slane %v3335_v37, %v10990_v34 }
 0x668   : > { %v2310_v56 = vmul.f32 %v6807_v43, %v11143_v3  ;;  %v11159_v3 = vld [vmem:[#allocation115_spill] sm:$0xff] }
 0x669   : > { %6814 = vrcp.f32 %v3352_v0 }
 0x66b   : > { %2390 = vperm.xlu1 %6515, %v2289_v44   ;;  %2393 = vperm.xlu0 %6514, %v2290_v24   ;;  %v11145_v44 = vld [vmem:[#allocation12_spill] sm:$0xff]  ;;  %v3356_v24 = vrot.slane %v3335_v37, %v10993_v11  ;;  %v11156_v37 = vld [vmem:[#allocation114_spill] sm:$0xff] }
 0x66c   : > { %v2313_v45 = vmul.f32 %v6809_v19, %v11145_v44  ;;  %v11161_v44 = vld [vmem:[#allocation117_spill] sm:$0xff] }
 0x66d   : > { %6816 = vrcp.f32 %v3356_v24 }
 0x66e   : > { %6818 = vrcp.f32 %v3360_v48  ;;  %v11162_v48 = vld [vmem:[#allocation120_spill] sm:$0xff] }
 0x66f   : > { %2399 = vperm.xlu0 %6514, %v2293_v25   ;;  %2396 = vperm.xlu1 %6515, %v2292_v53   ;;  %v3423_v25 = vmul.f32 %v6811_v20, %v11146_v27  ;;  %v3422_v53 = vmul.f32 %v6811_v20, %v11147_v18  ;;  %v6813_v35 = vpop.eup %6812  ;;  %6820 = vrcp.f32 %v3364_v58  ;;  %v11164_v58 = vld [vmem:[#allocation121_spill] sm:$0xff] }
 0x670   : > { %6822 = vrcp.f32 %v3368_v23 }
 0x671   : > { %6824 = vrcp.f32 %v3372_v6 }
 0x673   : > { %2405 = vperm.xlu0 %6514, %v2296_v28   ;;  %2402 = vperm.xlu1 %6515, %v2295_v55   ;;  %v11149_v28 = vld [vmem:[#allocation17_spill] sm:$0xff]  ;;  %v11150_v55 = vld [vmem:[#allocation16_spill] sm:$0xff]  ;;  %v6815_v54 = vpop.eup %6814 }
 0x674   : > { %v3426_v57 = vmul.f32 %v6813_v35, %v11149_v28  ;;  %v3425_v61 = vmul.f32 %v6813_v35, %v11150_v55 }
 0x677   : > { %2411 = vperm.xlu0 %6514, %v2299_v46   ;;  %2408 = vperm.xlu1 %6515, %v2298_v39   ;;  %v11151_v46 = vld [vmem:[#allocation109_spill] sm:$0xff]  ;;  %v11152_v39 = vld [vmem:[#allocation108_spill] sm:$0xff]  ;;  %v6817_v63 = vpop.eup %6816 }
 0x678   : > { %v3429_v10 = vmul.f32 %v6815_v54, %v11151_v46  ;;  %v3428_v62 = vmul.f32 %v6815_v54, %v11152_v39  ;;  %v3432_v36 = vmul.f32 %v6817_v63, %v9089_v30  ;;  %v6819_v16 = vpop.eup %6818  ;;  %v11165_v54 = vld [vmem:[#allocation122_spill] sm:$0xff]  ;;  %v11166_v39 = vld [vmem:[#allocation123_spill] sm:$0xff] }
 0x679   : > { %v3434_v4 = vmul.f32 %v6819_v16, %v11155_v15  ;;  %v6821_v26 = vpop.eup %6820 }
 0x67a   : > { %v6823_v7 = vpop.eup %6822 }
 0x67b   : > { %2417 = vperm.xlu0 %6514, %v2302_v13   ;;  %2414 = vperm.xlu1 %6515, %v2301_v29   ;;  %v9743_v13 = vpop.xlane.xlu1 %3337  ;;  %v11153_v29 = vld [vmem:[#allocation110_spill] sm:$0xff]  ;;  %v6825_v0 = vpop.eup %6824 }
 0x67c   : > { %v3431_v38 = vmul.f32 %v6817_v63, %v11153_v29  ;;  %v3380_v30 = vrot.slane %v9743_v13, %v10987_v40  ;;  %v3384_v43 = vrot.slane %v9743_v13, %v10990_v34  ;;  %v3388_v19 = vrot.slane %v9743_v13, %v10993_v11 }
 0x67d   : > { %v3392_v20 = vrot.slane %v9743_v13, %v10996_v33  ;;  %v3396_v35 = vrot.slane %v9743_v13, %v11000_v31  ;;  %v3400_v55 = vrot.slane %v9743_v13, %v11003_v14 }
 0x67f   : > { %2423 = vperm.xlu0 %6514, %v2305_v42   ;;  %2420 = vperm.xlu1 %6515, %v2304_v52   ;;  %v3376_v42 = vrot.slane %v9743_v13, %v10986_v22  ;;  %v3435_v52 = vmul.f32 %v6819_v16, %v11154_v60 }
 0x680   : > { %v9779_v6 = vpop.xlane.xlu1 %4489 }
 0x681   : > { %6826 = vrcp.f32 %v3376_v42  ;;  %v11169_v42 = vld [vmem:[#allocation125_spill] sm:$0xff] }
 0x682   : > { %6828 = vrcp.f32 %v3380_v30 }
 0x683   : > { %2429 = vperm.xlu0 %6514, %v2308_v9   ;;  %2426 = vperm.xlu1 %6515, %v2307_v1   ;;  %v3438_v9 = vmul.f32 %v6821_v26, %v11156_v37  ;;  %v3437_v1 = vmul.f32 %v6821_v26, %v11157_v47  ;;  %6830 = vrcp.f32 %v3384_v43  ;;  %v11171_v26 = vld [vmem:[#allocation127_spill] sm:$0xff]  ;;  %v4507_v37 = vrot.slane %v9779_v6, %v10990_v34  ;;  %v11173_v43 = vld [vmem:[#allocation129_spill] sm:$0xff] }
 0x684   : > { %6832 = vrcp.f32 %v3388_v19  ;;  %v4515_v19 = vrot.slane %v9779_v6, %v10996_v33 }
 0x685   : > { %6834 = vrcp.f32 %v3392_v20 }
 0x686   : > { %6836 = vrcp.f32 %v3396_v35  ;;  %v11178_v35 = vld [vmem:[#allocation134_spill] sm:$0xff] }
 0x687   : > { %2435 = vperm.xlu0 %6514, %v2311_v12   ;;  %2432 = vperm.xlu1 %6515, %v2310_v56   ;;  %v3441_v12 = vmul.f32 %v6823_v7, %v11158_v5  ;;  %v3440_v56 = vmul.f32 %v6823_v7, %v11159_v3  ;;  %6838 = vrcp.f32 %v3400_v55 }
 0x68b   : > { %2441 = vperm.xlu0 %6514, %v2314_v51   ;;  %2438 = vperm.xlu1 %6515, %v2313_v45   ;;  %v3444_v51 = vmul.f32 %v6825_v0, %v11160_v17  ;;  %v3443_v45 = vmul.f32 %v6825_v0, %v11161_v44  ;;  %v6827_v24 = vpop.eup %6826  ;;  %v11174_v17 = vld [vmem:[#allocation132_spill] sm:$0xff]  ;;  %v11175_v44 = vld [vmem:[#allocation131_spill] sm:$0xff] }
 0x68c   : > { %v3447_v27 = vmul.f32 %v6827_v24, %v11162_v48  ;;  %v11176_v48 = vmov 2  }
 0x68f   : > { %6516 = vset.pattern.permute.xlu0 %v11148_v41  ;;  %6517 = vset.pattern.permute.xlu1 %v11148_v41 }
 0x690   : > { %3505 = vperm.xlu1 %6517, %v3423_v25   ;;  %3502 = vperm.xlu0 %6516, %v3422_v53   ;;  %v11163_v25 = vld [vmem:[#allocation119_spill] sm:$0xff]  ;;  %v6829_v53 = vpop.eup %6828 }
 0x691   : > { %v3446_v18 = vmul.f32 %v6827_v24, %v11163_v25  ;;  %v3450_v41 = vmul.f32 %v6829_v53, %v9149_v49  ;;  %v3449_v28 = vmul.f32 %v6829_v53, %v11164_v58  ;;  %v3404_v49 = vrot.slane %v9743_v13, %v11007_v32  ;;  %v11168_v13 = vld [vmem:[#allocation126_spill] sm:$0xff] }
 0x692   : > { %v4519_v24 = vrot.slane %v9779_v6, %v11000_v31  ;;  %v4523_v58 = vrot.slane %v9779_v6, %v11003_v14 }
 0x693   : > { %6840 = vrcp.f32 %v3404_v49 }
 0x694   : > { %3511 = vperm.xlu1 %6517, %v3426_v57   ;;  %3508 = vperm.xlu0 %6516, %v3425_v61   ;;  %v6831_v57 = vpop.eup %6830 }
 0x695   : > { %v3453_v61 = vmul.f32 %v6831_v57, %v9161_v2  ;;  %v3452_v23 = vmul.f32 %v6831_v57, %v11165_v54  ;;  %v6833_v46 = vpop.eup %6832 }
 0x696   : > { %v6835_v63 = vpop.eup %6834 }
 0x697   : > { %v3459_v2 = vmul.f32 %v6835_v63, %v9181_v59  ;;  %v6837_v16 = vpop.eup %6836  ;;  %v11170_v59 = vld [vmem:[#allocation128_spill] sm:$0xff] }
 0x698   : > { %3517 = vperm.xlu1 %6517, %v3429_v10   ;;  %3514 = vperm.xlu0 %6516, %v3428_v62   ;;  %v3456_v10 = vmul.f32 %v6833_v46, %v9171_v21  ;;  %v3455_v62 = vmul.f32 %v6833_v46, %v11166_v39  ;;  %v3462_v21 = vmul.f32 %v6837_v16, %v11168_v13  ;;  %v6839_v15 = vpop.eup %6838 }
 0x699   : > { %v3461_v60 = vmul.f32 %v6837_v16, %v11169_v42  ;;  %v3464_v30 = vmul.f32 %v6839_v15, %v11171_v26 }
 0x69c   : > { %3523 = vperm.xlu1 %6517, %v3432_v36   ;;  %3520 = vperm.xlu0 %6516, %v3431_v38   ;;  %v11167_v36 = vld [vmem:[#allocation124_spill] sm:$0xff]  ;;  %v4499_v38 = vrot.slane %v9779_v6, %v10986_v22 }
 0x69d   : > { %v3458_v29 = vmul.f32 %v6835_v63, %v11167_v36  ;;  %v11181_v63 = vld [vmem:[#allocation137_spill] sm:$0xff]  ;;  %v11182_v36 = vld [vmem:[#allocation138_spill] sm:$0xff] }
 0x69e   : > { %6842 = vrcp.f32 %v4499_v38 }
 0x6a0   : > { %3529 = vperm.xlu1 %6517, %v3435_v52   ;;  %3526 = vperm.xlu0 %6516, %v3434_v4   ;;  %v4503_v52 = vrot.slane %v9779_v6, %v10987_v40  ;;  %v3465_v4 = vmul.f32 %v6839_v15, %v11170_v59  ;;  %v9793_v47 = vpop.xlane.xlu0 %4492  ;;  %v11185_v59 = vld [vmem:[#allocation141_spill] sm:$0xff] }
 0x6a1   : > { %v4531_v42 = vrot.slane %v9793_v47, %v10986_v22 }
 0x6a2   : > { %6844 = vrcp.f32 %v4503_v52  ;;  %v11184_v52 = vld [vmem:[#allocation140_spill] sm:$0xff] }
 0x6a3   : > { %6846 = vrcp.f32 %v4507_v37 }
 0x6a4   : > { %3535 = vperm.xlu1 %6517, %v3438_v9   ;;  %3532 = vperm.xlu0 %6516, %v3437_v1   ;;  %v6841_v9 = vpop.eup %6840  ;;  %v11172_v1 = vld [vmem:[#allocation130_spill] sm:$0xff] }
 0x6a5   : > { %v3468_v7 = vmul.f32 %v6841_v9, %v11172_v1  ;;  %v3467_v5 = vmul.f32 %v6841_v9, %v11173_v43  ;;  %v11186_v9 = vld [vmem:[#allocation142_spill] sm:$0xff] }
 0x6a8   : > { %3541 = vperm.xlu1 %6517, %v3441_v12   ;;  %3538 = vperm.xlu0 %6516, %v3440_v56   ;;  %v4511_v12 = vrot.slane %v9779_v6, %v10993_v11  ;;  %v6843_v3 = vpop.eup %6842 }
 0x6aa   : > { %6848 = vrcp.f32 %v4511_v12 }
 0x6ab   : > { %6850 = vrcp.f32 %v4515_v19 }
 0x6ac   : > { %3547 = vperm.xlu1 %6517, %v3444_v51   ;;  %3544 = vperm.xlu0 %6516, %v3443_v45   ;;  %v4578_v51 = vmul.f32 %v6843_v3, %v11174_v17  ;;  %v4577_v45 = vmul.f32 %v6843_v3, %v11175_v44  ;;  %v6845_v20 = vpop.eup %6844  ;;  %6852 = vrcp.f32 %v4519_v24  ;;  %v4535_v3 = vrot.slane %v9793_v47, %v10987_v40 }
 0x6ad   : > { %6854 = vrcp.f32 %v4523_v58 }
 0x6b0   : > { %3553 = vperm.xlu1 %6517, %v3447_v27   ;;  %3550 = vperm.xlu0 %6516, %v3446_v18   ;;  %v11177_v18 = vld [vmem:[#allocation133_spill] sm:$0xff] }
 0x6b1   : > { %v4580_v53 = vmul.f32 %v6845_v20, %v11177_v18 }
 0x6b4   : > { %3559 = vperm.xlu1 %6517, %v3450_v41   ;;  %3556 = vperm.xlu0 %6516, %v3449_v28   ;;  %v4581_v41 = vmul.f32 %v6845_v20, %v11178_v35  ;;  %v6847_v28 = vpop.eup %6846  ;;  %v11187_v20 = vld [vmem:[#allocation143_spill] sm:$0xff] }
 0x6b5   : > { %v6849_v49 = vpop.eup %6848 }
 0x6b6   : > { %v6851_v38 = vpop.eup %6850 }
 0x6b7   : > { %v6853_v16 = vpop.eup %6852  ;;  %v4590_v15 = vmul.f32 %v6851_v38, %v11184_v52 }
 0x6b8   : > { %3565 = vperm.xlu1 %6517, %v3453_v61   ;;  %3562 = vperm.xlu0 %6516, %v3452_v23   ;;  %v11179_v61 = vld [vmem:[#allocation135_spill] sm:$0xff]  ;;  %v11180_v23 = vld [vmem:[#allocation136_spill] sm:$0xff]  ;;  %v6855_v26 = vpop.eup %6854  ;;  %v4593_v1 = vmul.f32 %v6853_v16, %v11186_v9 }
 0x6b9   : > { %v4583_v54 = vmul.f32 %v6847_v28, %v11179_v61  ;;  %v4584_v46 = vmul.f32 %v6847_v28, %v11180_v23  ;;  %v4539_v28 = vrot.slane %v9793_v47, %v10990_v34  ;;  %v11191_v9 = vld [vmem:[#allocation148_spill] sm:$0xff] }
 0x6bc   : > { %3571 = vperm.xlu1 %6517, %v3456_v10   ;;  %3568 = vperm.xlu0 %6516, %v3455_v62   ;;  %v4527_v10 = vrot.slane %v9779_v6, %v11007_v32 }
 0x6be   : > { %6856 = vrcp.f32 %v4527_v10 }
 0x6bf   : > { %6858 = vrcp.f32 %v4531_v42  ;;  %v11190_v42 = vld [vmem:[#allocation146_spill] sm:$0xff] }
 0x6c0   : > { %3577 = vperm.xlu1 %6517, %v3459_v2   ;;  %3574 = vperm.xlu0 %6516, %v3458_v29   ;;  %v4586_v2 = vmul.f32 %v6849_v49, %v11181_v63  ;;  %v4587_v29 = vmul.f32 %v6849_v49, %v11182_v36  ;;  %6860 = vrcp.f32 %v4535_v3 }
 0x6c1   : > { %6862 = vrcp.f32 %v4539_v28  ;;  %v11197_v28 = vld [vmem:[#allocation154_spill] sm:$0xff] }
 0x6c4   : > { %3583 = vperm.xlu1 %6517, %v3462_v21   ;;  %3580 = vperm.xlu0 %6516, %v3461_v60   ;;  %v11183_v60 = vld [vmem:[#allocation139_spill] sm:$0xff] }
 0x6c5   : > { %v4589_v6 = vmul.f32 %v6851_v38, %v11183_v60  ;;  %v4543_v38 = vrot.slane %v9793_v47, %v10993_v11 }
 0x6c7   : > { %6864 = vrcp.f32 %v4543_v38 }
 0x6c8   : > { %3589 = vperm.xlu1 %6517, %v3465_v4   ;;  %3586 = vperm.xlu0 %6516, %v3464_v30   ;;  %v4592_v4 = vmul.f32 %v6853_v16, %v11185_v59 }
 0x6cc   : > { %3595 = vperm.xlu1 %6517, %v3468_v7   ;;  %3592 = vperm.xlu0 %6516, %v3467_v5  }
 0x6ce   : > { %v9799_v56 = vpop.permute.xlu1 %2351  ;;  %v9801_v0 = vpop.permute.xlu0 %2348 }
 0x6cf   : > { %v2450_v19 = vrot.slane %v9799_v56, %v8541_v50  ;;  %v2446_v17 = vrot.slane %v9801_v0, %v8534_v8  ;;  %v6857_v56 = vpop.eup %6856 }
 0x6d0   : > { %6519 = vset.pattern.permute.xlu1 %v11176_v48  ;;  %6518 = vset.pattern.permute.xlu0 %v11176_v48  ;;  %v4595_v48 = vmul.f32 %v6855_v26, %v11187_v20  ;;  %v4599_v60 = vmul.f32 %v6857_v56, %v11190_v42  ;;  %v4555_v20 = vrot.slane %v9793_v47, %v11003_v14  ;;  %v11202_v42 = vld [vmem:[#allocation157_spill] sm:$0xff] }
 0x6d1   : > { %4660 = vperm.xlu1 %6519, %v4578_v51   ;;  %4657 = vperm.xlu0 %6518, %v4577_v45  }
 0x6d2   : > { %v2355_v27 = vpop.permute.xlu1 %2354  ;;  %v2358_v25 = vpop.permute.xlu0 %2357 }
 0x6d3   : > { %v2455_v30 = vrot.slane %v2355_v27, %v8534_v8  ;;  %v2459_v37 = vrot.slane %v2358_v25, %v8541_v50 }
 0x6d5   : > { %4663 = vperm.xlu1 %6519, %v4580_v53   ;;  %4666 = vperm.xlu0 %6518, %v4581_v41   ;;  %v2460_v27 = vsel %vm1547_vm1, %v2459_v37, %v2455_v30  ;;  %v11188_v41 = vld [vmem:[#allocation144_spill] sm:$0xff]  ;;  %v4547_v37 = vrot.slane %v9793_v47, %v10996_v33 }
 0x6d6   : > { %v2361_v57 = vpop.permute.xlu1 %2360  ;;  %v2364_v55 = vpop.permute.xlu0 %2363  ;;  %v4596_v58 = vmul.f32 %v6855_v26, %v11188_v41 }
 0x6d7   : > { %v2464_v7 = vrot.slane %v2361_v57, %v8534_v8  ;;  %v2468_v43 = vrot.slane %v2364_v55, %v8541_v50  ;;  %v2451_v57 = vsel %vm1547_vm1, %v2450_v19, %v2446_v17  ;;  %6866 = vrcp.f32 %v4547_v37  ;;  %v11193_v17 = vld [vmem:[#allocation150_spill] sm:$0xff] }
 0x6d8   : > { %v2587_v23 = vsel %vm1684_vm2, %v2460_v27, %v2451_v57 }
 0x6d9   : > { %4669 = vperm.xlu1 %6519, %v4583_v54   ;;  %4672 = vperm.xlu0 %6518, %v4584_v46   ;;  %v2469_v0 = vsel %vm1547_vm1, %v2468_v43, %v2464_v7  ;;  %v11192_v7 = vld [vmem:[#allocation147_spill] sm:$0xff] }
 0x6da   : > { %v2367_v39 = vpop.permute.xlu1 %2366  ;;  %v2370_v62 = vpop.permute.xlu0 %2369  ;;  %v2588_v49 = vsel %vm1686_vm3, %v2469_v0, %v2587_v23 }
 0x6db   : > { %v2473_v51 = vrot.slane %v2367_v39, %v8534_v8  ;;  %v2477_v44 = vrot.slane %v2370_v62, %v8541_v50  ;;  %v11189_v39 = vld [vmem:[#allocation145_spill] sm:$0xff] }
 0x6dc   : > { %v4598_v62 = vmul.f32 %v6857_v56, %v11189_v39  ;;  %v11196_v56 = vld [vmem:[#allocation151_spill] sm:$0xff] }
 0x6dd   : > { %4675 = vperm.xlu1 %6519, %v4586_v2   ;;  %4678 = vperm.xlu0 %6518, %v4587_v29   ;;  %v2478_v55 = vsel %vm1547_vm1, %v2477_v44, %v2473_v51  ;;  %v11194_v44 = vld [vmem:[#allocation149_spill] sm:$0xff] }
 0x6de   : > { %v2373_v13 = vpop.permute.xlu1 %2372  ;;  %v2376_v21 = vpop.permute.xlu0 %2375  ;;  %v2589_v63 = vsel %vm1688_vm4, %v2478_v55, %v2588_v49  ;;  %v11198_v55 = vld [vmem:[#allocation153_spill] sm:$0xff] }
 0x6df   : > { %v2482_v45 = vrot.slane %v2373_v13, %v8534_v8  ;;  %v2486_v24 = vrot.slane %v2376_v21, %v8541_v50 }
 0x6e1   : > { %4681 = vperm.xlu1 %6519, %v4589_v6   ;;  %4684 = vperm.xlu0 %6518, %v4590_v15   ;;  %v2487_v46 = vsel %vm1547_vm1, %v2486_v24, %v2482_v45  ;;  %v6859_v6 = vpop.eup %6858 }
 0x6e2   : > { %v2379_v5 = vpop.permute.xlu1 %2378  ;;  %v2382_v12 = vpop.permute.xlu0 %2381  ;;  %v2590_v16 = vsel %vm1690_vm5, %v2487_v46, %v2589_v63  ;;  %v4601_v43 = vmul.f32 %v6859_v6, %v11192_v7 }
 0x6e3   : > { %v2491_v25 = vrot.slane %v2379_v5, %v8534_v8  ;;  %v2495_v18 = vrot.slane %v2382_v12, %v8541_v50  ;;  %v6861_v5 = vpop.eup %6860  ;;  %v4551_v12 = vrot.slane %v9793_v47, %v11000_v31 }
 0x6e4   : > { %v4605_v51 = vmul.f32 %v6861_v5, %v11193_v17  ;;  %v4604_v45 = vmul.f32 %v6861_v5, %v11194_v44  ;;  %v6863_v24 = vpop.eup %6862 }
 0x6e5   : > { %4687 = vperm.xlu1 %6519, %v4592_v4   ;;  %4690 = vperm.xlu0 %6518, %v4593_v1   ;;  %v2496_v10 = vsel %vm1547_vm1, %v2495_v18, %v2491_v25  ;;  %v4602_v1 = vmul.f32 %v6859_v6, %v11191_v9  ;;  %6868 = vrcp.f32 %v4551_v12  ;;  %v11195_v25 = vld [vmem:[#allocation152_spill] sm:$0xff]  ;;  %v4607_v0 = vmul.f32 %v6863_v24, %v11196_v56 }
 0x6e6   : > { %v2385_v53 = vpop.permute.xlu1 %2384  ;;  %v2388_v35 = vpop.permute.xlu0 %2387  ;;  %v2591_v52 = vsel %vm1692_vm6, %v2496_v10, %v2590_v16  ;;  %v4608_v18 = vmul.f32 %v6863_v24, %v11195_v25  ;;  %6870 = vrcp.f32 %v4555_v20  ;;  %v11199_v10 = vld [vmem:[#allocation156_spill] sm:$0xff] }
 0x6e7   : > { %v2500_v61 = vrot.slane %v2385_v53, %v8534_v8  ;;  %v2504_v54 = vrot.slane %v2388_v35, %v8541_v50  ;;  %v6865_v53 = vpop.eup %6864  ;;  %v4559_v35 = vrot.slane %v9793_v47, %v11007_v32  ;;  %v11203_v12 = vld [vmem:[#allocation160_spill] sm:$0xff] }
 0x6e8   : > { %v4611_v57 = vmul.f32 %v6865_v53, %v11197_v28 }
 0x6e9   : > { %4693 = vperm.xlu1 %6519, %v4595_v48   ;;  %4696 = vperm.xlu0 %6518, %v4596_v58   ;;  %v2505_v2 = vsel %vm1547_vm1, %v2504_v54, %v2500_v61  ;;  %v4610_v61 = vmul.f32 %v6865_v53, %v11198_v55  ;;  %v6867_v54 = vpop.eup %6866  ;;  %6872 = vrcp.f32 %v4559_v35 }
 0x6ea   : > { %v2391_v36 = vpop.permute.xlu1 %2390  ;;  %v2394_v29 = vpop.permute.xlu0 %2393  ;;  %v2592_v15 = vsel %vm1694_vm7, %v2505_v2, %v2591_v52  ;;  %v4614_v39 = vmul.f32 %v6867_v54, %v11199_v10 }
 0x6eb   : > { %v2509_v13 = vrot.slane %v2391_v36, %v8534_v8  ;;  %v2513_v21 = vrot.slane %v2394_v29, %v8541_v50 }
 0x6ed   : > { %v2514_v59 = vsel %vm1547_vm1, %v2513_v21, %v2509_v13  ;;  %4699 = vperm.xlu1 %6519, %v4598_v62   ;;  %4702 = vperm.xlu0 %6518, %v4599_v60   ;;  %v11200_v62 = vld [vmem:[#allocation155_spill] sm:$0xff]  ;;  %v11201_v13 = vld [vmem:[#allocation158_spill] sm:$0xff] }
 0x6ee   : > { %v2593_v4 = vsel %vm1696_vm8, %v2514_v59, %v2592_v15  ;;  %v9871_v26 = vpop.permute.xlu1 %2396  ;;  %v9873_v30 = vpop.permute.xlu0 %2399  ;;  %v4613_v63 = vmul.f32 %v6867_v54, %v11200_v62 }
 0x6ef   : > { %2603 = vst.msk [vmem:[%s9877_s12] sm:$0xff] %vm345_vm0, %v2593_v4  ;;  %v6869_v49 = vpop.eup %6868  ;;  %v2518_v52 = vrot.slane %v9871_v26, %v8534_v8  ;;  %v2522_v15 = vrot.slane %v9873_v30, %v8541_v50 }
 0x6f0   : > { %v4617_v21 = vmul.f32 %v6869_v49, %v11201_v13  ;;  %v4616_v60 = vmul.f32 %v6869_v49, %v11202_v42  ;;  %v6871_v6 = vpop.eup %6870  ;;  %v11210_v13 = vld [vmem:[#allocation40_spill] sm:$0xff]  ;;  %v11211_v42 = vld [vmem:[#allocation41_spill] sm:$0xff] }
 0x6f1   : > { %4708 = vperm.xlu0 %6518, %v4602_v1   ;;  %4705 = vperm.xlu1 %6519, %v4601_v43   ;;  %v2523_v44 = vsel %vm1547_vm1, %v2522_v15, %v2518_v52  ;;  %v11213_v15 = vld [vmem:[#allocation47_spill] sm:$0xff] }
 0x6f2   : > { %v2403_v3 = vpop.permute.xlu1 %2402  ;;  %v2406_v19 = vpop.permute.xlu0 %2405 }
 0x6f3   : > { %v2527_v2 = vrot.slane %v2403_v3, %v8534_v8  ;;  %v2531_v47 = vrot.slane %v2406_v19, %v8541_v50  ;;  %v4620_v3 = vmul.f32 %v6871_v6, %v11203_v12  ;;  %v11204_v19 = vld [vmem:[#allocation159_spill] sm:$0xff] }
 0x6f4   : > { %v4619_v17 = vmul.f32 %v6871_v6, %v11204_v19  ;;  %v11212_v6 = vld [vmem:[#allocation44_spill] sm:$0xff] }
 0x6f5   : > { %4714 = vperm.xlu0 %6518, %v4605_v51   ;;  %4711 = vperm.xlu1 %6519, %v4604_v45   ;;  %v2532_v1 = vsel %vm1547_vm1, %v2531_v47, %v2527_v2  ;;  %v6873_v51 = vpop.eup %6872  ;;  %v5027_v52 = vrot.slane %v11212_v6, %v8541_v50 }
 0x6f6   : > { %v2409_v48 = vpop.permute.xlu1 %2408  ;;  %v2412_v27 = vpop.permute.xlu0 %2411 }
 0x6f7   : > { %v2536_v36 = vrot.slane %v2409_v48, %v8534_v8  ;;  %v2540_v29 = vrot.slane %v2412_v27, %v8541_v50  ;;  %v2594_v48 = vsel %vm1684_vm2, %v2532_v1, %v2523_v44  ;;  %v11219_v44 = vld [vmem:[#allocation63_spill] sm:$0xff] }
 0x6f9   : > { %4720 = vperm.xlu0 %6518, %v4608_v18   ;;  %4717 = vperm.xlu1 %6519, %v4607_v0   ;;  %v2541_v26 = vsel %vm1547_vm1, %v2540_v29, %v2536_v36  ;;  %v11208_v36 = vld [vmem:[#allocation48_spill] sm:$0xff] }
 0x6fa   : > { %v2415_v41 = vpop.permute.xlu1 %2414  ;;  %v2418_v58 = vpop.permute.xlu0 %2417  ;;  %v2595_v25 = vsel %vm1686_vm3, %v2541_v26, %v2594_v48  ;;  %v5023_v29 = vrot.slane %v11208_v36, %v8534_v8  ;;  %v11216_v26 = vld [vmem:[#allocation39_spill] sm:$0xff]  ;;  %v11220_v48 = vld [vmem:[#allocation76_spill] sm:$0xff] }
 0x6fb   : > { %v2545_v59 = vrot.slane %v2415_v41, %v8534_v8  ;;  %v2549_v4 = vrot.slane %v2418_v58, %v8541_v50  ;;  %v11205_v41 = vld [vmem:[#allocation162_spill] sm:$0xff] }
 0x6fc   : > { %v4623_v58 = vmul.f32 %v6873_v51, %v11205_v41 }
 0x6fd   : > { %4726 = vperm.xlu0 %6518, %v4611_v57   ;;  %4723 = vperm.xlu1 %6519, %v4610_v61   ;;  %v2550_v45 = vsel %vm1547_vm1, %v2549_v4, %v2545_v59  ;;  %v11206_v61 = vld [vmem:[#allocation161_spill] sm:$0xff]  ;;  %v5099_v59 = vrot.slane %v11213_v15, %v8541_v50  ;;  %v11214_v4 = vld [vmem:[#allocation56_spill] sm:$0xff] }
 0x6fe   : > { %v2421_v23 = vpop.permute.xlu1 %2420  ;;  %v2424_v46 = vpop.permute.xlu0 %2423  ;;  %v2596_v56 = vsel %vm1688_vm4, %v2550_v45, %v2595_v25  ;;  %v4622_v54 = vmul.f32 %v6873_v51, %v11206_v61  ;;  %v5041_v45 = vrot.slane %v11219_v44, %v8534_v8  ;;  %v11221_v25 = vld [vmem:[#allocation52_spill] sm:$0xff]  ;;  %v11224_v61 = vld [vmem:[#allocation69_spill] sm:$0xff] }
 0x6ff   : > { %v2554_v37 = vrot.slane %v2421_v23, %v8534_v8  ;;  %v2558_v9 = vrot.slane %v2424_v46, %v8541_v50 }
 0x701   : > { %4732 = vperm.xlu0 %6518, %v4614_v39   ;;  %4729 = vperm.xlu1 %6519, %v4613_v63   ;;  %v2559_v27 = vsel %vm1547_vm1, %v2558_v9, %v2554_v37  ;;  %v11207_v63 = vmov 3   ;;  %v5032_v37 = vrot.slane %v11214_v4, %v8534_v8  ;;  %v11231_v4 = vld [vmem:[#allocation97_spill] sm:$0xff] }
 0x702   : > { %v2427_v38 = vpop.permute.xlu1 %2426  ;;  %v2430_v16 = vpop.permute.xlu0 %2429  ;;  %v2597_v28 = vsel %vm1690_vm5, %v2559_v27, %v2596_v56  ;;  %v5050_v27 = vrot.slane %v11220_v48, %v8534_v8 }
 0x703   : > { %v2563_v7 = vrot.slane %v2427_v38, %v8534_v8  ;;  %v2567_v43 = vrot.slane %v2430_v16, %v8541_v50  ;;  %v11209_v38 = vld [vmem:[#allocation50_spill] sm:$0xff] }
 0x704   : > { %v5095_v16 = vrot.slane %v11209_v38, %v8534_v8 }
 0x705   : > { %4738 = vperm.xlu0 %6518, %v4617_v21   ;;  %4735 = vperm.xlu1 %6519, %v4616_v60   ;;  %v2568_v18 = vsel %vm1547_vm1, %v2567_v43, %v2563_v7  ;;  %v5014_v21 = vrot.slane %v11210_v13, %v8534_v8  ;;  %v5086_v60 = vrot.slane %v11211_v42, %v8534_v8  ;;  %v11215_v7 = vld [vmem:[#allocation37_spill] sm:$0xff]  ;;  %v11228_v13 = vld [vmem:[#allocation60_spill] sm:$0xff] }
 0x706   : > { %v2433_v5 = vpop.permute.xlu1 %2432  ;;  %v2436_v30 = vpop.permute.xlu0 %2435  ;;  %v2598_v23 = vsel %vm1692_vm6, %v2568_v18, %v2597_v28  ;;  %v5018_v43 = vrot.slane %v11215_v7, %v8541_v50  ;;  %v5100_v12 = vsel %vm1547_vm1, %v5099_v59, %v5095_v16  ;;  %v5108_v18 = vrot.slane %v11221_v25, %v8541_v50  ;;  %v11232_v7 = vld [vmem:[#allocation71_spill] sm:$0xff] }
 0x707   : > { %v2572_v24 = vrot.slane %v2433_v5, %v8534_v8  ;;  %v2576_v20 = vrot.slane %v2436_v30, %v8541_v50  ;;  %v5090_v5 = vrot.slane %v11216_v26, %v8541_v50  ;;  %v5028_v30 = vsel %vm1547_vm1, %v5027_v52, %v5023_v29  ;;  %v11227_v29 = vld [vmem:[#allocation87_spill] sm:$0xff]  ;;  %v11230_v52 = vld [vmem:[#allocation74_spill] sm:$0xff] }
 0x708   : > { %v5063_v38 = vrot.slane %v11227_v29, %v8541_v50  ;;  %v5126_v15 = vrot.slane %v11230_v52, %v8541_v50  ;;  %v11239_v29 = vld [vmem:[#allocation67_spill] sm:$0xff] }
 0x709   : > { %4744 = vperm.xlu0 %6518, %v4620_v3   ;;  %4741 = vperm.xlu1 %6519, %v4619_v17   ;;  %v2577_v0 = vsel %vm1547_vm1, %v2576_v20, %v2572_v24  ;;  %v11217_v3 = vld [vmem:[#allocation54_spill] sm:$0xff]  ;;  %v5019_v24 = vsel %vm1547_vm1, %v5018_v43, %v5014_v21  ;;  %v5091_v20 = vsel %vm1547_vm1, %v5090_v5, %v5086_v60  ;;  %v11229_v60 = vld [vmem:[#allocation104_spill] sm:$0xff] }
 0x70a   : > { %v2439_v53 = vpop.permute.xlu1 %2438  ;;  %v2442_v35 = vpop.permute.xlu0 %2441  ;;  %v2599_v46 = vsel %vm1694_vm7, %v2577_v0, %v2598_v23  ;;  %v5036_v19 = vrot.slane %v11217_v3, %v8541_v50  ;;  %v11218_v17 = vld [vmem:[#allocation58_spill] sm:$0xff]  ;;  %v11225_v23 = vld [vmem:[#allocation75_spill] sm:$0xff]  ;;  %v5117_v21 = vrot.slane %v11228_v13, %v8541_v50  ;;  %v5068_v6 = vrot.slane %v11229_v60, %v8534_v8 }
 0x70b   : > { %v2581_v57 = vrot.slane %v2439_v53, %v8534_v8  ;;  %v2585_v55 = vrot.slane %v2442_v35, %v8541_v50  ;;  %v5104_v51 = vrot.slane %v11218_v17, %v8534_v8  ;;  %v11222_v0 = vld [vmem:[#allocation62_spill] sm:$0xff]  ;;  %v11223_v35 = vld [vmem:[#allocation92_spill] sm:$0xff]  ;;  %v5077_v43 = vrot.slane %v11232_v7, %v8534_v8 }
 0x70c   : > { %v5037_v56 = vsel %vm1547_vm1, %v5036_v19, %v5032_v37  ;;  %v5045_v53 = vrot.slane %v11222_v0, %v8541_v50  ;;  %v5059_v41 = vrot.slane %v11223_v35, %v8534_v8  ;;  %v5131_v37 = vrot.slane %v11231_v4, %v8534_v8  ;;  %v11233_v19 = vld [vmem:[#allocation102_spill] sm:$0xff] }
 0x70d   : > { %v2586_v49 = vsel %vm1547_vm1, %v2585_v55, %v2581_v57  ;;  %4750 = vperm.xlu0 %6518, %v4623_v58   ;;  %4747 = vperm.xlu1 %6519, %v4622_v54   ;;  %v5155_v57 = vsel %vm1684_vm2, %v5028_v30, %v5019_v24  ;;  %v5162_v55 = vsel %vm1684_vm2, %v5100_v12, %v5091_v20  ;;  %v11235_v20 = vld [vmem:[#allocation65_spill] sm:$0xff] }
 0x70e   : > { %v2600_v10 = vsel %vm1696_vm8, %v2586_v49, %v2599_v46  ;;  %v5113_v54 = vrot.slane %v11224_v61, %v8534_v8  ;;  %v5054_v46 = vrot.slane %v11225_v23, %v8541_v50  ;;  %v5109_v49 = vsel %vm1547_vm1, %v5108_v18, %v5104_v51  ;;  %v11236_v23 = vld [vmem:[#allocation105_spill] sm:$0xff] }
 0x70f   : > { %2604 = vst.msk [vmem:[%s9877_s12 + $0x8] sm:$0xff] %vm345_vm0, %v2600_v10  ;;  %v9938_v39 = vpop.permute.xlu1 %3505  ;;  %v9940_v62 = vpop.permute.xlu0 %3502  ;;  %v5046_v10 = vsel %vm1547_vm1, %v5045_v53, %v5041_v45  ;;  %v5156_v16 = vsel %vm1686_vm3, %v5037_v56, %v5155_v57  ;;  %v5064_v59 = vsel %vm1547_vm1, %v5063_v38, %v5059_v41  ;;  %v5163_v30 = vsel %vm1686_vm3, %v5109_v49, %v5162_v55  ;;  %v11234_v45 = vld [vmem:[#allocation86_spill] sm:$0xff] }
 0x710   : > { %v5055_v42 = vsel %vm1547_vm1, %v5054_v46, %v5050_v27  ;;  %v5157_v12 = vsel %vm1688_vm4, %v5046_v10, %v5156_v16  ;;  %v5118_v3 = vsel %vm1547_vm1, %v5117_v21, %v5113_v54  ;;  %v5072_v17 = vrot.slane %v11233_v19, %v8541_v50  ;;  %v11237_v10 = vld [vmem:[#allocation77_spill] sm:$0xff] }
 0x711   : > { %6520 = vset.pattern.permute.xlu0 %v11207_v63  ;;  %6521 = vset.pattern.permute.xlu1 %v11207_v63  ;;  %v11226_v63 = vld [vmem:[#allocation81_spill] sm:$0xff]  ;;  %v5158_v51 = vsel %vm1690_vm5, %v5055_v42, %v5157_v12  ;;  %v5135_v24 = vrot.slane %v11234_v45, %v8541_v50  ;;  %v5081_v48 = vrot.slane %v11235_v20, %v8541_v50 }
 0x712   : > { %v5122_v36 = vrot.slane %v11226_v63, %v8534_v8  ;;  %v5073_v27 = vsel %vm1547_vm1, %v5072_v17, %v5068_v6  ;;  %v5159_v56 = vsel %vm1692_vm6, %v5064_v59, %v5158_v51  ;;  %v5149_v63 = vrot.slane %v11237_v10, %v8534_v8 }
 0x713   : > { %v9944_v2 = vpop.permute.xlu1 %3511  ;;  %v9946_v47 = vpop.permute.xlu0 %3508  ;;  %v5136_v0 = vsel %vm1547_vm1, %v5135_v24, %v5131_v37  ;;  %v5082_v55 = vsel %vm1547_vm1, %v5081_v48, %v5077_v43  ;;  %v5160_v49 = vsel %vm1694_vm7, %v5073_v27, %v5159_v56  ;;  %v5153_v38 = vrot.slane %v11239_v29, %v8541_v50 }
 0x714   : > { %v5127_v44 = vsel %vm1547_vm1, %v5126_v15, %v5122_v36  ;;  %v3613_v25 = vrot.slane %v9944_v2, %v8541_v50  ;;  %v3609_v18 = vrot.slane %v9946_v47, %v8534_v8  ;;  %v3604_v2 = vrot.slane %v9938_v39, %v8541_v50 }
 0x715   : > { %v3600_v47 = vrot.slane %v9940_v62, %v8534_v8  ;;  %v5161_v42 = vsel %vm1696_vm8, %v5082_v55, %v5160_v49  ;;  %v5164_v59 = vsel %vm1688_vm4, %v5118_v3, %v5163_v30  ;;  %v5154_v12 = vsel %vm1547_vm1, %v5153_v38, %v5149_v63 }
 0x716   : > { %v3614_v39 = vsel %vm1547_vm1, %v3613_v25, %v3609_v18  ;;  %v5165_v43 = vsel %vm1690_vm5, %v5127_v44, %v5164_v59  ;;  %v5171_v3 = vsel %vm345_vm0, %v5161_v42, -inf }
 0x717   : > { %v9962_v9 = vpop.permute.xlu1 %3517  ;;  %v9964_v1 = vpop.permute.xlu0 %3514  ;;  %v3605_v60 = vsel %vm1547_vm1, %v3604_v2, %v3600_v47  ;;  %v5166_v45 = vsel %vm1692_vm6, %v5136_v0, %v5165_v43 }
 0x718   : > { %v3622_v53 = vrot.slane %v9962_v9, %v8541_v50  ;;  %v3618_v35 = vrot.slane %v9964_v1, %v8534_v8  ;;  %v5140_v9 = vrot.slane %v11236_v23, %v8534_v8  ;;  %v3741_v37 = vsel %vm1684_vm2, %v3614_v39, %v3605_v60 }
 0x71a   : > { %v3623_v16 = vsel %vm1547_vm1, %v3622_v53, %v3618_v35 }
 0x71b   : > { %v3524_v58 = vpop.permute.xlu1 %3523  ;;  %v3521_v28 = vpop.permute.xlu0 %3520 }
 0x71c   : > { %v3631_v61 = vrot.slane %v3524_v58, %v8541_v50  ;;  %v3627_v54 = vrot.slane %v3521_v28, %v8534_v8  ;;  %v11238_v28 = vld [vmem:[#allocation103_spill] sm:$0xff] }
 0x71d   : > { %v5144_v36 = vrot.slane %v11238_v28, %v8541_v50 }
 0x71e   : > { %v3632_v6 = vsel %vm1547_vm1, %v3631_v61, %v3627_v54 }
 0x71f   : > { %v3530_v26 = vpop.permute.xlu1 %3529  ;;  %v3527_v5 = vpop.permute.xlu0 %3526  ;;  %v5145_v4 = vsel %vm1547_vm1, %v5144_v36, %v5140_v9 }
 0x720   : > { %v3640_v46 = vrot.slane %v3530_v26, %v8541_v50  ;;  %v3636_v1 = vrot.slane %v3527_v5, %v8534_v8  ;;  %v3742_v26 = vsel %vm1686_vm3, %v3623_v16, %v3741_v37  ;;  %v5167_v48 = vsel %vm1694_vm7, %v5145_v4, %v5166_v45 }
 0x721   : > { %v3743_v19 = vsel %vm1688_vm4, %v3632_v6, %v3742_v26  ;;  %v5168_v25 = vsel %vm1696_vm8, %v5154_v12, %v5167_v48 }
 0x722   : > { %v3641_v7 = vsel %vm1547_vm1, %v3640_v46, %v3636_v1 }
 0x723   : > { %v3536_v41 = vpop.permute.xlu1 %3535  ;;  %v3533_v57 = vpop.permute.xlu0 %3532  ;;  %v3744_v24 = vsel %vm1690_vm5, %v3641_v7, %v3743_v19 }
 0x724   : > { %v3649_v62 = vrot.slane %v3536_v41, %v8541_v50  ;;  %v3645_v58 = vrot.slane %v3533_v57, %v8534_v8  ;;  %v5174_v41 = vsel %vm345_vm0, %v5168_v25, -inf }
 0x726   : > { %v3650_v5 = vsel %vm1547_vm1, %v3649_v62, %v3645_v58 }
 0x727   : > { %v3542_v13 = vpop.permute.xlu1 %3541  ;;  %v3539_v21 = vpop.permute.xlu0 %3538  ;;  %v3745_v27 = vsel %vm1692_vm6, %v3650_v5, %v3744_v24 }
 0x728   : > { %v3658_v52 = vrot.slane %v3542_v13, %v8541_v50  ;;  %v3654_v15 = vrot.slane %v3539_v21, %v8534_v8 }
 0x72a   : > { %v3659_v17 = vsel %vm1547_vm1, %v3658_v52, %v3654_v15 }
 0x72b   : > { %v3548_v51 = vpop.permute.xlu1 %3547  ;;  %v3545_v30 = vpop.permute.xlu0 %3544  ;;  %v3746_v18 = vsel %vm1694_vm7, %v3659_v17, %v3745_v27 }
 0x72c   : > { %v3667_v44 = vrot.slane %v3548_v51, %v8541_v50  ;;  %v3663_v20 = vrot.slane %v3545_v30, %v8534_v8  ;;  %5172 = vmax.xlane.f32.xlu0 %v5171_v3 }
 0x72e   : > { %v3668_v56 = vsel %vm1547_vm1, %v3667_v44, %v3663_v20 }
 0x72f   : > { %v3747_v53 = vsel %vm1696_vm8, %v3668_v56, %v3746_v18  ;;  %v3554_v0 = vpop.permute.xlu1 %3553  ;;  %v3551_v35 = vpop.permute.xlu0 %3550 }
 0x730   : > { %6247 = vst.msk [vmem:[%s9877_s12 + $0x10] sm:$0xff] %vm345_vm0, %v3747_v53  ;;  %v3676_v62 = vrot.slane %v3554_v0, %v8541_v50  ;;  %v3672_v58 = vrot.slane %v3551_v35, %v8534_v8 }
 0x731   : > { %5175 = vmax.xlane.f32.xlu1 %v5174_v41 }
 0x732   : > { %v3677_v52 = vsel %vm1547_vm1, %v3676_v62, %v3672_v58 }
 0x733   : > { %v3560_v57 = vpop.permute.xlu1 %3559  ;;  %v3557_v55 = vpop.permute.xlu0 %3556 }
 0x734   : > { %v3685_v46 = vrot.slane %v3560_v57, %v8541_v50  ;;  %v3681_v1 = vrot.slane %v3557_v55, %v8534_v8 }
 0x736   : > { %v3686_v16 = vsel %vm1547_vm1, %v3685_v46, %v3681_v1 }
 0x737   : > { %v3566_v2 = vpop.permute.xlu1 %3565  ;;  %v3563_v47 = vpop.permute.xlu0 %3562  ;;  %v3748_v37 = vsel %vm1684_vm2, %v3686_v16, %v3677_v52 }
 0x738   : > { %v3694_v49 = vrot.slane %v3566_v2, %v8541_v50  ;;  %v3690_v10 = vrot.slane %v3563_v47, %v8534_v8 }
 0x73a   : > { %v3695_v42 = vsel %vm1547_vm1, %v3694_v49, %v3690_v10 }
 0x73b   : > { %v3572_v61 = vpop.permute.xlu1 %3571  ;;  %v3569_v54 = vpop.permute.xlu0 %3568  ;;  %v3749_v43 = vsel %vm1686_vm3, %v3695_v42, %v3748_v37 }
 0x73c   : > { %v3703_v28 = vrot.slane %v3572_v61, %v8541_v50  ;;  %v3699_v36 = vrot.slane %v3569_v54, %v8534_v8 }
 0x73e   : > { %v3704_v15 = vsel %vm1547_vm1, %v3703_v28, %v3699_v36 }
 0x73f   : > { %v3578_v23 = vpop.permute.xlu1 %3577  ;;  %v3575_v9 = vpop.permute.xlu0 %3574  ;;  %v3750_v5 = vsel %vm1688_vm4, %v3704_v15, %v3749_v43 }
 0x740   : > { %v3712_v29 = vrot.slane %v3578_v23, %v8541_v50  ;;  %v3708_v38 = vrot.slane %v3575_v9, %v8534_v8 }
 0x742   : > { %v3713_v7 = vsel %vm1547_vm1, %v3712_v29, %v3708_v38 }
 0x743   : > { %v3584_v63 = vpop.permute.xlu1 %3583  ;;  %v3581_v39 = vpop.permute.xlu0 %3580  ;;  %v3751_v51 = vsel %vm1690_vm5, %v3713_v7, %v3750_v5 }
 0x744   : > { %v3721_v13 = vrot.slane %v3584_v63, %v8541_v50  ;;  %v3717_v21 = vrot.slane %v3581_v39, %v8534_v8 }
 0x746   : > { %v3722_v26 = vsel %vm1547_vm1, %v3721_v13, %v3717_v21 }
 0x747   : > { %v3590_v60 = vpop.permute.xlu1 %3589  ;;  %v3587_v6 = vpop.permute.xlu0 %3586  ;;  %v3752_v45 = vsel %vm1692_vm6, %v3722_v26, %v3751_v51 }
 0x748   : > { %v3730_v59 = vrot.slane %v3590_v60, %v8541_v50  ;;  %v3726_v4 = vrot.slane %v3587_v6, %v8534_v8 }
 0x74a   : > { %v3731_v12 = vsel %vm1547_vm1, %v3730_v59, %v3726_v4 }
 0x74b   : > { %v3596_v19 = vpop.permute.xlu1 %3595  ;;  %v3593_v17 = vpop.permute.xlu0 %3592  ;;  %v3753_v24 = vsel %vm1694_vm7, %v3731_v12, %v3752_v45 }
 0x74c   : > { %v3739_v30 = vrot.slane %v3596_v19, %v8541_v50  ;;  %v3735_v3 = vrot.slane %v3593_v17, %v8534_v8 }
 0x74e   : > { %v3740_v44 = vsel %vm1547_vm1, %v3739_v30, %v3735_v3 }
 0x74f   : > { %v3754_v20 = vsel %vm1696_vm8, %v3740_v44, %v3753_v24 }
 0x750   : > { %6248 = vst.msk [vmem:[%s9877_s12 + $0x18] sm:$0xff] %vm345_vm0, %v3754_v20  ;;  %v4661_v48 = vpop.permute.xlu1 %4660  ;;  %v4658_v27 = vpop.permute.xlu0 %4657 }
 0x751   : > { %v4759_v9 = vrot.slane %v4661_v48, %v8541_v50  ;;  %v4755_v46 = vrot.slane %v4658_v27, %v8534_v8 }
 0x753   : > { %v4760_v38 = vsel %vm1547_vm1, %v4759_v9, %v4755_v46 }
 0x754   : > { %v4664_v25 = vpop.permute.xlu1 %4663  ;;  %v4667_v18 = vpop.permute.xlu0 %4666 }
 0x755   : > { %v4764_v55 = vrot.slane %v4664_v25, %v8534_v8  ;;  %v4768_v2 = vrot.slane %v4667_v18, %v8541_v50 }
 0x757   : > { %v4769_v39 = vsel %vm1547_vm1, %v4768_v2, %v4764_v55 }
 0x758   : > { %v4670_v56 = vpop.permute.xlu1 %4669  ;;  %v4673_v53 = vpop.permute.xlu0 %4672  ;;  %v4896_v42 = vsel %vm1684_vm2, %v4769_v39, %v4760_v38 }
 0x759   : > { %v4773_v47 = vrot.slane %v4670_v56, %v8534_v8  ;;  %v4777_v61 = vrot.slane %v4673_v53, %v8541_v50 }
 0x75b   : > { %v4778_v28 = vsel %vm1547_vm1, %v4777_v61, %v4773_v47 }
 0x75c   : > { %v4676_v0 = vpop.permute.xlu1 %4675  ;;  %v4679_v35 = vpop.permute.xlu0 %4678  ;;  %v4897_v6 = vsel %vm1686_vm3, %v4778_v28, %v4896_v42 }
 0x75d   : > { %v4782_v1 = vrot.slane %v4676_v0, %v8534_v8  ;;  %v4786_v49 = vrot.slane %v4679_v35, %v8541_v50 }
 0x75f   : > { %v4787_v16 = vsel %vm1547_vm1, %v4786_v49, %v4782_v1 }
 0x760   : > { %v4682_v41 = vpop.permute.xlu1 %4681  ;;  %v4685_v57 = vpop.permute.xlu0 %4684  ;;  %v4898_v15 = vsel %vm1688_vm4, %v4787_v16, %v4897_v6 }
 0x761   : > { %v4791_v10 = vrot.slane %v4682_v41, %v8534_v8  ;;  %v4795_v63 = vrot.slane %v4685_v57, %v8541_v50 }
 0x763   : > { %v4796_v60 = vsel %vm1547_vm1, %v4795_v63, %v4791_v10 }
 0x764   : > { %v4688_v54 = vpop.permute.xlu1 %4687  ;;  %v4691_v23 = vpop.permute.xlu0 %4690  ;;  %v4899_v7 = vsel %vm1690_vm5, %v4796_v60, %v4898_v15 }
 0x765   : > { %v4800_v62 = vrot.slane %v4688_v54, %v8534_v8  ;;  %v4804_v58 = vrot.slane %v4691_v23, %v8541_v50 }
 0x767   : > { %v4805_v52 = vsel %vm1547_vm1, %v4804_v58, %v4800_v62 }
 0x768   : > { %v4694_v36 = vpop.permute.xlu1 %4693  ;;  %v4697_v29 = vpop.permute.xlu0 %4696  ;;  %v4900_v5 = vsel %vm1692_vm6, %v4805_v52, %v4899_v7 }
 0x769   : > { %v4809_v13 = vrot.slane %v4694_v36, %v8534_v8  ;;  %v4813_v21 = vrot.slane %v4697_v29, %v8541_v50 }
 0x76b   : > { %v4814_v59 = vsel %vm1547_vm1, %v4813_v21, %v4809_v13 }
 0x76c   : > { %v4700_v4 = vpop.permute.xlu1 %4699  ;;  %v4703_v37 = vpop.permute.xlu0 %4702  ;;  %v4901_v12 = vsel %vm1694_vm7, %v4814_v59, %v4900_v5  ;;  %v11240_v5 = vld [vmem:[#allocation22_spill] sm:$0xff] }
 0x76d   : > { %v4818_v43 = vrot.slane %v4700_v4, %v8534_v8  ;;  %v4822_v26 = vrot.slane %v4703_v37, %v8541_v50 }
 0x76f   : > { %v4823_v19 = vsel %vm1547_vm1, %v4822_v26, %v4818_v43 }
 0x770   : > { %v4902_v17 = vsel %vm1696_vm8, %v4823_v19, %v4901_v12  ;;  %v4706_v51 = vpop.permute.xlu1 %4705  ;;  %v4709_v30 = vpop.permute.xlu0 %4708  ;;  %v11241_v19 = vld [vmem:[#allocation19_spill] sm:$0xff] }
 0x771   : > { %6249 = vst.msk [vmem:[%s9877_s12 + $0x20] sm:$0xff] %vm345_vm0, %v4902_v17  ;;  %v4827_v57 = vrot.slane %v4706_v51, %v8534_v8  ;;  %v4831_v55 = vrot.slane %v4709_v30, %v8541_v50  ;;  %v11242_v30 = vld [vmem:[#allocation26_spill] sm:$0xff] }
 0x773   : > { %v4832_v63 = vsel %vm1547_vm1, %v4831_v55, %v4827_v57 }
 0x774   : > { %v4712_v3 = vpop.permute.xlu1 %4711  ;;  %v4715_v45 = vpop.permute.xlu0 %4714 }
 0x775   : > { %v4836_v18 = vrot.slane %v4712_v3, %v8534_v8  ;;  %v4840_v56 = vrot.slane %v4715_v45, %v8541_v50  ;;  %v11243_v45 = vld [vmem:[#allocation24_spill] sm:$0xff] }
 0x777   : > { %v4841_v23 = vsel %vm1547_vm1, %v4840_v56, %v4836_v18  ;;  %v11245_v56 = vld [vmem:[#allocation28_spill] sm:$0xff] }
 0x778   : > { %v4718_v24 = vpop.permute.xlu1 %4717  ;;  %v4721_v44 = vpop.permute.xlu0 %4720  ;;  %v4903_v28 = vsel %vm1684_vm2, %v4841_v23, %v4832_v63  ;;  %v11248_v23 = vld [vmem:[#allocation42_spill] sm:$0xff] }
 0x779   : > { %v4845_v53 = vrot.slane %v4718_v24, %v8534_v8  ;;  %v4849_v0 = vrot.slane %v4721_v44, %v8541_v50 }
 0x77b   : > { %v4850_v1 = vsel %vm1547_vm1, %v4849_v0, %v4845_v53 }
 0x77c   : > { %v4724_v20 = vpop.permute.xlu1 %4723  ;;  %v4727_v48 = vpop.permute.xlu0 %4726  ;;  %v4904_v29 = vsel %vm1686_vm3, %v4850_v1, %v4903_v28  ;;  %v11249_v1 = vld [vmem:[#allocation36_spill] sm:$0xff] }
 0x77d   : > { %v4854_v2 = vrot.slane %v4724_v20, %v8534_v8  ;;  %v4858_v47 = vrot.slane %v4727_v48, %v8541_v50 }
 0x77f   : > { %v4859_v39 = vsel %vm1547_vm1, %v4858_v47, %v4854_v2  ;;  %v11247_v2 = vld [vmem:[#allocation32_spill] sm:$0xff] }
 0x780   : > { %v4730_v27 = vpop.permute.xlu1 %4729  ;;  %v4733_v25 = vpop.permute.xlu0 %4732  ;;  %v4905_v16 = vsel %vm1688_vm4, %v4859_v39, %v4904_v29  ;;  %v11251_v29 = vld [vmem:[#allocation45_spill] sm:$0xff] }
 0x781   : > { %v4863_v61 = vrot.slane %v4730_v27, %v8534_v8  ;;  %v4867_v54 = vrot.slane %v4733_v25, %v8541_v50  ;;  %v11244_v27 = vld [vmem:[#allocation30_spill] sm:$0xff] }
 0x783   : > { %v4868_v36 = vsel %vm1547_vm1, %v4867_v54, %v4863_v61 }
 0x784   : > { %v4736_v35 = vpop.permute.xlu1 %4735  ;;  %v4739_v41 = vpop.permute.xlu0 %4738  ;;  %v4906_v60 = vsel %vm1690_vm5, %v4868_v36, %v4905_v16 }
 0x785   : > { %v4872_v9 = vrot.slane %v4736_v35, %v8534_v8  ;;  %v4876_v46 = vrot.slane %v4739_v41, %v8541_v50  ;;  %v11246_v41 = vld [vmem:[#allocation34_spill] sm:$0xff] }
 0x787   : > { %v4877_v38 = vsel %vm1547_vm1, %v4876_v46, %v4872_v9 }
 0x788   : > { %v4742_v49 = vpop.permute.xlu1 %4741  ;;  %v4745_v10 = vpop.permute.xlu0 %4744  ;;  %v4907_v15 = vsel %vm1692_vm6, %v4877_v38, %v4906_v60  ;;  %v11252_v60 = vld [vmem:[#allocation57_spill] sm:$0xff] }
 0x789   : > { %v4881_v62 = vrot.slane %v4742_v49, %v8534_v8  ;;  %v4885_v58 = vrot.slane %v4745_v10, %v8541_v50 }
 0x78b   : > { %v4886_v13 = vsel %vm1547_vm1, %v4885_v58, %v4881_v62  ;;  %v11250_v58 = vld [vmem:[#allocation49_spill] sm:$0xff] }
 0x78c   : > { %v4748_v21 = vpop.permute.xlu1 %4747  ;;  %v4751_v42 = vpop.permute.xlu0 %4750  ;;  %v4908_v59 = vsel %vm1694_vm7, %v4886_v13, %v4907_v15 }
 0x78d   : > { %v4890_v6 = vrot.slane %v4748_v21, %v8534_v8  ;;  %v4894_v52 = vrot.slane %v4751_v42, %v8541_v50 }
 0x78f   : > { %v4895_v4 = vsel %vm1547_vm1, %v4894_v52, %v4890_v6 }
 0x790   : > { %v4909_v37 = vsel %vm1696_vm8, %v4895_v4, %v4908_v59  ;;  %v11253_v59 = vld [vmem:[#allocation53_spill] sm:$0xff] }
 0x791   : > { %6250 = vst.msk [vmem:[%s9877_s12 + $0x28] sm:$0xff] %vm345_vm0, %v4909_v37 }
 0x7b9   : > { %v10186_v7 = vpop.xlane.xlu0 %5172 }
 0x7ba   : > { %v5182_v43 = vrot.slane %v10186_v7, %v10986_v22  ;;  %v5186_v26 = vrot.slane %v10186_v7, %v10987_v40  ;;  %v5190_v51 = vrot.slane %v10186_v7, %v10990_v34  ;;  %v5194_v48 = vrot.slane %v10186_v7, %v10993_v11 }
 0x7bb   : > { %v5198_v35 = vrot.slane %v10186_v7, %v10996_v33  ;;  %v5202_v54 = vrot.slane %v10186_v7, %v11000_v31  ;;  %v5206_v62 = vrot.slane %v10186_v7, %v11003_v14 }
 0x7bc   : > { %v5259_v12 = vsub.f32 %v11240_v5, %v5182_v43  ;;  %v5260_v17 = vsub.f32 %v11241_v19, %v5182_v43  ;;  %v5261_v3 = vsub.f32 %v11242_v30, %v5186_v26  ;;  %v5262_v24 = vsub.f32 %v11243_v45, %v5186_v26  ;;  %v11254_v19 = vld [vmem:[#allocation21_spill] sm:$0xff]  ;;  %v11255_v30 = vld [vmem:[#allocation20_spill] sm:$0xff] }
 0x7bd   : > { %v5263_v25 = vsub.f32 %v11244_v27, %v5190_v51  ;;  %v5264_v53 = vsub.f32 %v11245_v56, %v5190_v51  ;;  %v5265_v57 = vsub.f32 %v11246_v41, %v5194_v48  ;;  %v5266_v47 = vsub.f32 %v11247_v2, %v5194_v48  ;;  %v11258_v41 = vld [vmem:[#allocation31_spill] sm:$0xff]  ;;  %v11259_v2 = vld [vmem:[#allocation29_spill] sm:$0xff] }
 0x7be   : > { %v5291_v44 = vmul.f32 1.442695, %v5259_v12  ;;  %v5293_v20 = vmul.f32 1.442695, %v5260_v17  ;;  %v5295_v18 = vmul.f32 1.442695, %v5261_v3  ;;  %v5267_v9 = vsub.f32 %v11248_v23, %v5198_v35  ;;  %v10220_v13 = vpop.xlane.xlu1 %5175 }
 0x7bf   : > { %v5297_v0 = vmul.f32 1.442695, %v5262_v24  ;;  %v5299_v55 = vmul.f32 1.442695, %v5263_v25  ;;  %v5301_v61 = vmul.f32 1.442695, %v5264_v53  ;;  %v5268_v49 = vsub.f32 %v11249_v1, %v5198_v35 }
 0x7c0   : > { %6874 = vpow2.f32 %v5291_v44  ;;  %v5303_v46 = vmul.f32 1.442695, %v5265_v57  ;;  %v5305_v10 = vmul.f32 1.442695, %v5266_v47  ;;  %v5269_v28 = vsub.f32 %v11250_v58, %v5202_v54  ;;  %v11257_v25 = vld [vmem:[#allocation25_spill] sm:$0xff] }
 0x7c1   : > { %6876 = vpow2.f32 %v5293_v20  ;;  %v5307_v36 = vmul.f32 1.442695, %v5267_v9  ;;  %v5270_v38 = vsub.f32 %v11251_v29, %v5202_v54  ;;  %v5309_v16 = vmul.f32 1.442695, %v5268_v49  ;;  %v11256_v20 = vld [vmem:[#allocation27_spill] sm:$0xff] }
 0x7c2   : > { %6878 = vpow2.f32 %v5295_v18  ;;  %v5271_v6 = vsub.f32 %v11252_v60, %v5206_v62  ;;  %v5311_v52 = vmul.f32 1.442695, %v5269_v28  ;;  %v5214_v15 = vrot.slane %v10220_v13, %v10986_v22 }
 0x7c3   : > { %6880 = vpow2.f32 %v5297_v0  ;;  %v5272_v4 = vsub.f32 %v11253_v59, %v5206_v62  ;;  %v5313_v37 = vmul.f32 1.442695, %v5270_v38  ;;  %v5218_v12 = vrot.slane %v10220_v13, %v10987_v40  ;;  %v11263_v38 = vld [vmem:[#allocation43_spill] sm:$0xff] }
 0x7c4   : > { %6882 = vpow2.f32 %v5299_v55  ;;  %v5315_v5 = vmul.f32 1.442695, %v5271_v6  ;;  %v5275_v17 = vsub.f32 %v11254_v19, %v5214_v15  ;;  %v5276_v3 = vsub.f32 %v11255_v30, %v5214_v15  ;;  %v11264_v6 = vld [vmem:[#allocation38_spill] sm:$0xff] }
 0x7c5   : > { %6884 = vpow2.f32 %v5301_v61  ;;  %v5317_v51 = vmul.f32 1.442695, %v5272_v4  ;;  %v5222_v44 = vrot.slane %v10220_v13, %v10990_v34  ;;  %v5277_v48 = vsub.f32 %v11256_v20, %v5218_v12 }
 0x7c6   : > { %6886 = vpow2.f32 %v5303_v46  ;;  %v5323_v27 = vmul.f32 1.442695, %v5275_v17  ;;  %v5278_v18 = vsub.f32 %v11257_v25, %v5218_v12  ;;  %v5325_v56 = vmul.f32 1.442695, %v5276_v3  ;;  %v11260_v46 = vld [vmem:[#allocation35_spill] sm:$0xff]  ;;  %v11266_v17 = vld [vmem:[#allocation46_spill] sm:$0xff] }
 0x7c7   : > { %6888 = vpow2.f32 %v5305_v10  ;;  %v5226_v35 = vrot.slane %v10220_v13, %v10993_v11  ;;  %v5279_v57 = vsub.f32 %v11258_v41, %v5222_v44  ;;  %v5327_v55 = vmul.f32 1.442695, %v5277_v48  ;;  %v11261_v10 = vld [vmem:[#allocation33_spill] sm:$0xff]  ;;  %v11267_v48 = vld [vmem:[#allocation23_spill] sm:$0xff] }
 0x7c8   : > { %6890 = vpow2.f32 %v5307_v36  ;;  %v5280_v47 = vsub.f32 %v11259_v2, %v5222_v44  ;;  %v5329_v61 = vmul.f32 1.442695, %v5278_v18  ;;  %v5230_v9 = vrot.slane %v10220_v13, %v10996_v33  ;;  %v11268_v18 = vld [vmem:[#allocation55_spill] sm:$0xff] }
 0x7c9   : > { %6892 = vpow2.f32 %v5309_v16  ;;  %v5281_v1 = vsub.f32 %v11260_v46, %v5226_v35  ;;  %v5331_v49 = vmul.f32 1.442695, %v5279_v57  ;;  %v5282_v62 = vsub.f32 %v11261_v10, %v5226_v35 }
 0x7ca   : > { %v10210_v63 = vpop.eup %6874  ;;  %6894 = vpow2.f32 %v5311_v52  ;;  %v5333_v58 = vmul.f32 1.442695, %v5280_v47  ;;  %v5234_v29 = vrot.slane %v10220_v13, %v11000_v31  ;;  %v5283_v16 = vsub.f32 %v11263_v38, %v5230_v9 }
 0x7cb   : > { %v10212_v39 = vpop.eup %6876  ;;  %5388 = vperm.xlu0 %6520, %v10210_v63   ;;  %6896 = vpow2.f32 %v5313_v37  ;;  %v5335_v60 = vmul.f32 1.442695, %v5281_v1  ;;  %v5284_v52 = vsub.f32 %v11264_v6, %v5230_v9  ;;  %v5337_v15 = vmul.f32 1.442695, %v5282_v62  ;;  %v11272_v62 = vld [vmem:[#allocation66_spill] sm:$0xff] }
 0x7cc   : > { %5391 = vperm.xlu1 %6521, %v10212_v39   ;;  %v10222_v21 = vpop.eup %6878  ;;  %6898 = vpow2.f32 %v5315_v5  ;;  %v5238_v37 = vrot.slane %v10220_v13, %v11003_v14  ;;  %v11265_v5 = vld [vmem:[#allocation51_spill] sm:$0xff]  ;;  %v5339_v19 = vmul.f32 1.442695, %v5283_v16  ;;  %v5210_v20 = vrot.slane %v10186_v7, %v11007_v32 }
 0x7cd   : > { %v10224_v42 = vpop.eup %6880  ;;  %6900 = vpow2.f32 %v5317_v51  ;;  %v5285_v12 = vsub.f32 %v11265_v5, %v5234_v29  ;;  %v5286_v51 = vsub.f32 %v11266_v17, %v5234_v29  ;;  %v5341_v30 = vmul.f32 1.442695, %v5284_v52  ;;  %v11273_v29 = vld [vmem:[#allocation61_spill] sm:$0xff] }
 0x7ce   : > { %v10232_v43 = vpop.eup %6882  ;;  %6902 = vpow2.f32 %v5323_v27  ;;  %v5287_v27 = vsub.f32 %v11267_v48, %v5238_v37  ;;  %v5242_v7 = vrot.slane %v10220_v13, %v11007_v32 }
 0x7cf   : > { %5394 = vperm.xlu0 %6520, %v10222_v21   ;;  %v10234_v26 = vpop.eup %6884  ;;  %6904 = vpow2.f32 %v5325_v56  ;;  %v5343_v25 = vmul.f32 1.442695, %v5285_v12  ;;  %v5288_v56 = vsub.f32 %v11268_v18, %v5238_v37  ;;  %v5345_v35 = vmul.f32 1.442695, %v5286_v51 }
 0x7d0   : > { %5397 = vperm.xlu1 %6521, %v10224_v42   ;;  %v10242_v45 = vpop.eup %6886  ;;  %6906 = vpow2.f32 %v5327_v55  ;;  %v11269_v55 = vld [vmem:[#allocation64_spill] sm:$0xff]  ;;  %v5347_v47 = vmul.f32 1.442695, %v5287_v27  ;;  %v5290_v38 = vsub.f32 %v11273_v29, %v5242_v7 }
 0x7d1   : > { %v10244_v24 = vpop.eup %6888  ;;  %6908 = vpow2.f32 %v5329_v61  ;;  %v5273_v2 = vsub.f32 %v11269_v55, %v5210_v20  ;;  %v11270_v61 = vld [vmem:[#allocation59_spill] sm:$0xff]  ;;  %v5349_v46 = vmul.f32 1.442695, %v5288_v56 }
 0x7d2   : > { %v10252_v53 = vpop.eup %6890  ;;  %6910 = vpow2.f32 %v5331_v49  ;;  %v5274_v9 = vsub.f32 %v11270_v61, %v5210_v20  ;;  %v5353_v52 = vmul.f32 1.442695, %v5290_v38 }
 0x7d3   : > { %5400 = vperm.xlu0 %6520, %v10232_v43   ;;  %v10254_v0 = vpop.eup %6892  ;;  %6912 = vpow2.f32 %v5333_v58  ;;  %v5319_v10 = vmul.f32 1.442695, %v5273_v2  ;;  %v5289_v58 = vsub.f32 %v11272_v62, %v5242_v7 }
 0x7d4   : > { %5403 = vperm.xlu1 %6521, %v10234_v26   ;;  %v10262_v54 = vpop.eup %6894  ;;  %6914 = vpow2.f32 %v5335_v60  ;;  %v5321_v13 = vmul.f32 1.442695, %v5274_v9 }
 0x7d5   : > { %v10264_v23 = vpop.eup %6896  ;;  %6916 = vpow2.f32 %v5337_v15  ;;  %v5351_v6 = vmul.f32 1.442695, %v5289_v58 }
 0x7d6   : > { %v10272_v28 = vpop.eup %6898  ;;  %6918 = vpow2.f32 %v5339_v19 }
 0x7d7   : > { %5406 = vperm.xlu0 %6520, %v10242_v45   ;;  %v10274_v36 = vpop.eup %6900  ;;  %6920 = vpow2.f32 %v5341_v30 }
 0x7d8   : > { %5409 = vperm.xlu1 %6521, %v10244_v24   ;;  %11262 = vst [vmem:[#allocation73_spill] sm:$0xff] %v10274_v36  ;;  %v10282_v59 = vpop.eup %6902  ;;  %6922 = vpow2.f32 %v5343_v25 }
 0x7d9   : > { %v10284_v4 = vpop.eup %6904  ;;  %6924 = vpow2.f32 %v5345_v35 }
 0x7da   : > { %v10292_v3 = vpop.eup %6906  ;;  %6926 = vpow2.f32 %v5347_v47 }
 0x7db   : > { %5412 = vperm.xlu0 %6520, %v10252_v53   ;;  %v10294_v44 = vpop.eup %6908  ;;  %6928 = vpow2.f32 %v5349_v46 }
 0x7dc   : > { %5415 = vperm.xlu1 %6521, %v10254_v0   ;;  %v10302_v41 = vpop.eup %6910  ;;  %6930 = vpow2.f32 %v5319_v10 }
 0x7dd   : > { %v10304_v57 = vpop.eup %6912  ;;  %6932 = vpow2.f32 %v5321_v13 }
 0x7de   : > { %v10312_v1 = vpop.eup %6914  ;;  %6934 = vpow2.f32 %v5351_v6 }
 0x7df   : > { %5418 = vperm.xlu0 %6520, %v10262_v54   ;;  %v10314_v49 = vpop.eup %6916  ;;  %6936 = vpow2.f32 %v5353_v52 }
 0x7e0   : > { %5421 = vperm.xlu1 %6521, %v10264_v23   ;;  %11271 = vst [vmem:[#allocation68_spill] sm:$0xff] %v10314_v49  ;;  %v10320_v16 = vpop.eup %6918 }
 0x7e1   : > { %11274 = vst [vmem:[#allocation89_spill] sm:$0xff] %v10320_v16  ;;  %v10322_v60 = vpop.eup %6920 }
 0x7e2   : > { %11275 = vst [vmem:[#allocation70_spill] sm:$0xff] %v10322_v60  ;;  %v10326_v15 = vpop.eup %6922 }
 0x7e3   : > { %5424 = vperm.xlu0 %6520, %v10272_v28   ;;  %11276 = vst [vmem:[#allocation72_spill] sm:$0xff] %v10326_v15  ;;  %v10328_v37 = vpop.eup %6924 }
 0x7e4   : > { %5427 = vperm.xlu1 %6521, %v10274_v36   ;;  %11277 = vst [vmem:[#allocation90_spill] sm:$0xff] %v10328_v37  ;;  %v10332_v5 = vpop.eup %6926 }
 0x7e5   : > { %11278 = vst [vmem:[#allocation85_spill] sm:$0xff] %v10332_v5  ;;  %v10334_v12 = vpop.eup %6928 }
 0x7e6   : > { %11279 = vst [vmem:[#allocation78_spill] sm:$0xff] %v10334_v12  ;;  %v10338_v19 = vpop.eup %6930 }
 0x7e7   : > { %5436 = vperm.xlu0 %6520, %v10282_v59   ;;  %11280 = vst [vmem:[#allocation79_spill] sm:$0xff] %v10338_v19  ;;  %v10340_v17 = vpop.eup %6932 }
 0x7e8   : > { %5439 = vperm.xlu1 %6521, %v10284_v4   ;;  %11281 = vst [vmem:[#allocation88_spill] sm:$0xff] %v10340_v17  ;;  %v10344_v51 = vpop.eup %6934 }
 0x7e9   : > { %11282 = vst [vmem:[#allocation83_spill] sm:$0xff] %v10344_v51  ;;  %v10346_v30 = vpop.eup %6936 }
 0x7ea   : > { %11283 = vst [vmem:[#allocation80_spill] sm:$0xff] %v10346_v30 }
 0x7eb   : > { %5442 = vperm.xlu0 %6520, %v10292_v3  }
 0x7ec   : > { %5445 = vperm.xlu1 %6521, %v10294_v44  }
 0x7ef   : > { %5448 = vperm.xlu0 %6520, %v10302_v41  }
 0x7f0   : > { %5451 = vperm.xlu1 %6521, %v10304_v57  }
 0x7f3   : > { %5454 = vperm.xlu0 %6520, %v10312_v1  }
 0x7f4   : > { %5457 = vperm.xlu1 %6521, %v10314_v49  }
 0x7f7   : > { %5460 = vperm.xlu0 %6520, %v10320_v16  }
 0x7f8   : > { %5463 = vperm.xlu1 %6521, %v10322_v60  }
 0x7fb   : > { %5466 = vperm.xlu0 %6520, %v10326_v15  }
 0x7fc   : > { %5469 = vperm.xlu1 %6521, %v10328_v37  }
 0x7ff   : > { %5472 = vperm.xlu0 %6520, %v10332_v5  }
 0x800   : > { %5475 = vperm.xlu1 %6521, %v10334_v12  }
 0x803   : > { %5430 = vperm.xlu0 %6520, %v10338_v19  }
 0x804   : > { %5433 = vperm.xlu1 %6521, %v10340_v17  }
 0x807   : > { %5478 = vperm.xlu0 %6520, %v10344_v51  }
 0x808   : > { %5481 = vperm.xlu1 %6521, %v10346_v30  }
 0x84a   : > { %v5389_v20 = vpop.permute.xlu0 %5388 }
 0x84b   : > { %v5392_v48 = vpop.permute.xlu1 %5391  ;;  %v5486_v12 = vrot.slane %v5389_v20, %v8534_v8 }
 0x84c   : > { %v5490_v5 = vrot.slane %v5392_v48, %v8541_v50 }
 0x84e   : > { %v5395_v27 = vpop.permute.xlu0 %5394 }
 0x84f   : > { %v5398_v25 = vpop.permute.xlu1 %5397  ;;  %v5495_v30 = vrot.slane %v5395_v27, %v8534_v8  ;;  %v5491_v27 = vsel %vm1547_vm1, %v5490_v5, %v5486_v12 }
 0x850   : > { %v5499_v51 = vrot.slane %v5398_v25, %v8541_v50 }
 0x852   : > { %v5401_v18 = vpop.permute.xlu0 %5400  ;;  %v5500_v60 = vsel %vm1547_vm1, %v5499_v51, %v5495_v30 }
 0x853   : > { %v5404_v56 = vpop.permute.xlu1 %5403  ;;  %v5504_v17 = vrot.slane %v5401_v18, %v8534_v8 }
 0x854   : > { %v5508_v19 = vrot.slane %v5404_v56, %v8541_v50  ;;  %v5627_v56 = vsel %vm1684_vm2, %v5500_v60, %v5491_v27 }
 0x856   : > { %v5407_v35 = vpop.permute.xlu0 %5406  ;;  %v5509_v25 = vsel %vm1547_vm1, %v5508_v19, %v5504_v17 }
 0x857   : > { %v5410_v55 = vpop.permute.xlu1 %5409  ;;  %v5513_v49 = vrot.slane %v5407_v35, %v8534_v8  ;;  %v5628_v48 = vsel %vm1686_vm3, %v5509_v25, %v5627_v56 }
 0x858   : > { %v5517_v15 = vrot.slane %v5410_v55, %v8541_v50 }
 0x85a   : > { %v5413_v2 = vpop.permute.xlu0 %5412  ;;  %v5518_v20 = vsel %vm1547_vm1, %v5517_v15, %v5513_v49 }
 0x85b   : > { %v5416_v7 = vpop.permute.xlu1 %5415  ;;  %v5522_v51 = vrot.slane %v5413_v2, %v8534_v8  ;;  %v5629_v55 = vsel %vm1688_vm4, %v5518_v20, %v5628_v48 }
 0x85c   : > { %v5526_v32 = vrot.slane %v5416_v7, %v8541_v50 }
 0x85e   : > { %v5419_v47 = vpop.permute.xlu0 %5418 }
 0x85f   : > { %v5422_v61 = vpop.permute.xlu1 %5421  ;;  %v5531_v35 = vrot.slane %v5419_v47, %v8534_v8 }
 0x860   : > { %v5535_v30 = vrot.slane %v5422_v61, %v8541_v50 }
 0x862   : > { %v5425_v9 = vpop.permute.xlu0 %5424 }
 0x863   : > { %v5428_v46 = vpop.permute.xlu1 %5427  ;;  %v5540_v5 = vrot.slane %v5425_v9, %v8534_v8 }
 0x864   : > { %v5544_v19 = vrot.slane %v5428_v46, %v8541_v50  ;;  %v5527_v46 = vsel %vm1547_vm1, %v5526_v32, %v5522_v51 }
 0x866   : > { %v5437_v10 = vpop.permute.xlu0 %5436 }
 0x867   : > { %v5440_v62 = vpop.permute.xlu1 %5439  ;;  %v5558_v47 = vrot.slane %v5437_v10, %v8534_v8 }
 0x868   : > { %v5562_v7 = vrot.slane %v5440_v62, %v8541_v50 }
 0x86a   : > { %v5443_v58 = vpop.permute.xlu0 %5442  ;;  %v5563_v48 = vsel %vm1547_vm1, %v5562_v7, %v5558_v47 }
 0x86b   : > { %v5446_v13 = vpop.permute.xlu1 %5445  ;;  %v5567_v60 = vrot.slane %v5443_v58, %v8534_v8  ;;  %v5536_v58 = vsel %vm1547_vm1, %v5535_v30, %v5531_v35 }
 0x86c   : > { %v5571_v12 = vrot.slane %v5446_v13, %v8541_v50 }
 0x86e   : > { %v5449_v29 = vpop.permute.xlu0 %5448 }
 0x86f   : > { %v5452_v38 = vpop.permute.xlu1 %5451  ;;  %v5576_v15 = vrot.slane %v5449_v29, %v8534_v8  ;;  %v5572_v29 = vsel %vm1547_vm1, %v5571_v12, %v5567_v60 }
 0x870   : > { %v5580_v49 = vrot.slane %v5452_v38, %v8541_v50  ;;  %v5545_v38 = vsel %vm1547_vm1, %v5544_v19, %v5540_v5 }
 0x872   : > { %v5455_v6 = vpop.permute.xlu0 %5454 }
 0x873   : > { %v5458_v52 = vpop.permute.xlu1 %5457  ;;  %v5585_v9 = vrot.slane %v5455_v6, %v8534_v8 }
 0x874   : > { %v5589_v61 = vrot.slane %v5458_v52, %v8541_v50  ;;  %v5581_v52 = vsel %vm1547_vm1, %v5580_v49, %v5576_v15 }
 0x876   : > { %v5461_v37 = vpop.permute.xlu0 %5460  ;;  %v5590_v20 = vsel %vm1547_vm1, %v5589_v61, %v5585_v9 }
 0x877   : > { %v5464_v36 = vpop.permute.xlu1 %5463  ;;  %v5594_v25 = vrot.slane %v5461_v37, %v8534_v8  ;;  %v5630_v37 = vsel %vm1690_vm5, %v5527_v46, %v5629_v55 }
 0x878   : > { %v5598_v13 = vrot.slane %v5464_v36, %v8541_v50  ;;  %v5631_v30 = vsel %vm1692_vm6, %v5536_v58, %v5630_v37 }
 0x879   : > { %v5632_v60 = vsel %vm1694_vm7, %v5545_v38, %v5631_v30 }
 0x87a   : > { %v5467_v16 = vpop.permute.xlu0 %5466  ;;  %v5599_v51 = vsel %vm1547_vm1, %v5598_v13, %v5594_v25 }
 0x87b   : > { %v5470_v18 = vpop.permute.xlu1 %5469  ;;  %v5603_v10 = vrot.slane %v5467_v16, %v8534_v8  ;;  %v5634_v16 = vsel %vm1684_vm2, %v5572_v29, %v5563_v48 }
 0x87c   : > { %v5607_v62 = vrot.slane %v5470_v18, %v8541_v50  ;;  %v5635_v35 = vsel %vm1686_vm3, %v5581_v52, %v5634_v16 }
 0x87e   : > { %v5473_v17 = vpop.permute.xlu0 %5472  ;;  %v5608_v19 = vsel %vm1547_vm1, %v5607_v62, %v5603_v10 }
 0x87f   : > { %v5476_v2 = vpop.permute.xlu1 %5475  ;;  %v5612_v32 = vrot.slane %v5473_v17, %v8534_v8  ;;  %v5636_v17 = vsel %vm1688_vm4, %v5590_v20, %v5635_v35 }
 0x880   : > { %v5616_v6 = vrot.slane %v5476_v2, %v8541_v50  ;;  %v5637_v7 = vsel %vm1690_vm5, %v5599_v51, %v5636_v17 }
 0x881   : > { %v5638_v9 = vsel %vm1692_vm6, %v5608_v19, %v5637_v7 }
 0x882   : > { %v5431_v27 = vpop.permute.xlu0 %5430  ;;  %v5617_v55 = vsel %vm1547_vm1, %v5616_v6, %v5612_v32 }
 0x883   : > { %v5434_v56 = vpop.permute.xlu1 %5433  ;;  %v5549_v36 = vrot.slane %v5431_v27, %v8534_v8  ;;  %v5639_v58 = vsel %vm1694_vm7, %v5617_v55, %v5638_v9 }
 0x884   : > { %v5553_v18 = vrot.slane %v5434_v56, %v8541_v50 }
 0x886   : > { %v5479_v5 = vpop.permute.xlu0 %5478  ;;  %v5554_v12 = vsel %vm1547_vm1, %v5553_v18, %v5549_v36 }
 0x887   : > { %v5482_v49 = vpop.permute.xlu1 %5481  ;;  %v5621_v15 = vrot.slane %v5479_v5, %v8534_v8  ;;  %v5633_v2 = vsel %vm1696_vm8, %v5554_v12, %v5632_v60 }
 0x888   : > { %v5625_v47 = vrot.slane %v5482_v49, %v8541_v50  ;;  %v5643_v61 = vsel %vm345_vm0, %v5633_v2, 0.0 }
 0x889   : > { %5644 = vadd.xlane.f32.xlu0 %v5643_v61 }
 0x88a   : > { %v5626_v46 = vsel %vm1547_vm1, %v5625_v47, %v5621_v15 }
 0x88b   : > { %v5640_v13 = vsel %vm1696_vm8, %v5626_v46, %v5639_v58  ;;  %v11288_v46 = vld [vmem:[#allocation70_spill] sm:$0xff] }
 0x88c   : > { %v5646_v25 = vsel %vm345_vm0, %v5640_v13, 0.0  ;;  %v11289_v13 = vld [vmem:[#allocation73_spill] sm:$0xff] }
 0x88d   : > { %5647 = vadd.xlane.f32.xlu1 %v5646_v25 }
 0x916   : > { %v10414_v38 = vpop.xlane.xlu0 %5644 }
 0x917   : > { %v5654_v29 = vrot.slane %v10414_v38, %v10986_v22  ;;  %v5658_v62 = vrot.slane %v10414_v38, %v10987_v40  ;;  %v5662_v10 = vrot.slane %v10414_v38, %v10990_v34  ;;  %v5666_v27 = vrot.slane %v10414_v38, %v10993_v11 }
 0x918   : > { %v5670_v6 = vrot.slane %v10414_v38, %v10996_v33  ;;  %v5674_v48 = vrot.slane %v10414_v38, %v11000_v31 }
 0x919   : > { %6938 = vrcp.f32 %v5654_v29 }
 0x91a   : > { %6940 = vrcp.f32 %v5658_v62  ;;  %v10428_v37 = vpop.xlane.xlu1 %5647 }
 0x91b   : > { %6942 = vrcp.f32 %v5662_v10  ;;  %v5710_v15 = vrot.slane %v10428_v37, %v11003_v14  ;;  %v11291_v10 = vld [vmem:[#allocation78_spill] sm:$0xff] }
 0x91c   : > { %6944 = vrcp.f32 %v5666_v27 }
 0x91d   : > { %6946 = vrcp.f32 %v5670_v6 }
 0x91e   : > { %6948 = vrcp.f32 %v5674_v48 }
 0x923   : > { %v6939_v52 = vpop.eup %6938 }
 0x924   : > { %v5733_v32 = vmul.f32 %v6939_v52, %v10212_v39  ;;  %v5732_v56 = vmul.f32 %v6939_v52, %v10210_v63  ;;  %v6941_v36 = vpop.eup %6940  ;;  %v5686_v39 = vrot.slane %v10428_v37, %v10986_v22  ;;  %v5678_v63 = vrot.slane %v10414_v38, %v11003_v14  ;;  %v11292_v52 = vld [vmem:[#allocation85_spill] sm:$0xff] }
 0x925   : > { %v5736_v20 = vmul.f32 %v6941_v36, %v10224_v42  ;;  %v5735_v18 = vmul.f32 %v6941_v36, %v10222_v21  ;;  %v6943_v16 = vpop.eup %6942  ;;  %v5690_v21 = vrot.slane %v10428_v37, %v10987_v40  ;;  %v5698_v40 = vrot.slane %v10428_v37, %v10993_v11 }
 0x926   : > { %5815 = vperm.xlu1 %6521, %v5733_v32   ;;  %5812 = vperm.xlu0 %6520, %v5732_v56   ;;  %v5739_v51 = vmul.f32 %v6943_v16, %v10234_v26  ;;  %v5738_v30 = vmul.f32 %v6943_v16, %v10232_v43  ;;  %v6945_v35 = vpop.eup %6944  ;;  %6950 = vrcp.f32 %v5686_v39  ;;  %v5694_v26 = vrot.slane %v10428_v37, %v10990_v34  ;;  %v11293_v56 = vld [vmem:[#allocation88_spill] sm:$0xff]  ;;  %v11296_v39 = vld [vmem:[#allocation83_spill] sm:$0xff] }
 0x927   : > { %6952 = vrcp.f32 %v5678_v63  ;;  %v5742_v42 = vmul.f32 %v6945_v35, %v10244_v24  ;;  %v5741_v22 = vmul.f32 %v6945_v35, %v10242_v45  ;;  %v6947_v19 = vpop.eup %6946  ;;  %v5702_v34 = vrot.slane %v10428_v37, %v10996_v33 }
 0x928   : > { %6954 = vrcp.f32 %v5690_v21  ;;  %v5745_v43 = vmul.f32 %v6947_v19, %v10254_v0  ;;  %v5744_v5 = vmul.f32 %v6947_v19, %v10252_v53  ;;  %v6949_v12 = vpop.eup %6948  ;;  %v5706_v11 = vrot.slane %v10428_v37, %v11000_v31 }
 0x929   : > { %6956 = vrcp.f32 %v5694_v26  ;;  %v5748_v45 = vmul.f32 %v6949_v12, %v10264_v23  ;;  %v5747_v60 = vmul.f32 %v6949_v12, %v10262_v54 }
 0x92a   : > { %5821 = vperm.xlu1 %6521, %v5736_v20   ;;  %5818 = vperm.xlu0 %6520, %v5735_v18   ;;  %6958 = vrcp.f32 %v5698_v40  ;;  %v11295_v18 = vld [vmem:[#allocation80_spill] sm:$0xff] }
 0x92b   : > { %6960 = vrcp.f32 %v5702_v34 }
 0x92c   : > { %6962 = vrcp.f32 %v5706_v11 }
 0x92d   : > { %6964 = vrcp.f32 %v5710_v15 }
 0x92e   : > { %5827 = vperm.xlu1 %6521, %v5739_v51   ;;  %5824 = vperm.xlu0 %6520, %v5738_v30  }
 0x930   : > { %v6951_v24 = vpop.eup %6950 }
 0x931   : > { %v6953_v17 = vpop.eup %6952  ;;  %v5756_v53 = vmul.f32 %v6951_v24, %v10282_v59  ;;  %v5757_v23 = vmul.f32 %v6951_v24, %v10284_v4  ;;  %v11284_v4 = vld [vmem:[#allocation18_spill] sm:$0xff] }
 0x932   : > { %5833 = vperm.xlu1 %6521, %v5742_v42   ;;  %5830 = vperm.xlu0 %6520, %v5741_v22   ;;  %v5750_v0 = vmul.f32 %v6953_v17, %v10272_v28  ;;  %v6955_v55 = vpop.eup %6954  ;;  %v5682_v7 = vrot.slane %v10414_v38, %v11284_v4  ;;  %v5714_v14 = vrot.slane %v10428_v37, %v11284_v4  ;;  %v11290_v38 = vld [vmem:[#allocation90_spill] sm:$0xff]  ;;  %v11294_v37 = vld [vmem:[#allocation79_spill] sm:$0xff] }
 0x933   : > { %v5759_v54 = vmul.f32 %v6955_v55, %v10292_v3  ;;  %v6957_v49 = vpop.eup %6956  ;;  %v5760_v59 = vmul.f32 %v6955_v55, %v10294_v44  ;;  %v11286_v44 = vld [vmem:[#allocation68_spill] sm:$0xff]  ;;  %v5751_v25 = vmul.f32 %v6953_v17, %v11289_v13 }
 0x934   : > { %v5762_v33 = vmul.f32 %v6957_v49, %v10302_v41  ;;  %v6959_v28 = vpop.eup %6958  ;;  %v5763_v3 = vmul.f32 %v6957_v49, %v10304_v57  ;;  %v11285_v41 = vld [vmem:[#allocation89_spill] sm:$0xff]  ;;  %6966 = vrcp.f32 %v5682_v7 }
 0x935   : > { %v5765_v31 = vmul.f32 %v6959_v28, %v10312_v1  ;;  %v6961_v2 = vpop.eup %6960  ;;  %v5766_v61 = vmul.f32 %v6959_v28, %v11286_v44  ;;  %v11287_v1 = vld [vmem:[#allocation72_spill] sm:$0xff]  ;;  %6968 = vrcp.f32 %v5714_v14 }
 0x936   : > { %5839 = vperm.xlu1 %6521, %v5745_v43   ;;  %5836 = vperm.xlu0 %6520, %v5744_v5   ;;  %v5768_v47 = vmul.f32 %v6961_v2, %v11285_v41  ;;  %v6963_v9 = vpop.eup %6962  ;;  %v5769_v58 = vmul.f32 %v6961_v2, %v11288_v46 }
 0x937   : > { %v5771_v57 = vmul.f32 %v6963_v9, %v11287_v1  ;;  %v5772_v29 = vmul.f32 %v6963_v9, %v11290_v38  ;;  %v6965_v62 = vpop.eup %6964 }
 0x938   : > { %v5775_v27 = vmul.f32 %v6965_v62, %v11291_v10  ;;  %v5774_v6 = vmul.f32 %v6965_v62, %v11292_v52 }
 0x93a   : > { %5845 = vperm.xlu1 %6521, %v5748_v45   ;;  %5842 = vperm.xlu0 %6520, %v5747_v60  }
 0x93e   : > { %5860 = vperm.xlu1 %6521, %v5756_v53   ;;  %5848 = vperm.xlu0 %6520, %v5750_v0   ;;  %v6967_v32 = vpop.eup %6966 }
 0x93f   : > { %v5754_v36 = vmul.f32 %v6967_v32, %v11293_v56  ;;  %v5753_v48 = vmul.f32 %v6967_v32, %v11294_v37  ;;  %v6969_v20 = vpop.eup %6968 }
 0x940   : > { %v5778_v16 = vmul.f32 %v6969_v20, %v11295_v18  ;;  %v5777_v63 = vmul.f32 %v6969_v20, %v11296_v39 }
 0x942   : > { %5866 = vperm.xlu1 %6521, %v5759_v54   ;;  %5863 = vperm.xlu0 %6520, %v5757_v23  }
 0x946   : > { %5872 = vperm.xlu1 %6521, %v5762_v33   ;;  %5869 = vperm.xlu0 %6520, %v5760_v59  }
 0x94a   : > { %5878 = vperm.xlu1 %6521, %v5765_v31   ;;  %5875 = vperm.xlu0 %6520, %v5763_v3  }
 0x94e   : > { %5884 = vperm.xlu1 %6521, %v5768_v47   ;;  %5881 = vperm.xlu0 %6520, %v5766_v61  }
 0x952   : > { %5890 = vperm.xlu1 %6521, %v5771_v57   ;;  %5887 = vperm.xlu0 %6520, %v5769_v58  }
 0x956   : > { %5851 = vperm.xlu1 %6521, %v5751_v25   ;;  %5893 = vperm.xlu0 %6520, %v5772_v29  }
 0x95a   : > { %5899 = vperm.xlu1 %6521, %v5775_v27   ;;  %5896 = vperm.xlu0 %6520, %v5774_v6  }
 0x95e   : > { %5857 = vperm.xlu1 %6521, %v5754_v36   ;;  %5854 = vperm.xlu0 %6520, %v5753_v48  }
 0x962   : > { %5905 = vperm.xlu1 %6521, %v5778_v16   ;;  %5902 = vperm.xlu0 %6520, %v5777_v63  }
 0x9a5   : > { %v5816_v51 = vpop.permute.xlu1 %5815  ;;  %v5813_v30 = vpop.permute.xlu0 %5812 }
 0x9a6   : > { %v5914_v33 = vrot.slane %v5816_v51, %v8541_v50  ;;  %v5910_v59 = vrot.slane %v5813_v30, %v8534_v8 }
 0x9a8   : > { %v5915_v44 = vsel %vm1547_vm1, %v5914_v33, %v5910_v59 }
 0x9a9   : > { %v5822_v35 = vpop.permute.xlu1 %5821  ;;  %v5819_v21 = vpop.permute.xlu0 %5818 }
 0x9aa   : > { %v5923_v23 = vrot.slane %v5822_v35, %v8541_v50  ;;  %v5919_v49 = vrot.slane %v5819_v21, %v8534_v8 }
 0x9ac   : > { %v5924_v7 = vsel %vm1547_vm1, %v5923_v23, %v5919_v49 }
 0x9ad   : > { %v5828_v42 = vpop.permute.xlu1 %5827  ;;  %v5825_v22 = vpop.permute.xlu0 %5824  ;;  %v6051_v1 = vsel %vm1684_vm2, %v5924_v7, %v5915_v44 }
 0x9ae   : > { %v5932_v28 = vrot.slane %v5828_v42, %v8541_v50  ;;  %v5928_v15 = vrot.slane %v5825_v22, %v8534_v8 }
 0x9b0   : > { %v5933_v61 = vsel %vm1547_vm1, %v5932_v28, %v5928_v15 }
 0x9b1   : > { %v5834_v19 = vpop.permute.xlu1 %5833  ;;  %v5831_v26 = vpop.permute.xlu0 %5830  ;;  %v6052_v38 = vsel %vm1686_vm3, %v5933_v61, %v6051_v1 }
 0x9b2   : > { %v5941_v2 = vrot.slane %v5834_v19, %v8541_v50  ;;  %v5937_v4 = vrot.slane %v5831_v26, %v8534_v8 }
 0x9b4   : > { %v5942_v57 = vsel %vm1547_vm1, %v5941_v2, %v5937_v4 }
 0x9b5   : > { %v5840_v43 = vpop.permute.xlu1 %5839  ;;  %v5837_v5 = vpop.permute.xlu0 %5836  ;;  %v6053_v10 = vsel %vm1688_vm4, %v5942_v57, %v6052_v38 }
 0x9b6   : > { %v5950_v41 = vrot.slane %v5840_v43, %v8541_v50  ;;  %v5946_v47 = vrot.slane %v5837_v5, %v8534_v8 }
 0x9b8   : > { %v5951_v46 = vsel %vm1547_vm1, %v5950_v41, %v5946_v47 }
 0x9b9   : > { %v5846_v12 = vpop.permute.xlu1 %5845  ;;  %v5843_v40 = vpop.permute.xlu0 %5842  ;;  %v6054_v56 = vsel %vm1690_vm5, %v5951_v46, %v6053_v10 }
 0x9ba   : > { %v5959_v58 = vrot.slane %v5846_v12, %v8541_v50  ;;  %v5955_v13 = vrot.slane %v5843_v40, %v8534_v8 }
 0x9bc   : > { %v5960_v20 = vsel %vm1547_vm1, %v5959_v58, %v5955_v13 }
 0x9bd   : > { %v5861_v24 = vpop.permute.xlu1 %5860  ;;  %v5849_v45 = vpop.permute.xlu0 %5848 }
 0x9be   : > { %v5982_v27 = vrot.slane %v5861_v24, %v8534_v8  ;;  %v5964_v18 = vrot.slane %v5849_v45, %v8534_v8  ;;  %v6055_v45 = vsel %vm1692_vm6, %v5960_v20, %v6054_v56 }
 0x9c1   : > { %v5867_v60 = vpop.permute.xlu1 %5866  ;;  %v5864_v17 = vpop.permute.xlu0 %5863 }
 0x9c2   : > { %v5986_v25 = vrot.slane %v5864_v17, %v8541_v50  ;;  %v5991_v36 = vrot.slane %v5867_v60, %v8534_v8 }
 0x9c4   : > { %v5987_v16 = vsel %vm1547_vm1, %v5986_v25, %v5982_v27 }
 0x9c5   : > { %v5873_v34 = vpop.permute.xlu1 %5872  ;;  %v5870_v53 = vpop.permute.xlu0 %5869 }
 0x9c6   : > { %v5995_v29 = vrot.slane %v5870_v53, %v8541_v50  ;;  %v6000_v37 = vrot.slane %v5873_v34, %v8534_v8 }
 0x9c8   : > { %v5996_v63 = vsel %vm1547_vm1, %v5995_v29, %v5991_v36 }
 0x9c9   : > { %v5879_v0 = vpop.permute.xlu1 %5878  ;;  %v5876_v55 = vpop.permute.xlu0 %5875  ;;  %v6058_v60 = vsel %vm1684_vm2, %v5996_v63, %v5987_v16 }
 0x9ca   : > { %v6004_v62 = vrot.slane %v5876_v55, %v8541_v50  ;;  %v6009_v51 = vrot.slane %v5879_v0, %v8534_v8 }
 0x9cc   : > { %v6005_v30 = vsel %vm1547_vm1, %v6004_v62, %v6000_v37 }
 0x9cd   : > { %v5885_v11 = vpop.permute.xlu1 %5884  ;;  %v5882_v54 = vpop.permute.xlu0 %5881  ;;  %v6059_v34 = vsel %vm1686_vm3, %v6005_v30, %v6058_v60 }
 0x9ce   : > { %v6013_v48 = vrot.slane %v5882_v54, %v8541_v50  ;;  %v6018_v21 = vrot.slane %v5885_v11, %v8534_v8 }
 0x9d0   : > { %v6014_v5 = vsel %vm1547_vm1, %v6013_v48, %v6009_v51 }
 0x9d1   : > { %v5891_v31 = vpop.permute.xlu1 %5890  ;;  %v5888_v3 = vpop.permute.xlu0 %5887  ;;  %v6060_v11 = vsel %vm1688_vm4, %v6014_v5, %v6059_v34 }
 0x9d2   : > { %v6022_v39 = vrot.slane %v5888_v3, %v8541_v50  ;;  %v6027_v12 = vrot.slane %v5891_v31, %v8534_v8 }
 0x9d4   : > { %v6023_v17 = vsel %vm1547_vm1, %v6022_v39, %v6018_v21 }
 0x9d5   : > { %v5852_v9 = vpop.permute.xlu1 %5851  ;;  %v5894_v14 = vpop.permute.xlu0 %5893  ;;  %v6061_v59 = vsel %vm1690_vm5, %v6023_v17, %v6060_v11 }
 0x9d6   : > { %v5968_v52 = vrot.slane %v5852_v9, %v8541_v50  ;;  %v6031_v35 = vrot.slane %v5894_v14, %v8541_v50 }
 0x9d8   : > { %v5969_v42 = vsel %vm1547_vm1, %v5968_v52, %v5964_v18  ;;  %v6032_v0 = vsel %vm1547_vm1, %v6031_v35, %v6027_v12 }
 0x9d9   : > { %v5900_v6 = vpop.permute.xlu1 %5899  ;;  %v5897_v32 = vpop.permute.xlu0 %5896  ;;  %v6056_v53 = vsel %vm1694_vm7, %v5969_v42, %v6055_v45  ;;  %v6062_v31 = vsel %vm1692_vm6, %v6032_v0, %v6061_v59 }
 0x9da   : > { %v6040_v22 = vrot.slane %v5900_v6, %v8541_v50  ;;  %v6036_v19 = vrot.slane %v5897_v32, %v8534_v8 }
 0x9dc   : > { %v6041_v54 = vsel %vm1547_vm1, %v6040_v22, %v6036_v19 }
 0x9dd   : > { %v5858_v26 = vpop.permute.xlu1 %5857  ;;  %v5855_v43 = vpop.permute.xlu0 %5854  ;;  %v6063_v3 = vsel %vm1694_vm7, %v6041_v54, %v6062_v31 }
 0x9de   : > { %v5977_v40 = vrot.slane %v5858_v26, %v8541_v50  ;;  %v5973_v24 = vrot.slane %v5855_v43, %v8534_v8 }
 0x9e0   : > { %v5978_v55 = vsel %vm1547_vm1, %v5977_v40, %v5973_v24 }
 0x9e1   : > { %v6057_v23 = vsel %vm1696_vm8, %v5978_v55, %v6056_v53  ;;  %v5906_v49 = vpop.permute.xlu1 %5905  ;;  %v5903_v33 = vpop.permute.xlu0 %5902 }
 0x9e2   : > { %6251 = vst.msk [vmem:[%s9877_s12 + $0x30] sm:$0xff] %vm345_vm0, %v6057_v23  ;;  %v6049_v28 = vrot.slane %v5906_v49, %v8541_v50  ;;  %v6045_v15 = vrot.slane %v5903_v33, %v8534_v8 }
 0x9e4   : > { %v6050_v2 = vsel %vm1547_vm1, %v6049_v28, %v6045_v15 }
 0x9e5   : > { %v6064_v50 = vsel %vm1696_vm8, %v6050_v2, %v6063_v3 }
 0x9e6   : > { %6252 = vst.msk [vmem:[%s9877_s12 + $0x38] sm:$0xff] %vm345_vm0, %v6064_v50 }
 0x9e7   : > { %7043 = shalt.err (!%p7040_p11)
}
 0x9e8   : > { %s7044_s28 = scalar_lea.hbm %s10548_s9, 1024  ;;  %s7048_s24 = scalar_lea.hbm %s10609_s5, 2048 }
 0x9e9   : > { %p7045_p1 = scmp.ne.s32.totalorder %s10548_s9, %s7044_s28  ;;  %p7049_p5 = scmp.lt.u32.totalorder %s10548_s9, %s10609_s5 }
 0x9ea   : > { %p7050_p4 = scmp.lt.u32.totalorder %s7048_s24, %s7044_s28  ;;  %p7052_p0 = scmp.lt.u32.totalorder %s7044_s28, %s10548_s9 }
 0x9eb   : > { %p7046_p6 = pnand %p7045_p1, %p11297_p3 }
 0x9ec   : > { %p7051_p8 = por %p7050_p4, %p7049_p5 }
 0x9ed   : > { %p7047_p2 = pneg %p7046_p6 }
 0x9ee   : > { %p7053_p12 = por %p7052_p0, %p7051_p8 }
 0x9f0   : > { %p7054_p13 = pnand %p7053_p12, %p7047_p2 }
 0x9f2   : > { %7057 = shalt.err (!%p7054_p13)
}
 0x9f3   : > { %s7127_s13 = smov 128   ;;  %s7128_s21 = smov 8  }
 0x9f4   : > { %6357 = dma.vmem_to_hbm [thread:$0]  (%p11297_p3), %s10550_s17, 1024, %s10548_s9, %s6071_s29, %s7127_s13, %s7127_s13, %s7128_s21  }
 0x9f5 PF: > { %s6101_s0 = sand.u32 1, %s7096_s18   ;;  %p11298_p7 = scmp.ne.s32.totalorder %s10846_s8, 0 }
 0x9f6   : > { %p11299_p10 = scmp.ge.s32.totalorder %s7116_s23, 2  ;;  %s6102_s30 = scalar_lea.sflag [#allocation4], %s6101_s0 }
 0x9f8   : > { %p6367_p9 = pnand %p11299_p10, %p11298_p7 }
 0x9fa   : > { %7091 = dma.done.wait (!%p6367_p9), %s6102_s30, 1024  }
 0x9fb   : > { %7093 = vsyncadd (!%p6367_p9), %s6102_s30, 4294966272  ;;  %s24_s23 = sadd.s32 1, %s7116_s23   ;;  %s11300_s18 = smov %s7100_s19 }
 0x9fc   : > { %p21_p11 = scmp.ge.s32.totalorder %s24_s23, 4   ;;  %s11301_s19 = smov %s7104_s20 }
 0x9fd   : > { %s11302_s20 = smov %s7215_s7  ;;  %s11303_s21 = smov %s7112_s22 }
 0x9fe   : > { %s11304_s22 = smov %s11306_s26  ;;  %23 = sbr.rel (!%p21_p11) target bundleno = 10 (0xa), region = 101 }
 0xa05   :  { %6107 = vsyncpa [#allocation3], 1 }
 0xa06   :  { %6109 = vsyncpa [#allocation3 + $0x1], 1 }
 0xa07   :  { %6110 = vsyncpa [#allocation6], 1 }
 0xa08   :  { %6112 = vsyncpa [#allocation6 + $0x1], 1 }
 0xa09   :  { %6113 = vsyncpa [#allocation4], 1 }
 0xa0a   :  { %6115 = vsyncpa [#allocation4 + $0x1], 1 }

</bundles_post_ra>
